<compile_context>
chip_gen: v7x
topology: tpu7x:2x2x1
jax: 0.10.0
libtpu: 0.0.40
codegen_flags: <defaults>
</compile_context>

<pallas_src>
import jax
import jax.numpy as jnp
from jax.experimental import pallas as pl
from jax.experimental.pallas import tpu as pltpu

# ---------------------------------------------------------------------------
# Product-manifold configuration
# ---------------------------------------------------------------------------
SIGNATURE = ((-1.0, 2), (0.0, 2), (-1.0, 3))


def _component_layout(signature):
    comps = []
    i_off, a_off = 0, 0
    for curv, d in signature:
        a_dim = d if curv == 0.0 else d + 1
        comps.append((curv, d, i_off, a_off, a_dim))
        i_off += d
        a_off += a_dim
    return tuple(comps), i_off, a_off


COMPONENTS, PM_DIM, PM_AMBIENT = _component_layout(SIGNATURE)   # dim=7, ambient=9


# ---------------------------------------------------------------------------
# Lorentz-model helpers (pure jnp; used both inside the kernel and in the reference)
# ---------------------------------------------------------------------------
_NORM_CLAMP = 85.0   # exp(85) is still finite in f32; guards cosh/sinh overflow


def _cosh_sinhc(n):
    """cosh(n) and sinh(n)/n (with sinhc(0)=1) from a SINGLE exp pair."""
    nc = jnp.minimum(n, _NORM_CLAMP)
    e_pos = jnp.exp(nc)
    e_neg = jnp.exp(-nc)
    cosh = 0.5 * (e_pos + e_neg)
    sinh = 0.5 * (e_pos - e_neg)
    sinhc = jnp.where(nc < 1e-6, 1.0, sinh / jnp.maximum(nc, 1e-12))
    return cosh, sinhc


def _lorentz_expmap_sample(u_sp, v_sp):
    """expmap0 + parallel transport + expmap for one Lorentz factor.

    Works on SPATIAL coordinates only: the ambient projection matrix just prepends a
    zero time coordinate, so u = (0, u_sp), v = (0, v_sp) at the origin mu0 = (1, 0,...).
    Returns (mu_time, mu_spatial, z_time, z_spatial).
    """
    # expmap0: mu = (cosh(|u|), sinh(|u|)/|u| * u_sp)
    n_u = jnp.sqrt(jnp.sum(u_sp * u_sp, axis=-1, keepdims=True))
    cosh_u, sinhc_u = _cosh_sinhc(n_u)
    mu_t = cosh_u
    mu_sp = sinhc_u * u_sp
    # parallel transport of v from origin to mu:
    #   <mu, v>_L = mu_sp . v_sp ; coef = <mu,v>_L / (mu_t + 1) ; PT(v) = v + coef*(mu0 + mu)
    inner = jnp.sum(mu_sp * v_sp, axis=-1, keepdims=True)
    coef = inner / (mu_t + 1.0)
    w_t = inner                       # = coef * (mu_t + 1)
    w_sp = v_sp + coef * mu_sp
    # expmap at mu: ||w||_L = sqrt(w_sp.w_sp - w_t^2)
    sq = jnp.sum(w_sp * w_sp, axis=-1, keepdims=True) - w_t * w_t
    n_w = jnp.sqrt(jnp.maximum(sq, 0.0))
    cosh_w, sinhc_w = _cosh_sinhc(n_w)
    z_t = cosh_w * mu_t + sinhc_w * w_t
    z_sp = cosh_w * mu_sp + sinhc_w * w_sp
    return mu_t, mu_sp, z_t, z_sp


# ---------------------------------------------------------------------------
# Fused Pallas kernel: encoder -> expmap/sample -> decoder on one batch tile
# ---------------------------------------------------------------------------
def _vae_forward_kernel(x_ref, ew1_ref, eb1_ref, ew2_ref, eb2_ref,
                        dw1_ref, db1_ref, dw2_ref, db2_ref, eps_ref, o_ref):
    x = x_ref[...]
    F = x.shape[-1]

    # ---- encoder: Linear -> ReLU -> Linear ----
    h = jnp.maximum(
        jnp.dot(x, ew1_ref[...], preferred_element_type=jnp.float32) + eb1_ref[...], 0.0)
    z = jnp.dot(h, ew2_ref[...], preferred_element_type=jnp.float32) + eb2_ref[...]
    mean_t = z[:, :PM_DIM]                      # posterior mean in tangent plane at origin
    logvar = z[:, PM_DIM:]                      # posterior log-variance (intrinsic)

    var = jnp.exp(logvar) + 1e-8                # diag(Sigma)
    v_t = eps_ref[...] * jnp.sqrt(var)          # ~ N(0, Sigma) in intrinsic coords

    # ---- per-component expmap0 + wrapped-normal sampling (static unroll) ----
    mean_parts, samp_parts = [], []
    for curv, d, i_off, _, _ in COMPONENTS:
        u_sp = mean_t[:, i_off:i_off + d]
        v_sp = v_t[:, i_off:i_off + d]
        if curv == 0.0:                         # Euclidean factor: expmap is identity
            mean_parts.append(u_sp)
            samp_parts.append(u_sp + v_sp)
        else:                                   # Hyperbolic (Lorentz) factor
            mu_t, mu_sp, z_t, z_sp = _lorentz_expmap_sample(u_sp, v_sp)
            mean_parts += [mu_t, mu_sp]
            samp_parts += [z_t, z_sp]
        # TODO(synk): spherical (curv > 0) factors are not in this synthetic signature.

    z_samp = jnp.concatenate(samp_parts, axis=-1)        # (bm, PM_AMBIENT)

    # ---- decoder: Linear -> ReLU -> Linear ----
    hd = jnp.maximum(
        jnp.dot(z_samp, dw1_ref[...], preferred_element_type=jnp.float32) + db1_ref[...], 0.0)
    x_rec = jnp.dot(hd, dw2_ref[...], preferred_element_type=jnp.float32) + db2_ref[...]

    # ---- single lane-dense packed output: [x_rec | z_mean | var | zero pad] ----
    pad_w = o_ref.shape[-1] - (F + PM_AMBIENT + PM_DIM)
    pieces = [x_rec] + mean_parts + [var]
    if pad_w > 0:
        pieces.append(jnp.zeros((x.shape[0], pad_w), jnp.float32))
    o_ref[...] = jnp.concatenate(pieces, axis=-1).astype(o_ref.dtype)


# ---------------------------------------------------------------------------
# ProductSpaceVAE.forward wrapper
# ---------------------------------------------------------------------------
def _round_up(n, m):
    return ((n + m - 1) // m) * m


def product_space_vae_forward(params, x, eps, *, block_m=None):
    """Returns (x_reconstructed, z_means, sigmas) exactly like the torch forward."""
    B, F = x.shape
    if block_m is None:
        block_m = min(512, _round_up(B, 8))
    block_m = max(8, _round_up(block_m, 8))

    # Pad batch so no remainder rows are silently dropped; slice back afterwards.
    B_pad = _round_up(B, block_m)
    if B_pad != B:
        x = jnp.pad(x, ((0, B_pad - B), (0, 0)))
        eps = jnp.pad(eps, ((0, B_pad - B), (0, 0)))

    out_w = _round_up(F + PM_AMBIENT + PM_DIM, 128)      # lane-dense packed output width

    ew1, eb1 = params["enc_w1"], params["enc_b1"]
    ew2, eb2 = params["enc_w2"], params["enc_b2"]
    dw1, db1 = params["dec_w1"], params["dec_b1"]
    dw2, db2 = params["dec_w2"], params["dec_b2"]

    rows = lambda i: (i, 0)       # batch-tiled operands
    full = lambda i: (0, 0)       # weights/biases: whole array every step

    packed = pl.pallas_call(
        _vae_forward_kernel,
        out_shape=jax.ShapeDtypeStruct((B_pad, out_w), jnp.float32),
        grid_spec=pltpu.PrefetchScalarGridSpec(
            num_scalar_prefetch=0,
            grid=(B_pad // block_m,),
            in_specs=[
                pl.BlockSpec((block_m, F), rows),
                pl.BlockSpec(ew1.shape, full),
                pl.BlockSpec(eb1.shape, full),
                pl.BlockSpec(ew2.shape, full),
                pl.BlockSpec(eb2.shape, full),
                pl.BlockSpec(dw1.shape, full),
                pl.BlockSpec(db1.shape, full),
                pl.BlockSpec(dw2.shape, full),
                pl.BlockSpec(db2.shape, full),
                pl.BlockSpec((block_m, PM_DIM), rows),
            ],
            out_specs=pl.BlockSpec((block_m, out_w), rows),
        ),
        compiler_params=pltpu.CompilerParams(dimension_semantics=("parallel",)),
    )(x, ew1, eb1, ew2, eb2, dw1, db1, dw2, db2, eps)

    # Unpack the lane-dense slab.
    x_rec = packed[:B, :F]
    z_means = packed[:B, F:F + PM_AMBIENT]
    var = packed[:B, F + PM_AMBIENT:F + PM_AMBIENT + PM_DIM]

    # sigmas = [diag_embed(exp(logvar_k) + 1e-8)] per manifold component (cheap glue).
    sigmas = []
    for _, d, i_off, _, _ in COMPONENTS:
        var_k = var[:, i_off:i_off + d]
        sigmas.append(var_k[:, :, None] * jnp.eye(d, dtype=var.dtype))
    return x_rec, z_means, sigmas


# ---------------------------------------------------------------------------
# Pure-JAX reference (for a correctness sanity check)
# ---------------------------------------------------------------------------
def _reference_forward(params, x, eps):
    hi = jax.lax.Precision.HIGHEST
    h = jnp.maximum(jnp.matmul(x, params["enc_w1"], precision=hi) + params["enc_b1"], 0.0)
    z = jnp.matmul(h, params["enc_w2"], precision=hi) + params["enc_b2"]
    mean_t, logvar = z[:, :PM_DIM], z[:, PM_DIM:]
    var = jnp.exp(logvar) + 1e-8
    v_t = eps * jnp.sqrt(var)
    mean_parts, samp_parts = [], []
    for curv, d, i_off, _, _ in COMPONENTS:
        u_sp = mean_t[:, i_off:i_off + d]
        v_sp = v_t[:, i_off:i_off + d]
        if curv == 0.0:
            mean_parts.append(u_sp)
            samp_parts.append(u_sp + v_sp)
        else:
            mu_t, mu_sp, z_t, z_sp = _lorentz_expmap_sample(u_sp, v_sp)
            mean_parts += [mu_t, mu_sp]
            samp_parts += [z_t, z_sp]
    z_mean = jnp.concatenate(mean_parts, axis=-1)
    z_samp = jnp.concatenate(samp_parts, axis=-1)
    hd = jnp.maximum(jnp.matmul(z_samp, params["dec_w1"], precision=hi) + params["dec_b1"], 0.0)
    x_rec = jnp.matmul(hd, params["dec_w2"], precision=hi) + params["dec_b2"]
    return x_rec, z_mean, var


# ---------------------------------------------------------------------------
# Deterministic parameter init (torch.nn.Linear-style uniform(-1/sqrt(fan_in), ...))
# ---------------------------------------------------------------------------
def init_linear(key, fan_in, fan_out):
    kw, kb = jax.random.split(key)
    bound = float(fan_in) ** -0.5
    w = jax.random.uniform(kw, (fan_in, fan_out), jnp.float32, -bound, bound)
    b = jax.random.uniform(kb, (1, fan_out), jnp.float32, -bound, bound)
    return w, b


if __name__ == "__main__":
    B, F, H = 64, 16, 32           # batch, n_features, hidden width

    key = jax.random.PRNGKey(0)
    kx, keps, k1, k2, k3, k4 = jax.random.split(key, 6)

    x = jax.random.normal(kx, (B, F), jnp.float32)
    eps = jax.random.normal(keps, (B, PM_DIM), jnp.float32)   # Monte-Carlo noise

    enc_w1, enc_b1 = init_linear(k1, F, H)
    enc_w2, enc_b2 = init_linear(k2, H, 2 * PM_DIM)            # == 2 * pm.dim
    dec_w1, dec_b1 = init_linear(k3, PM_AMBIENT, H)            # == pm.ambient_dim
    dec_w2, dec_b2 = init_linear(k4, H, F)

    params = dict(
        enc_w1=enc_w1, enc_b1=enc_b1, enc_w2=enc_w2, enc_b2=enc_b2,
        dec_w1=dec_w1, dec_b1=dec_b1, dec_w2=dec_w2, dec_b2=dec_b2,
    )

    fwd = jax.jit(lambda p, xx, ee: product_space_vae_forward(p, xx, ee))
    x_rec, z_means, sigmas = fwd(params, x, eps)
    jax.block_until_ready((x_rec, z_means, sigmas))

    assert x_rec.shape == (B, F)
    assert z_means.shape == (B, PM_AMBIENT)
    assert [s.shape for s in sigmas] == [(B, d, d) for _, d in SIGNATURE]

    # Sanity check against the pure-JAX reference.
    x_rec_ref, z_means_ref, var_ref = _reference_forward(params, x, eps)
    assert jnp.allclose(x_rec, x_rec_ref, rtol=1e-3, atol=1e-3)
    assert jnp.allclose(z_means, z_means_ref, rtol=1e-3, atol=1e-3)
    for (curv, d), sig in zip(SIGNATURE, sigmas):
        pass  # shapes already checked; diagonal values come straight from var

    print("KERNEL_OK")
</pallas_src>

<mosaic_0001>
module attributes {stable_mosaic.version = 11 : i64} {
  func.func @_vae_forward_kernel(%arg0: i32, %arg1: memref<64x16xf32, #tpu.memory_space<vmem>>, %arg2: memref<16x32xf32, #tpu.memory_space<vmem>>, %arg3: memref<1x32xf32, #tpu.memory_space<vmem>>, %arg4: memref<32x14xf32, #tpu.memory_space<vmem>>, %arg5: memref<1x14xf32, #tpu.memory_space<vmem>>, %arg6: memref<9x32xf32, #tpu.memory_space<vmem>>, %arg7: memref<1x32xf32, #tpu.memory_space<vmem>>, %arg8: memref<32x16xf32, #tpu.memory_space<vmem>>, %arg9: memref<1x16xf32, #tpu.memory_space<vmem>>, %arg10: memref<64x7xf32, #tpu.memory_space<vmem>>, %arg11: memref<64x128xf32, #tpu.memory_space<vmem>>) attributes {dimension_semantics = [#tpu.dimension_semantics<parallel>], iteration_bounds = array<i64: 1>, scalar_prefetch = 0 : i64, scratch_operands = 0 : i64, tpu.core_type = #tpu.core_type<tc>, window_params = [{transform_indices = @transform_0, window_bounds = array<i64: 64, 16>}, {pipeline_mode = #tpu.pipeline_mode<synchronous>, transform_indices = @transform_1, window_bounds = array<i64: 16, 32>}, {pipeline_mode = #tpu.pipeline_mode<synchronous>, transform_indices = @transform_2, window_bounds = array<i64: 1, 32>}, {pipeline_mode = #tpu.pipeline_mode<synchronous>, transform_indices = @transform_3, window_bounds = array<i64: 32, 14>}, {pipeline_mode = #tpu.pipeline_mode<synchronous>, transform_indices = @transform_4, window_bounds = array<i64: 1, 14>}, {pipeline_mode = #tpu.pipeline_mode<synchronous>, transform_indices = @transform_5, window_bounds = array<i64: 9, 32>}, {pipeline_mode = #tpu.pipeline_mode<synchronous>, transform_indices = @transform_6, window_bounds = array<i64: 1, 32>}, {pipeline_mode = #tpu.pipeline_mode<synchronous>, transform_indices = @transform_7, window_bounds = array<i64: 32, 16>}, {pipeline_mode = #tpu.pipeline_mode<synchronous>, transform_indices = @transform_8, window_bounds = array<i64: 1, 16>}, {transform_indices = @transform_9, window_bounds = array<i64: 64, 7>}, {transform_indices = @transform_10, window_bounds = array<i64: 64, 128>}]} {
    %c0 = arith.constant 0 : index
    %c0_0 = arith.constant 0 : index
    %0 = vector.load %arg1[%c0, %c0_0] : memref<64x16xf32, #tpu.memory_space<vmem>>, vector<64x16xf32>
    %c0_1 = arith.constant 0 : index
    %c0_2 = arith.constant 0 : index
    %1 = vector.load %arg2[%c0_1, %c0_2] : memref<16x32xf32, #tpu.memory_space<vmem>>, vector<16x32xf32>
    %cst = arith.constant dense<0.000000e+00> : vector<64x32xf32>
    %2 = tpu.matmul %0, %1, %cst {dimension_numbers = #tpu.dot_dimension_numbers<[1], [0], [0], [1], [0, 0, 1, 1], [], []>} : vector<64x16xf32>, vector<16x32xf32>, vector<64x32xf32> -> vector<64x32xf32>
    %c0_3 = arith.constant 0 : index
    %c0_4 = arith.constant 0 : index
    %3 = vector.load %arg3[%c0_3, %c0_4] : memref<1x32xf32, #tpu.memory_space<vmem>>, vector<1x32xf32>
    %4 = vector.broadcast %3 : vector<1x32xf32> to vector<64x32xf32>
    %5 = arith.addf %2, %4 : vector<64x32xf32>
    %cst_5 = arith.constant 0.000000e+00 : f32
    %6 = vector.broadcast %cst_5 : f32 to vector<64x32xf32>
    %7 = arith.maximumf %5, %6 : vector<64x32xf32>
    %c0_6 = arith.constant 0 : index
    %c0_7 = arith.constant 0 : index
    %8 = vector.load %arg4[%c0_6, %c0_7] : memref<32x14xf32, #tpu.memory_space<vmem>>, vector<32x14xf32>
    %cst_8 = arith.constant dense<0.000000e+00> : vector<64x14xf32>
    %9 = tpu.matmul %7, %8, %cst_8 {dimension_numbers = #tpu.dot_dimension_numbers<[1], [0], [0], [1], [0, 0, 1, 1], [], []>} : vector<64x32xf32>, vector<32x14xf32>, vector<64x14xf32> -> vector<64x14xf32>
    %c0_9 = arith.constant 0 : index
    %c0_10 = arith.constant 0 : index
    %10 = vector.load %arg5[%c0_9, %c0_10] : memref<1x14xf32, #tpu.memory_space<vmem>>, vector<1x14xf32>
    %11 = vector.broadcast %10 : vector<1x14xf32> to vector<64x14xf32>
    %12 = arith.addf %9, %11 : vector<64x14xf32>
    %13 = vector.extract_strided_slice %12 {offsets = [0, 0], sizes = [64, 7], strides = [1, 1]} : vector<64x14xf32> to vector<64x7xf32>
    %14 = vector.extract_strided_slice %12 {offsets = [0, 7], sizes = [64, 7], strides = [1, 1]} : vector<64x14xf32> to vector<64x7xf32>
    %15 = math.exp %14 : vector<64x7xf32>
    %cst_11 = arith.constant 9.99999993E-9 : f32
    %16 = vector.broadcast %cst_11 : f32 to vector<64x7xf32>
    %17 = arith.addf %15, %16 : vector<64x7xf32>
    %c0_12 = arith.constant 0 : index
    %c0_13 = arith.constant 0 : index
    %18 = vector.load %arg10[%c0_12, %c0_13] : memref<64x7xf32, #tpu.memory_space<vmem>>, vector<64x7xf32>
    %19 = math.sqrt %17 : vector<64x7xf32>
    %20 = arith.mulf %18, %19 : vector<64x7xf32>
    %21 = vector.extract_strided_slice %13 {offsets = [0, 0], sizes = [64, 2], strides = [1, 1]} : vector<64x7xf32> to vector<64x2xf32>
    %22 = vector.extract_strided_slice %20 {offsets = [0, 0], sizes = [64, 2], strides = [1, 1]} : vector<64x7xf32> to vector<64x2xf32>
    %23 = arith.mulf %21, %21 : vector<64x2xf32>
    %cst_14 = arith.constant dense<0.000000e+00> : vector<64xf32>
    %24 = vector.multi_reduction <add>, %23, %cst_14 [1] : vector<64x2xf32> to vector<64xf32>
    %25 = vector.shape_cast %24 : vector<64xf32> to vector<64x1xf32>
    %26 = math.sqrt %25 : vector<64x1xf32>
    %cst_15 = arith.constant 8.500000e+01 : f32
    %27 = vector.broadcast %cst_15 : f32 to vector<64x1xf32>
    %28 = arith.minimumf %26, %27 : vector<64x1xf32>
    %29 = math.exp %28 : vector<64x1xf32>
    %cst_16 = arith.constant 0.000000e+00 : f32
    %30 = vector.broadcast %cst_16 : f32 to vector<64x1xf32>
    %31 = arith.subf %30, %28 : vector<64x1xf32>
    %32 = math.exp %31 : vector<64x1xf32>
    %33 = arith.addf %29, %32 : vector<64x1xf32>
    %cst_17 = arith.constant 5.000000e-01 : f32
    %34 = vector.broadcast %cst_17 : f32 to vector<64x1xf32>
    %35 = arith.mulf %34, %33 : vector<64x1xf32>
    %36 = arith.subf %29, %32 : vector<64x1xf32>
    %cst_18 = arith.constant 5.000000e-01 : f32
    %37 = vector.broadcast %cst_18 : f32 to vector<64x1xf32>
    %38 = arith.mulf %37, %36 : vector<64x1xf32>
    %cst_19 = arith.constant 9.99999997E-7 : f32
    %39 = vector.broadcast %cst_19 : f32 to vector<64x1xf32>
    %40 = arith.cmpf olt, %28, %39 : vector<64x1xf32>
    %cst_20 = arith.constant 9.99999996E-13 : f32
    %41 = vector.broadcast %cst_20 : f32 to vector<64x1xf32>
    %42 = arith.maximumf %28, %41 : vector<64x1xf32>
    %43 = arith.divf %38, %42 : vector<64x1xf32>
    %cst_21 = arith.constant 1.000000e+00 : f32
    %44 = vector.broadcast %cst_21 : f32 to vector<64x1xf32>
    %45 = arith.select %40, %44, %43 : vector<64x1xi1>, vector<64x1xf32>
    %46 = vector.broadcast %45 : vector<64x1xf32> to vector<64x2xf32>
    %47 = arith.mulf %46, %21 : vector<64x2xf32>
    %48 = arith.mulf %47, %22 : vector<64x2xf32>
    %cst_22 = arith.constant dense<0.000000e+00> : vector<64xf32>
    %49 = vector.multi_reduction <add>, %48, %cst_22 [1] : vector<64x2xf32> to vector<64xf32>
    %50 = vector.shape_cast %49 : vector<64xf32> to vector<64x1xf32>
    %cst_23 = arith.constant 1.000000e+00 : f32
    %51 = vector.broadcast %cst_23 : f32 to vector<64x1xf32>
    %52 = arith.addf %35, %51 : vector<64x1xf32>
    %53 = arith.divf %50, %52 : vector<64x1xf32>
    %54 = vector.broadcast %53 : vector<64x1xf32> to vector<64x2xf32>
    %55 = arith.mulf %54, %47 : vector<64x2xf32>
    %56 = arith.addf %22, %55 : vector<64x2xf32>
    %57 = arith.mulf %56, %56 : vector<64x2xf32>
    %cst_24 = arith.constant dense<0.000000e+00> : vector<64xf32>
    %58 = vector.multi_reduction <add>, %57, %cst_24 [1] : vector<64x2xf32> to vector<64xf32>
    %59 = vector.shape_cast %58 : vector<64xf32> to vector<64x1xf32>
    %60 = arith.mulf %50, %50 : vector<64x1xf32>
    %61 = arith.subf %59, %60 : vector<64x1xf32>
    %cst_25 = arith.constant 0.000000e+00 : f32
    %62 = vector.broadcast %cst_25 : f32 to vector<64x1xf32>
    %63 = arith.maximumf %61, %62 : vector<64x1xf32>
    %64 = math.sqrt %63 : vector<64x1xf32>
    %cst_26 = arith.constant 8.500000e+01 : f32
    %65 = vector.broadcast %cst_26 : f32 to vector<64x1xf32>
    %66 = arith.minimumf %64, %65 : vector<64x1xf32>
    %67 = math.exp %66 : vector<64x1xf32>
    %cst_27 = arith.constant 0.000000e+00 : f32
    %68 = vector.broadcast %cst_27 : f32 to vector<64x1xf32>
    %69 = arith.subf %68, %66 : vector<64x1xf32>
    %70 = math.exp %69 : vector<64x1xf32>
    %71 = arith.addf %67, %70 : vector<64x1xf32>
    %cst_28 = arith.constant 5.000000e-01 : f32
    %72 = vector.broadcast %cst_28 : f32 to vector<64x1xf32>
    %73 = arith.mulf %72, %71 : vector<64x1xf32>
    %74 = arith.subf %67, %70 : vector<64x1xf32>
    %cst_29 = arith.constant 5.000000e-01 : f32
    %75 = vector.broadcast %cst_29 : f32 to vector<64x1xf32>
    %76 = arith.mulf %75, %74 : vector<64x1xf32>
    %cst_30 = arith.constant 9.99999997E-7 : f32
    %77 = vector.broadcast %cst_30 : f32 to vector<64x1xf32>
    %78 = arith.cmpf olt, %66, %77 : vector<64x1xf32>
    %cst_31 = arith.constant 9.99999996E-13 : f32
    %79 = vector.broadcast %cst_31 : f32 to vector<64x1xf32>
    %80 = arith.maximumf %66, %79 : vector<64x1xf32>
    %81 = arith.divf %76, %80 : vector<64x1xf32>
    %cst_32 = arith.constant 1.000000e+00 : f32
    %82 = vector.broadcast %cst_32 : f32 to vector<64x1xf32>
    %83 = arith.select %78, %82, %81 : vector<64x1xi1>, vector<64x1xf32>
    %84 = arith.mulf %73, %35 : vector<64x1xf32>
    %85 = arith.mulf %83, %50 : vector<64x1xf32>
    %86 = arith.addf %84, %85 : vector<64x1xf32>
    %87 = vector.broadcast %73 : vector<64x1xf32> to vector<64x2xf32>
    %88 = arith.mulf %87, %47 : vector<64x2xf32>
    %89 = vector.broadcast %83 : vector<64x1xf32> to vector<64x2xf32>
    %90 = arith.mulf %89, %56 : vector<64x2xf32>
    %91 = arith.addf %88, %90 : vector<64x2xf32>
    %92 = vector.extract_strided_slice %13 {offsets = [0, 2], sizes = [64, 2], strides = [1, 1]} : vector<64x7xf32> to vector<64x2xf32>
    %93 = vector.extract_strided_slice %20 {offsets = [0, 2], sizes = [64, 2], strides = [1, 1]} : vector<64x7xf32> to vector<64x2xf32>
    %94 = arith.addf %92, %93 : vector<64x2xf32>
    %95 = vector.extract_strided_slice %13 {offsets = [0, 4], sizes = [64, 3], strides = [1, 1]} : vector<64x7xf32> to vector<64x3xf32>
    %96 = vector.extract_strided_slice %20 {offsets = [0, 4], sizes = [64, 3], strides = [1, 1]} : vector<64x7xf32> to vector<64x3xf32>
    %97 = arith.mulf %95, %95 : vector<64x3xf32>
    %cst_33 = arith.constant dense<0.000000e+00> : vector<64xf32>
    %98 = vector.multi_reduction <add>, %97, %cst_33 [1] : vector<64x3xf32> to vector<64xf32>
    %99 = vector.shape_cast %98 : vector<64xf32> to vector<64x1xf32>
    %100 = math.sqrt %99 : vector<64x1xf32>
    %cst_34 = arith.constant 8.500000e+01 : f32
    %101 = vector.broadcast %cst_34 : f32 to vector<64x1xf32>
    %102 = arith.minimumf %100, %101 : vector<64x1xf32>
    %103 = math.exp %102 : vector<64x1xf32>
    %cst_35 = arith.constant 0.000000e+00 : f32
    %104 = vector.broadcast %cst_35 : f32 to vector<64x1xf32>
    %105 = arith.subf %104, %102 : vector<64x1xf32>
    %106 = math.exp %105 : vector<64x1xf32>
    %107 = arith.addf %103, %106 : vector<64x1xf32>
    %cst_36 = arith.constant 5.000000e-01 : f32
    %108 = vector.broadcast %cst_36 : f32 to vector<64x1xf32>
    %109 = arith.mulf %108, %107 : vector<64x1xf32>
    %110 = arith.subf %103, %106 : vector<64x1xf32>
    %cst_37 = arith.constant 5.000000e-01 : f32
    %111 = vector.broadcast %cst_37 : f32 to vector<64x1xf32>
    %112 = arith.mulf %111, %110 : vector<64x1xf32>
    %cst_38 = arith.constant 9.99999997E-7 : f32
    %113 = vector.broadcast %cst_38 : f32 to vector<64x1xf32>
    %114 = arith.cmpf olt, %102, %113 : vector<64x1xf32>
    %cst_39 = arith.constant 9.99999996E-13 : f32
    %115 = vector.broadcast %cst_39 : f32 to vector<64x1xf32>
    %116 = arith.maximumf %102, %115 : vector<64x1xf32>
    %117 = arith.divf %112, %116 : vector<64x1xf32>
    %cst_40 = arith.constant 1.000000e+00 : f32
    %118 = vector.broadcast %cst_40 : f32 to vector<64x1xf32>
    %119 = arith.select %114, %118, %117 : vector<64x1xi1>, vector<64x1xf32>
    %120 = vector.broadcast %119 : vector<64x1xf32> to vector<64x3xf32>
    %121 = arith.mulf %120, %95 : vector<64x3xf32>
    %122 = arith.mulf %121, %96 : vector<64x3xf32>
    %cst_41 = arith.constant dense<0.000000e+00> : vector<64xf32>
    %123 = vector.multi_reduction <add>, %122, %cst_41 [1] : vector<64x3xf32> to vector<64xf32>
    %124 = vector.shape_cast %123 : vector<64xf32> to vector<64x1xf32>
    %cst_42 = arith.constant 1.000000e+00 : f32
    %125 = vector.broadcast %cst_42 : f32 to vector<64x1xf32>
    %126 = arith.addf %109, %125 : vector<64x1xf32>
    %127 = arith.divf %124, %126 : vector<64x1xf32>
    %128 = vector.broadcast %127 : vector<64x1xf32> to vector<64x3xf32>
    %129 = arith.mulf %128, %121 : vector<64x3xf32>
    %130 = arith.addf %96, %129 : vector<64x3xf32>
    %131 = arith.mulf %130, %130 : vector<64x3xf32>
    %cst_43 = arith.constant dense<0.000000e+00> : vector<64xf32>
    %132 = vector.multi_reduction <add>, %131, %cst_43 [1] : vector<64x3xf32> to vector<64xf32>
    %133 = vector.shape_cast %132 : vector<64xf32> to vector<64x1xf32>
    %134 = arith.mulf %124, %124 : vector<64x1xf32>
    %135 = arith.subf %133, %134 : vector<64x1xf32>
    %cst_44 = arith.constant 0.000000e+00 : f32
    %136 = vector.broadcast %cst_44 : f32 to vector<64x1xf32>
    %137 = arith.maximumf %135, %136 : vector<64x1xf32>
    %138 = math.sqrt %137 : vector<64x1xf32>
    %cst_45 = arith.constant 8.500000e+01 : f32
    %139 = vector.broadcast %cst_45 : f32 to vector<64x1xf32>
    %140 = arith.minimumf %138, %139 : vector<64x1xf32>
    %141 = math.exp %140 : vector<64x1xf32>
    %cst_46 = arith.constant 0.000000e+00 : f32
    %142 = vector.broadcast %cst_46 : f32 to vector<64x1xf32>
    %143 = arith.subf %142, %140 : vector<64x1xf32>
    %144 = math.exp %143 : vector<64x1xf32>
    %145 = arith.addf %141, %144 : vector<64x1xf32>
    %cst_47 = arith.constant 5.000000e-01 : f32
    %146 = vector.broadcast %cst_47 : f32 to vector<64x1xf32>
    %147 = arith.mulf %146, %145 : vector<64x1xf32>
    %148 = arith.subf %141, %144 : vector<64x1xf32>
    %cst_48 = arith.constant 5.000000e-01 : f32
    %149 = vector.broadcast %cst_48 : f32 to vector<64x1xf32>
    %150 = arith.mulf %149, %148 : vector<64x1xf32>
    %cst_49 = arith.constant 9.99999997E-7 : f32
    %151 = vector.broadcast %cst_49 : f32 to vector<64x1xf32>
    %152 = arith.cmpf olt, %140, %151 : vector<64x1xf32>
    %cst_50 = arith.constant 9.99999996E-13 : f32
    %153 = vector.broadcast %cst_50 : f32 to vector<64x1xf32>
    %154 = arith.maximumf %140, %153 : vector<64x1xf32>
    %155 = arith.divf %150, %154 : vector<64x1xf32>
    %cst_51 = arith.constant 1.000000e+00 : f32
    %156 = vector.broadcast %cst_51 : f32 to vector<64x1xf32>
    %157 = arith.select %152, %156, %155 : vector<64x1xi1>, vector<64x1xf32>
    %158 = arith.mulf %147, %109 : vector<64x1xf32>
    %159 = arith.mulf %157, %124 : vector<64x1xf32>
    %160 = arith.addf %158, %159 : vector<64x1xf32>
    %161 = vector.broadcast %147 : vector<64x1xf32> to vector<64x3xf32>
    %162 = arith.mulf %161, %121 : vector<64x3xf32>
    %163 = vector.broadcast %157 : vector<64x1xf32> to vector<64x3xf32>
    %164 = arith.mulf %163, %130 : vector<64x3xf32>
    %165 = arith.addf %162, %164 : vector<64x3xf32>
    %166 = tpu.concatenate %86, %91, %94, %160, %165 in 1 : vector<64x1xf32>, vector<64x2xf32>, vector<64x2xf32>, vector<64x1xf32>, vector<64x3xf32> -> vector<64x9xf32>
    %c0_52 = arith.constant 0 : index
    %c0_53 = arith.constant 0 : index
    %167 = vector.load %arg6[%c0_52, %c0_53] : memref<9x32xf32, #tpu.memory_space<vmem>>, vector<9x32xf32>
    %cst_54 = arith.constant dense<0.000000e+00> : vector<64x32xf32>
    %168 = tpu.matmul %166, %167, %cst_54 {dimension_numbers = #tpu.dot_dimension_numbers<[1], [0], [0], [1], [0, 0, 1, 1], [], []>} : vector<64x9xf32>, vector<9x32xf32>, vector<64x32xf32> -> vector<64x32xf32>
    %c0_55 = arith.constant 0 : index
    %c0_56 = arith.constant 0 : index
    %169 = vector.load %arg7[%c0_55, %c0_56] : memref<1x32xf32, #tpu.memory_space<vmem>>, vector<1x32xf32>
    %170 = vector.broadcast %169 : vector<1x32xf32> to vector<64x32xf32>
    %171 = arith.addf %168, %170 : vector<64x32xf32>
    %cst_57 = arith.constant 0.000000e+00 : f32
    %172 = vector.broadcast %cst_57 : f32 to vector<64x32xf32>
    %173 = arith.maximumf %171, %172 : vector<64x32xf32>
    %c0_58 = arith.constant 0 : index
    %c0_59 = arith.constant 0 : index
    %174 = vector.load %arg8[%c0_58, %c0_59] : memref<32x16xf32, #tpu.memory_space<vmem>>, vector<32x16xf32>
    %cst_60 = arith.constant dense<0.000000e+00> : vector<64x16xf32>
    %175 = tpu.matmul %173, %174, %cst_60 {dimension_numbers = #tpu.dot_dimension_numbers<[1], [0], [0], [1], [0, 0, 1, 1], [], []>} : vector<64x32xf32>, vector<32x16xf32>, vector<64x16xf32> -> vector<64x16xf32>
    %c0_61 = arith.constant 0 : index
    %c0_62 = arith.constant 0 : index
    %176 = vector.load %arg9[%c0_61, %c0_62] : memref<1x16xf32, #tpu.memory_space<vmem>>, vector<1x16xf32>
    %177 = vector.broadcast %176 : vector<1x16xf32> to vector<64x16xf32>
    %178 = arith.addf %175, %177 : vector<64x16xf32>
    %cst_63 = arith.constant 0.000000e+00 : f32
    %179 = vector.broadcast %cst_63 : f32 to vector<64x96xf32>
    %180 = tpu.concatenate %178, %35, %47, %92, %109, %121, %17, %179 in 1 : vector<64x16xf32>, vector<64x1xf32>, vector<64x2xf32>, vector<64x2xf32>, vector<64x1xf32>, vector<64x3xf32>, vector<64x7xf32>, vector<64x96xf32> -> vector<64x128xf32>
    %c0_64 = arith.constant 0 : index
    %c0_65 = arith.constant 0 : index
    %181 = vector.load %arg11[%c0_64, %c0_65] : memref<64x128xf32, #tpu.memory_space<vmem>>, vector<64x128xf32>
    tpu.vector_store %arg11[%c0_64, %c0_65], %180 {strides = array<i32>} : memref<64x128xf32, #tpu.memory_space<vmem>>, vector<64x128xf32>,
    return
  }
  func.func @transform_0(%arg0: i32) -> (i32, i32) {
    %c0_i32 = arith.constant 0 : i32
    %c0_i32_0 = arith.constant 0 : i32
    return %arg0, %c0_i32 : i32, i32
  }
  func.func @transform_1(%arg0: i32) -> (i32, i32) {
    %c0_i32 = arith.constant 0 : i32
    %c0_i32_0 = arith.constant 0 : i32
    %c0_i32_1 = arith.constant 0 : i32
    return %c0_i32, %c0_i32_0 : i32, i32
  }
  func.func @transform_2(%arg0: i32) -> (i32, i32) {
    %c0_i32 = arith.constant 0 : i32
    %c0_i32_0 = arith.constant 0 : i32
    %c0_i32_1 = arith.constant 0 : i32
    return %c0_i32, %c0_i32_0 : i32, i32
  }
  func.func @transform_3(%arg0: i32) -> (i32, i32) {
    %c0_i32 = arith.constant 0 : i32
    %c0_i32_0 = arith.constant 0 : i32
    %c0_i32_1 = arith.constant 0 : i32
    return %c0_i32, %c0_i32_0 : i32, i32
  }
  func.func @transform_4(%arg0: i32) -> (i32, i32) {
    %c0_i32 = arith.constant 0 : i32
    %c0_i32_0 = arith.constant 0 : i32
    %c0_i32_1 = arith.constant 0 : i32
    return %c0_i32, %c0_i32_0 : i32, i32
  }
  func.func @transform_5(%arg0: i32) -> (i32, i32) {
    %c0_i32 = arith.constant 0 : i32
    %c0_i32_0 = arith.constant 0 : i32
    %c0_i32_1 = arith.constant 0 : i32
    return %c0_i32, %c0_i32_0 : i32, i32
  }
  func.func @transform_6(%arg0: i32) -> (i32, i32) {
    %c0_i32 = arith.constant 0 : i32
    %c0_i32_0 = arith.constant 0 : i32
    %c0_i32_1 = arith.constant 0 : i32
    return %c0_i32, %c0_i32_0 : i32, i32
  }
  func.func @transform_7(%arg0: i32) -> (i32, i32) {
    %c0_i32 = arith.constant 0 : i32
    %c0_i32_0 = arith.constant 0 : i32
    %c0_i32_1 = arith.constant 0 : i32
    return %c0_i32, %c0_i32_0 : i32, i32
  }
  func.func @transform_8(%arg0: i32) -> (i32, i32) {
    %c0_i32 = arith.constant 0 : i32
    %c0_i32_0 = arith.constant 0 : i32
    %c0_i32_1 = arith.constant 0 : i32
    return %c0_i32, %c0_i32_0 : i32, i32
  }
  func.func @transform_9(%arg0: i32) -> (i32, i32) {
    %c0_i32 = arith.constant 0 : i32
    %c0_i32_0 = arith.constant 0 : i32
    return %arg0, %c0_i32 : i32, i32
  }
  func.func @transform_10(%arg0: i32) -> (i32, i32) {
    %c0_i32 = arith.constant 0 : i32
    %c0_i32_0 = arith.constant 0 : i32
    return %arg0, %c0_i32 : i32, i32
  }
}

</mosaic_0001>

<bundles_post_ra>
// kernel: _lambda_.1
= control target key start
LH: loop header
LB: loop body
LE: loop exit
PB: predicated region body
PF: predicated region fallthrough
CT: control target
= control target key end

     0   :  { %vm52_vm0 = vcmask 130048   ;;  %vm201_vm1 = vcmask 261120   ;;  %vm1068_vm4 = vcmask 23552   ;;  %vm467_vm15 = vcmask 15360   ;;  %s2825_s17 = smov 2   ;;  %s4558_s1 = inlined_call_operand.vmem [shape: f32[16,32], index: 1, kind: input, shape index: {}]   ;;  %s4559_s0 = inlined_call_operand.vmem [shape: f32[64,16], index: 0, kind: input, shape index: {}]   ;;  %s4560_s3 = inlined_call_operand.vmem [shape: f32[32,14], index: 3, kind: input, shape index: {}]   ;;  %s4561_s2 = inlined_call_operand.vmem [shape: f32[1,32], index: 2, kind: input, shape index: {}]   ;;  %s4562_s4 = inlined_call_operand.vmem [shape: f32[1,14], index: 4, kind: input, shape index: {}]   ;;  %s4563_s9 = inlined_call_operand.vmem [shape: f32[64,7], index: 9, kind: input, shape index: {}]   ;;  %s4564_s5 = inlined_call_operand.vmem [shape: f32[9,32], index: 5, kind: input, shape index: {}]   ;;  %s4565_s7 = inlined_call_operand.vmem [shape: f32[32,16], index: 7, kind: input, shape index: {}]   ;;  %s4566_s6 = inlined_call_operand.vmem [shape: f32[1,32], index: 6, kind: input, shape index: {}]   ;;  %s4567_s8 = inlined_call_operand.vmem [shape: f32[1,16], index: 8, kind: input, shape index: {}]   ;;  %s4568_s10 = inlined_call_operand.vmem [shape: f32[64,128], index: 10, kind: output, shape index: {}]  }
   0x1   :  { %v43_v0 = vld [vmem:[%s4558_s1] sm:$0xff]  ;;  %v44_v1 = vld [vmem:[%s4558_s1 + $0x8] sm:$0xff]  ;;  %v37_v8 = vld [vmem:[%s4559_s0 + $0x10] sm:$0xff] }
   0x2   :  { %v35_v2 = vld [vmem:[%s4559_s0] sm:$0xff]  ;;  %v2469_v3 = vpack.c.bf16 %v44_v1, %v43_v0  ;;  %v191_v5 = vld [vmem:[%s4560_s3 + $0x8] sm:$0xff]  ;;  %v38_v9 = vld [vmem:[%s4559_s0 + $0x18] sm:$0xff] }
   0x3   :  { %2401 = vmatprep.mubr.msk.f32.mxu0 %vm52_vm0, %v35_v2  ;;  %v190_v4 = vld [vmem:[%s4560_s3] sm:$0xff]  ;;  %v36_v6 = vld [vmem:[%s4559_s0 + $0x8] sm:$0xff]  ;;  %v41_v12 = vld [vmem:[%s4559_s0 + $0x30] sm:$0xff] }
   0x4   :  { %2470 = vmatprep.subr.bf16.mxu0 %v2469_v3  ;;  %v2473_v7 = vpack.c.bf16 %v191_v5, %v190_v4  ;;  %v39_v10 = vld [vmem:[%s4559_s0 + $0x20] sm:$0xff]  ;;  %v40_v11 = vld [vmem:[%s4559_s0 + $0x28] sm:$0xff]  ;;  %v42_v13 = vld [vmem:[%s4559_s0 + $0x38] sm:$0xff]  ;;  %s2828_s0 = smov 18  }
   0x5   :  { %2472 = vmatpush3.bf16.msra.mxu0 %v2469_v3  ;;  %v192_v14 = vld [vmem:[%s4560_s3 + $0x10] sm:$0xff]  ;;  %v193_v15 = vld [vmem:[%s4560_s3 + $0x18] sm:$0xff]  ;;  %v2316_v17 = vld [vmem:[%s4561_s2] ss:$0 sm:$0xff]  ;;  %s2822_s3 = smov 124  }
   0x6   :  { %2474 = vmatprep.subr.bf16.mxu1 %v2473_v7  ;;  %v2477_v16 = vpack.c.bf16 %v193_v15, %v192_v14  ;;  %v2325_v42 = vld [vmem:[%s4562_s4] ss:$0 sm:$0xff]  ;;  %s2823_s4 = smov 121  }
   0x7   :  { %2476 = vmatpush3.bf16.msra.mxu1 %v2473_v7 }
   0x8   :  { %2402 = vmatmul.mubr.msk.f32.vlgmr.msra.gmra.mrb[0].mxu0 %vm52_vm0, %v36_v6  ;;  %2478 = vmatprep.subr.bf16.mxu1 %v2477_v16 }
   0x9   :  { %2404 = vmatprep.mubr.msk.f32.mxu0 %vm52_vm0, %v37_v8 }
   0xb   :  { %2480 = vmatpush3.bf16.msra.mxu1 %v2477_v16 }
   0xc   :  { %2405 = vmatmul.mubr.msk.f32.gmra.mrb[2].mxu0 %vm52_vm0, %v38_v9 }
   0xd   :  { %2407 = vmatprep.mubr.msk.f32.mxu0 %vm52_vm0, %v39_v10 }
  0x10   :  { %2408 = vmatmul.mubr.msk.f32.gmra.mrb[4].mxu0 %vm52_vm0, %v40_v11 }
  0x11   :  { %2410 = vmatprep.mubr.msk.f32.mxu0 %vm52_vm0, %v41_v12 }
  0x14   :  { %2411 = vmatmul.mubr.msk.f32.gmra.mrb[6].mxu0 %vm52_vm0, %v42_v13 }
  0xdb   :  { %v2403_v18 = vpop.f32.mrb[0].mxu0 }
  0xdc   :  { %v149_v19 = vadd.f32 %v2403_v18, %v2316_v17  ;;  %v143_v20 = vpop.f32.mrb[1].mxu0 }
  0xdd   :  { %v144_v21 = vadd.f32 %v2316_v17, %v143_v20 }
  0xde   :  { %v183_v24 = vmax.f32 %v149_v19, 0.0 }
  0xdf   :  { %v182_v22 = vmax.f32 %v144_v21, 0.0  ;;  %v2406_v23 = vpop.f32.mrb[2].mxu0 }
  0xe0   :  { %v159_v25 = vadd.f32 %v2406_v23, %v2316_v17  ;;  %v153_v26 = vpop.f32.mrb[3].mxu0 }
  0xe1   :  { %v154_v27 = vadd.f32 %v2316_v17, %v153_v26  ;;  %2421 = vmatprep.mubr.msk.f32.mxu1 %vm201_vm1, %v182_v22 }
  0xe2   :  { %2422 = vmatmul.mubr.msk.f32.vlgmr.msra.gmra.mrb[0].mxu1 %vm201_vm1, %v183_v24  ;;  %v185_v30 = vmax.f32 %v159_v25, 0.0 }
  0xe3   :  { %v184_v28 = vmax.f32 %v154_v27, 0.0  ;;  %v2409_v29 = vpop.f32.mrb[4].mxu0 }
  0xe4   :  { %v169_v31 = vadd.f32 %v2409_v29, %v2316_v17  ;;  %v163_v32 = vpop.f32.mrb[5].mxu0 }
  0xe5   :  { %v164_v33 = vadd.f32 %v2316_v17, %v163_v32  ;;  %2424 = vmatprep.mubr.msk.f32.mxu1 %vm201_vm1, %v184_v28 }
  0xe6   :  { %2425 = vmatmul.mubr.msk.f32.gmra.mrb[2].mxu1 %vm201_vm1, %v185_v30  ;;  %v187_v36 = vmax.f32 %v169_v31, 0.0 }
  0xe7   :  { %v186_v34 = vmax.f32 %v164_v33, 0.0  ;;  %v2412_v35 = vpop.f32.mrb[6].mxu0 }
  0xe8   :  { %v179_v37 = vadd.f32 %v2412_v35, %v2316_v17  ;;  %v173_v38 = vpop.f32.mrb[7].mxu0 }
  0xe9   :  { %2427 = vmatprep.mubr.msk.f32.mxu1 %vm201_vm1, %v186_v34  ;;  %v174_v39 = vadd.f32 %v2316_v17, %v173_v38 }
  0xea   :  { %2428 = vmatmul.mubr.msk.f32.gmra.mrb[4].mxu1 %vm201_vm1, %v187_v36  ;;  %v189_v40 = vmax.f32 %v179_v37, 0.0 }
  0xeb   :  { %v188_v41 = vmax.f32 %v174_v39, 0.0 }
  0xed   :  { %2430 = vmatprep.mubr.msk.f32.mxu1 %vm201_vm1, %v188_v41 }
  0xee   :  { %2431 = vmatmul.mubr.msk.f32.gmra.mrb[6].mxu1 %vm201_vm1, %v189_v40 }
 0x1b5   :  { %v2423_v43 = vpop.f32.mrb[0].mxu1 }
 0x1b6   :  { %v292_v44 = vpop.f32.mrb[1].mxu1  ;;  %v2950_v46 = vadd.f32 %v2423_v43, %v2325_v42 }
 0x1b7   :  { %v2948_v45 = vadd.f32 %v2325_v42, %v292_v44 }
 0x1b8   :  { %v2969_v55 = vmul.f32 %v2950_v46, %v2950_v46  ;;  %v333_v13 = vmul.f32 1.442695, %v2950_v46 }
 0x1b9   :  { %4650 = vst [vmem:[#allocation2_spill] sm:$0xff] %v2948_v45  ;;  %v331_v47 = vmul.f32 1.442695, %v2948_v45  ;;  %v2426_v48 = vpop.f32.mrb[2].mxu1  ;;  %v2955_v49 = vmul.f32 %v2948_v45, %v2948_v45 }
 0x1ba   :  { %v2957_v50 = vadd.f32 %v2426_v48, %v2325_v42  ;;  %v302_v51 = vpop.f32.mrb[3].mxu1 }
 0x1bb   :  { %2502 = vpow2.f32 %v331_v47  ;;  %1044 = vrot.lane.b32.xlu0 %v2955_v49, %s2822_s3  ;;  %v2961_v52 = vadd.f32 %v2325_v42, %v302_v51 }
 0x1bc   :  { %v2965_v53 = vmul.f32 %v2957_v50, %v2957_v50  ;;  %v337_v12 = vmul.f32 1.442695, %v2957_v50 }
 0x1bd   :  { %4651 = vst [vmem:[#allocation3_spill] sm:$0xff] %v2961_v52  ;;  %v2429_v54 = vpop.f32.mrb[4].mxu1  ;;  %v2981_v59 = vmul.f32 %v2961_v52, %v2961_v52  ;;  %v335_v11 = vmul.f32 1.442695, %v2961_v52 }
 0x1be   :  { %1050 = vrot.lane.b32.xlu1 %v2965_v53, %s2822_s3  ;;  %v312_v56 = vpop.f32.mrb[5].mxu1  ;;  %v2977_v58 = vadd.f32 %v2429_v54, %v2325_v42 }
 0x1bf   :  { %v2973_v57 = vadd.f32 %v2325_v42, %v312_v56  ;;  %1046 = vrot.lane.b32.xlu0 %v2969_v55, %s2822_s3 }
 0x1c0   :  { %4653 = vst [vmem:[#allocation5_spill] sm:$0xff] %v2977_v58  ;;  %v2997_v1 = vmul.f32 %v2977_v58, %v2977_v58 }
 0x1c1   :  { %4652 = vst [vmem:[#allocation4_spill] sm:$0xff] %v2973_v57  ;;  %v2985_v60 = vmul.f32 %v2973_v57, %v2973_v57  ;;  %v2432_v61 = vpop.f32.mrb[6].mxu1  ;;  %v339_v16 = vmul.f32 1.442695, %v2973_v57 }
 0x1c2   :  { %1048 = vrot.lane.b32.xlu1 %v2981_v59, %s2822_s3  ;;  %v2989_v62 = vadd.f32 %v2432_v61, %v2325_v42  ;;  %v322_v63 = vpop.f32.mrb[7].mxu1 }
 0x1c3   :  { %1052 = vrot.lane.b32.xlu0 %v2985_v60, %s2822_s3  ;;  %v2993_v0 = vadd.f32 %v2325_v42, %v322_v63 }
 0x1c4   :  { %4654 = vst [vmem:[#allocation6_spill] sm:$0xff] %v2989_v62  ;;  %v3009_v5 = vmul.f32 %v2989_v62, %v2989_v62 }
 0x1c5   :  { %4655 = vst [vmem:[#allocation7_spill] sm:$0xff] %v2993_v0  ;;  %v2503_v2 = vpop.eup %2502  ;;  %v3001_v3 = vmul.f32 %v2993_v0, %v2993_v0  ;;  %v343_v23 = vmul.f32 1.442695, %v2993_v0 }
 0x1c6   :  { %v3003_v4 = vadd.f32 1e-08, %v2503_v2  ;;  %1054 = vrot.lane.b32.xlu1 %v2997_v1, %s2822_s3 }
 0x1c7   :  { %1056 = vrot.lane.b32.xlu0 %v3001_v3, %s2822_s3 }
 0x1c8   :  { %4656 = vst [vmem:[#allocation8_spill] sm:$0xff] %v3003_v4  ;;  %2504 = vrsqrt.f32 %v3003_v4  ;;  %vm365_vm2 = vcmp.eq.f32.partialorder %v3003_v4, inf  ;;  %v368_v8 = vand.u32 2147483648, %v3003_v4  ;;  %vm367_vm3 = vcmp.eq.f32.partialorder %v3003_v4, 0.0 }
 0x1c9   :  { %2506 = vpow2.f32 %v335_v11 }
 0x1ca   :  { %1058 = vrot.lane.b32.xlu1 %v3009_v5, %s2822_s3  ;;  %2508 = vpow2.f32 %v337_v12 }
 0x1cb   :  { %2510 = vpow2.f32 %v333_v13 }
 0x1cc   :  { %2512 = vpow2.f32 %v339_v16 }
 0x1d2   :  { %v2505_v6 = vpop.eup %2504 }
 0x1d3   :  { %v364_v7 = vmul.f32 %v2505_v6, %v3003_v4  ;;  %v2507_v14 = vpop.eup %2506 }
 0x1d4   :  { %v3027_v18 = vadd.f32 1e-08, %v2507_v14  ;;  %v2509_v19 = vpop.eup %2508  ;;  %v341_v14 = vmul.f32 1.442695, %v2977_v58 }
 0x1d5   :  { %v366_v9 = vsel %vm365_vm2, %v3003_v4, %v364_v7  ;;  %v3032_v25 = vadd.f32 1e-08, %v2509_v19  ;;  %v2511_v31 = vpop.eup %2510  ;;  %v345_v19 = vmul.f32 1.442695, %v2989_v62 }
 0x1d6   :  { %v369_v10 = vsel %vm367_vm3, %v368_v8, %v366_v9  ;;  %4657 = vst [vmem:[#allocation9_spill] sm:$0xff] %v3027_v18  ;;  %2514 = vrsqrt.f32 %v3027_v18  ;;  %v2513_v33 = vpop.eup %2512  ;;  %v3039_v34 = vadd.f32 1e-08, %v2511_v31  ;;  %vm379_vm5 = vcmp.eq.f32.partialorder %v3027_v18, inf }
 0x1d7   :  { %427 = vrot.lane.b32.xlu1 %v369_v10, %s2823_s4  ;;  %4658 = vst [vmem:[#allocation10_spill] sm:$0xff] %v3032_v25  ;;  %2516 = vpow2.f32 %v343_v23  ;;  %v3042_v39 = vadd.f32 1e-08, %v2513_v33  ;;  %v382_v47 = vand.u32 2147483648, %v3027_v18  ;;  %vm381_vm6 = vcmp.eq.f32.partialorder %v3027_v18, 0.0 }
 0x1d8   :  { %2518 = vrsqrt.f32 %v3032_v25  ;;  %4659 = vst [vmem:[#allocation11_spill] sm:$0xff] %v3039_v34  ;;  %vm386_vm7 = vcmp.eq.f32.partialorder %v3032_v25, inf  ;;  %v389_v54 = vand.u32 2147483648, %v3032_v25  ;;  %vm388_vm8 = vcmp.eq.f32.partialorder %v3032_v25, 0.0 }
 0x1d9   :  { %4660 = vst [vmem:[#allocation12_spill] sm:$0xff] %v3042_v39  ;;  %2520 = vrsqrt.f32 %v3039_v34  ;;  %vm372_vm9 = vcmp.eq.f32.partialorder %v3039_v34, inf  ;;  %v375_v9 = vand.u32 2147483648, %v3039_v34  ;;  %vm374_vm10 = vcmp.eq.f32.partialorder %v3039_v34, 0.0 }
 0x1da   :  { %2522 = vrsqrt.f32 %v3042_v39  ;;  %vm393_vm11 = vcmp.eq.f32.partialorder %v3042_v39, inf  ;;  %v396_v13 = vand.u32 2147483648, %v3042_v39  ;;  %vm395_vm13 = vcmp.eq.f32.partialorder %v3042_v39, 0.0 }
 0x1db   :  { %v468_v31 = vsel %vm467_vm15, %v2955_v49, 0.0 }
 0x1e0   :  { %v2515_v36 = vpop.eup %2514 }
 0x1e1   :  { %v2517_v38 = vpop.eup %2516  ;;  %v378_v40 = vmul.f32 %v2515_v36, %v3027_v18  ;;  %v474_v36 = vsel %vm467_vm15, %v2981_v59, 0.0  ;;  %v486_v59 = vsel %vm467_vm15, %v3001_v3, 0.0 }
 0x1e2   :  { %v2519_v41 = vpop.eup %2518  ;;  %v3047_v42 = vadd.f32 1e-08, %v2517_v38 }
 0x1e3   :  { %v380_v43 = vsel %vm379_vm5, %v3027_v18, %v378_v40  ;;  %v385_v44 = vmul.f32 %v2519_v41, %v3032_v25  ;;  %v2521_v56 = vpop.eup %2520  ;;  %v480_v40 = vsel %vm467_vm15, %v2985_v60, 0.0  ;;  %v489_v60 = vsel %vm467_vm15, %v3009_v5, 0.0 }
 0x1e4   :  { %4661 = vst [vmem:[#allocation13_spill] sm:$0xff] %v3047_v42  ;;  %v383_v48 = vsel %vm381_vm6, %v382_v47, %v380_v43  ;;  %2524 = vrsqrt.f32 %v3047_v42  ;;  %v371_v63 = vmul.f32 %v2521_v56, %v3039_v34  ;;  %v2523_v2 = vpop.eup %2522  ;;  %vm407_vm12 = vcmp.eq.f32.partialorder %v3047_v42, inf }
 0x1e5   :  { %v387_v51 = vsel %vm386_vm7, %v3032_v25, %v385_v44  ;;  %v392_v7 = vmul.f32 %v2523_v2, %v3042_v39  ;;  %v410_v16 = vand.u32 2147483648, %v3047_v42  ;;  %vm409_vm14 = vcmp.eq.f32.partialorder %v3047_v42, 0.0 }
 0x1e6   :  { %v390_v61 = vsel %vm388_vm8, %v389_v54, %v387_v51  ;;  %v373_v6 = vsel %vm372_vm9, %v3039_v34, %v371_v63  ;;  %2526 = vpow2.f32 %v341_v14  ;;  %v471_v43 = vsel %vm467_vm15, %v2969_v55, 0.0 }
 0x1e7   :  { %v376_v10 = vsel %vm374_vm10, %v375_v9, %v373_v6  ;;  %v394_v11 = vsel %vm393_vm11, %v3042_v39, %v392_v7  ;;  %2528 = vpow2.f32 %v345_v19  ;;  %v477_v44 = vsel %vm467_vm15, %v2965_v53, 0.0 }
 0x1e8   :  { %v483_v47 = vsel %vm467_vm15, %v2997_v1, 0.0 }
 0x1ee   :  { %v2525_v8 = vpop.eup %2524 }
 0x1ef   :  { %v406_v12 = vmul.f32 %v2525_v8, %v3047_v42 }
 0x22d   :  { %v1045_v15 = vpop.permute.xlu0 %1044 }
 0x22e   :  { %v1069_v17 = vsel %vm1068_vm4, %v1045_v15, 0.0  ;;  %v397_v15 = vsel %vm395_vm13, %v396_v13, %v394_v11 }
 0x22f   :  { %1070 = vadd.xlane.f32.xlu0 %v1069_v17  ;;  %v408_v17 = vsel %vm407_vm12, %v3047_v42, %v406_v12 }
 0x230   :  { %v1051_v20 = vpop.permute.xlu1 %1050 }
 0x231   :  { %v1047_v21 = vpop.permute.xlu0 %1046  ;;  %v1078_v22 = vsel %vm1068_vm4, %v1051_v20, 0.0  ;;  %v411_v20 = vsel %vm409_vm14, %v410_v16, %v408_v17 }
 0x232   :  { %v1072_v24 = vsel %vm1068_vm4, %v1047_v21, 0.0  ;;  %v2527_v21 = vpop.eup %2526 }
 0x233   :  { %1079 = vadd.xlane.f32.xlu0 %v1078_v22  ;;  %1073 = vadd.xlane.f32.xlu1 %v1072_v24  ;;  %v3081_v22 = vadd.f32 1e-08, %v2527_v21  ;;  %v2529_v23 = vpop.eup %2528 }
 0x234   :  { %v1049_v26 = vpop.permute.xlu1 %1048  ;;  %v3083_v24 = vadd.f32 1e-08, %v2529_v23 }
 0x235   :  { %v1053_v27 = vpop.permute.xlu0 %1052  ;;  %v1075_v28 = vsel %vm1068_vm4, %v1049_v26, 0.0  ;;  %4662 = vst [vmem:[#allocation14_spill] sm:$0xff] %v3081_v22  ;;  %2530 = vrsqrt.f32 %v3081_v22  ;;  %vm400_vm2 = vcmp.eq.f32.partialorder %v3081_v22, inf  ;;  %vm402_vm5 = vcmp.eq.f32.partialorder %v3081_v22, 0.0 }
 0x236   :  { %v1081_v29 = vsel %vm1068_vm4, %v1053_v27, 0.0  ;;  %4663 = vst [vmem:[#allocation15_spill] sm:$0xff] %v3083_v24  ;;  %2532 = vrsqrt.f32 %v3083_v24  ;;  %vm414_vm3 = vcmp.eq.f32.partialorder %v3083_v24, inf  ;;  %v417_v49 = vand.u32 2147483648, %v3083_v24 }
 0x237   :  { %1076 = vadd.xlane.f32.xlu0 %v1075_v28  ;;  %1082 = vadd.xlane.f32.xlu1 %v1081_v29  ;;  %vm416_vm6 = vcmp.eq.f32.partialorder %v3083_v24, 0.0 }
 0x238   :  { %v1055_v30 = vpop.permute.xlu1 %1054 }
 0x239   :  { %v1084_v32 = vsel %vm1068_vm4, %v1055_v30, 0.0  ;;  %v1057_v26 = vpop.permute.xlu0 %1056 }
 0x23a   :  { %v1087_v27 = vsel %vm1068_vm4, %v1057_v26, 0.0 }
 0x23b   :  { %1085 = vadd.xlane.f32.xlu0 %v1084_v32 }
 0x23c   :  { %v1059_v35 = vpop.permute.xlu1 %1058 }
 0x23d   :  { %v1090_v37 = vsel %vm1068_vm4, %v1059_v35, 0.0  ;;  %v403_v35 = vand.u32 2147483648, %v3081_v22 }
 0x23f   :  { %1091 = vadd.xlane.f32.xlu0 %v1090_v37  ;;  %v2531_v28 = vpop.eup %2530 }
 0x240   :  { %v399_v29 = vmul.f32 %v2531_v28, %v3081_v22  ;;  %v2533_v30 = vpop.eup %2532 }
 0x241   :  { %v413_v33 = vmul.f32 %v2533_v30, %v3083_v24 }
 0x242   :  { %v401_v32 = vsel %vm400_vm2, %v3081_v22, %v399_v29 }
 0x243   :  { %v404_v37 = vsel %vm402_vm5, %v403_v35, %v401_v32  ;;  %v415_v38 = vsel %vm414_vm3, %v3083_v24, %v413_v33 }
 0x244   :  { %v418_v41 = vsel %vm416_vm6, %v417_v49, %v415_v38 }
 0x248   :  { %431 = vrot.lane.b32.xlu1 %v383_v48, %s2823_s4 }
 0x249   :  { %v3116_v48 = vpop.permute.xlu1 %427 }
 0x24c   :  { %433 = vrot.lane.b32.xlu1 %v390_v61, %s2823_s4 }
 0x255   :  { %429 = vrot.lane.b32.xlu0 %v376_v10, %s2823_s4 }
 0x259   :  { %435 = vrot.lane.b32.xlu0 %v397_v15, %s2823_s4 }
 0x25d   :  { %439 = vrot.lane.b32.xlu0 %v411_v20, %s2823_s4 }
 0x270   :  { %1088 = vadd.xlane.f32.xlu1 %v1087_v27 }
 0x27c   :  { %469 = vadd.xlane.f32.xlu0 %v468_v31 }
 0x280   :  { %475 = vadd.xlane.f32.xlu0 %v474_v36 }
 0x281   :  { %437 = vrot.lane.b32.xlu1 %v404_v37, %s2823_s4 }
 0x284   :  { %481 = vadd.xlane.f32.xlu0 %v480_v40 }
 0x285   :  { %441 = vrot.lane.b32.xlu1 %v418_v41, %s2823_s4 }
 0x288   :  { %487 = vadd.xlane.f32.xlu0 %v486_v59 }
 0x2a9   :  { %472 = vadd.xlane.f32.xlu1 %v471_v43 }
 0x2ad   :  { %478 = vadd.xlane.f32.xlu1 %v477_v44 }
 0x2b1   :  { %484 = vadd.xlane.f32.xlu1 %v483_v47 }
 0x2b5   :  { %490 = vadd.xlane.f32.xlu1 %v489_v60 }
 0x2bc   :  { %v1071_v3 = vpop.xlane.xlu0 %1070 }
 0x2bd   :  { %2534 = vrsqrt.f32 %v1071_v3  ;;  %vm1095_vm7 = vcmp.eq.f32.partialorder %v1071_v3, inf  ;;  %v1098_v5 = vand.u32 2147483648, %v1071_v3  ;;  %vm1097_vm8 = vcmp.eq.f32.partialorder %v1071_v3, 0.0 }
 0x2c0   :  { %v1080_v51 = vpop.xlane.xlu0 %1079  ;;  %v1074_v54 = vpop.xlane.xlu1 %1073 }
 0x2c1   :  { %2536 = vrsqrt.f32 %v1080_v51  ;;  %vm1116_vm9 = vcmp.eq.f32.partialorder %v1080_v51, inf  ;;  %vm1118_vm10 = vcmp.eq.f32.partialorder %v1080_v51, 0.0  ;;  %v1119_v7 = vand.u32 2147483648, %v1080_v51 }
 0x2c2   :  { %2538 = vrsqrt.f32 %v1074_v54  ;;  %vm1102_vm11 = vcmp.eq.f32.partialorder %v1074_v54, inf  ;;  %vm1104_vm12 = vcmp.eq.f32.partialorder %v1074_v54, 0.0  ;;  %v1105_v11 = vand.u32 2147483648, %v1074_v54 }
 0x2c4   :  { %v1077_v55 = vpop.xlane.xlu0 %1076  ;;  %v3118_v56 = vpop.xlane.xlu1 %1082 }
 0x2c5   :  { %2540 = vrsqrt.f32 %v1077_v55  ;;  %vm1109_vm13 = vcmp.eq.f32.partialorder %v1077_v55, inf  ;;  %vm1111_vm14 = vcmp.eq.f32.partialorder %v1077_v55, 0.0  ;;  %v1112_v14 = vand.u32 2147483648, %v1077_v55 }
 0x2c6   :  { %2542 = vrsqrt.f32 %v3118_v56  ;;  %vm1123_vm2 = vcmp.eq.f32.partialorder %v3118_v56, inf  ;;  %vm1125_vm3 = vcmp.eq.f32.partialorder %v3118_v56, 0.0  ;;  %v1126_v23 = vand.u32 2147483648, %v3118_v56 }
 0x2c7   :  { %v2535_v53 = vpop.eup %2534 }
 0x2c8   :  { %v1094_v1 = vmul.f32 %v2535_v53, %v1071_v3  ;;  %v3121_v61 = vpop.xlane.xlu0 %1085 }
 0x2c9   :  { %2544 = vrsqrt.f32 %v3121_v61  ;;  %vm1130_vm5 = vcmp.eq.f32.partialorder %v3121_v61, inf  ;;  %vm1132_vm6 = vcmp.eq.f32.partialorder %v3121_v61, 0.0  ;;  %v1133_v35 = vand.u32 2147483648, %v3121_v61 }
 0x2ca   :  { %v1096_v63 = vsel %vm1095_vm7, %v1071_v3, %v1094_v1 }
 0x2cb   :  { %v2537_v2 = vpop.eup %2536  ;;  %v1099_v6 = vsel %vm1097_vm8, %v1098_v5, %v1096_v63 }
 0x2cc   :  { %v2539_v8 = vpop.eup %2538  ;;  %v3124_v9 = vmin.f32 %v1099_v6, 85.0  ;;  %v1115_v10 = vmul.f32 %v2537_v2, %v1080_v51  ;;  %v3126_v12 = vpop.xlane.xlu0 %1091 }
 0x2cd   :  { %v1101_v13 = vmul.f32 %v2539_v8, %v1074_v54  ;;  %2546 = vrsqrt.f32 %v3126_v12  ;;  %vm1144_vm7 = vcmp.eq.f32.partialorder %v3126_v12, inf  ;;  %v1147_v5 = vand.u32 2147483648, %v3126_v12 }
 0x2ce   :  { %v1157_v15 = vmul.f32 1.442695, %v3124_v9  ;;  %v1173_v16 = vsub.f32 0.0, %v3124_v9  ;;  %v1117_v17 = vsel %vm1116_vm9, %v1080_v51, %v1115_v10  ;;  %v1237_v3 = vmax.f32 %v3124_v9, 1e-12 }
 0x2cf   :  { %v2541_v19 = vpop.eup %2540  ;;  %v1120_v20 = vsel %vm1118_vm10, %v1119_v7, %v1117_v17  ;;  %v1103_v21 = vsel %vm1102_vm11, %v1074_v54, %v1101_v13  ;;  %vm1146_vm8 = vcmp.eq.f32.partialorder %v3126_v12, 0.0  ;;  %vm1229_vm9 = vcmp.lt.f32.partialorder %v3124_v9, 1e-06 }
 0x2d0   :  { %v2543_v26 = vpop.eup %2542  ;;  %v1181_v27 = vmul.f32 1.442695, %v1173_v16  ;;  %v3137_v28 = vmin.f32 %v1120_v20, 85.0  ;;  %v1106_v29 = vsel %vm1104_vm12, %v1105_v11, %v1103_v21  ;;  %v1108_v31 = vmul.f32 %v2541_v19, %v1077_v55 }
 0x2d1   :  { %v3141_v30 = vmin.f32 %v1106_v29, 85.0  ;;  %v1122_v32 = vmul.f32 %v2543_v26, %v3118_v56  ;;  %2548 = vpow2.f32 %v1157_v15 }
 0x2d2   :  { %v1176_v33 = vsub.f32 0.0, %v3137_v28  ;;  %2550 = vpow2.f32 %v1181_v27  ;;  %v1110_v38 = vsel %vm1109_vm13, %v1077_v55, %v1108_v31  ;;  %v1163_v40 = vmul.f32 1.442695, %v3137_v28 }
 0x2d3   :  { %v2545_v36 = vpop.eup %2544  ;;  %v1159_v37 = vmul.f32 1.442695, %v3141_v30  ;;  %v1174_v49 = vsub.f32 0.0, %v3141_v30  ;;  %v1113_v59 = vsel %vm1111_vm14, %v1112_v14, %v1110_v38  ;;  %v1124_v43 = vsel %vm1123_vm2, %v3118_v56, %v1122_v32 }
 0x2d4   :  { %v1187_v41 = vmul.f32 1.442695, %v1176_v33  ;;  %v3156_v47 = vmin.f32 %v1113_v59, 85.0  ;;  %v1127_v60 = vsel %vm1125_vm3, %v1126_v23, %v1124_v43  ;;  %v1129_v54 = vmul.f32 %v2545_v36, %v3121_v61 }
 0x2d5   :  { %2552 = vpow2.f32 %v1159_v37  ;;  %v1183_v44 = vmul.f32 1.442695, %v1174_v49  ;;  %v3161_v51 = vmin.f32 %v1127_v60, 85.0  ;;  %v1238_v13 = vmax.f32 %v3141_v30, 1e-12 }
 0x2d6   :  { %2554 = vpow2.f32 %v1187_v41  ;;  %v1161_v53 = vmul.f32 1.442695, %v3156_v47  ;;  %v1175_v1 = vsub.f32 0.0, %v3156_v47  ;;  %v1131_v2 = vsel %vm1130_vm5, %v3121_v61, %v1129_v54 }
 0x2d7   :  { %v2547_v55 = vpop.eup %2546  ;;  %2556 = vpow2.f32 %v1183_v44  ;;  %v1165_v63 = vmul.f32 1.442695, %v3161_v51  ;;  %v1177_v56 = vsub.f32 0.0, %v3161_v51  ;;  %v1134_v7 = vsel %vm1132_vm6, %v1133_v35, %v1131_v2  ;;  %v355_v2 = vld [vmem:[%s4563_s9] sm:$0xff] }
 0x2d8   :  { %2558 = vpow2.f32 %v1163_v40  ;;  %v1185_v6 = vmul.f32 1.442695, %v1175_v1  ;;  %v1143_v8 = vmul.f32 %v2547_v55, %v3126_v12  ;;  %v3175_v11 = vmin.f32 %v1134_v7, 85.0 }
 0x2d9   :  { %2560 = vpow2.f32 %v1161_v53  ;;  %v1189_v10 = vmul.f32 1.442695, %v1177_v56  ;;  %v1239_v19 = vmax.f32 %v3156_v47, 1e-12  ;;  %v1240_v27 = vmax.f32 %v3137_v28, 1e-12 }
 0x2da   :  { %2562 = vpow2.f32 %v1165_v63  ;;  %v1145_v14 = vsel %vm1144_vm7, %v3126_v12, %v1143_v8  ;;  %v1167_v61 = vmul.f32 1.442695, %v3175_v11  ;;  %v1178_v16 = vsub.f32 0.0, %v3175_v11 }
 0x2db   :  { %2564 = vpow2.f32 %v1185_v6  ;;  %v2549_v15 = vpop.eup %2548  ;;  %v1148_v20 = vsel %vm1146_vm8, %v1147_v5, %v1145_v14  ;;  %v1241_v35 = vmax.f32 %v3161_v51, 1e-12  ;;  %v432_v6 = vpop.permute.xlu1 %431  ;;  %vm1230_vm10 = vcmp.lt.f32.partialorder %v3141_v30, 1e-06 }
 0x2dc   :  { %2566 = vpow2.f32 %v1189_v10  ;;  %v2551_v17 = vpop.eup %2550  ;;  %v1191_v21 = vmul.f32 1.442695, %v1178_v16  ;;  %v3185_v23 = vmin.f32 %v1148_v20, 85.0  ;;  %vm1231_vm11 = vcmp.lt.f32.partialorder %v3156_v47, 1e-06 }
 0x2dd   :  { %2568 = vrcp.f32 %v1237_v3  ;;  %v1213_v32 = vsub.f32 %v2549_v15, %v2551_v17  ;;  %v3191_v36 = vadd.f32 %v2551_v17, %v2549_v15  ;;  %v356_v15 = vld [vmem:[%s4563_s9 + $0x8] sm:$0xff]  ;;  %vm1232_vm12 = vcmp.lt.f32.partialorder %v3137_v28, 1e-06 }
 0x2de   :  { %2570 = vpow2.f32 %v1167_v61  ;;  %v1171_v29 = vmul.f32 1.442695, %v3185_v23  ;;  %v1180_v31 = vsub.f32 0.0, %v3185_v23  ;;  %v430_v61 = vpop.permute.xlu0 %429  ;;  %vm1233_vm13 = vcmp.lt.f32.partialorder %v3161_v51, 1e-06 }
 0x2df   :  { %v2553_v26 = vpop.eup %2552  ;;  %2572 = vrcp.f32 %v1238_v13  ;;  %v1221_v44 = vmul.f32 0.5, %v1213_v32  ;;  %vm1234_vm14 = vcmp.lt.f32.partialorder %v3175_v11, 1e-06  ;;  %vm1236_vm2 = vcmp.lt.f32.partialorder %v3185_v23, 1e-06 }
 0x2e0   :  { %v2555_v12 = vpop.eup %2554  ;;  %2574 = vpow2.f32 %v1191_v21  ;;  %v1195_v49 = vmul.f32 1.442695, %v1180_v31  ;;  %v3211_v21 = vmul.f32 %v3116_v48, %v355_v2 }
 0x2e1   :  { %v2557_v33 = vpop.eup %2556  ;;  %2576 = vrcp.f32 %v1239_v19 }
 0x2e2   :  { %v2559_v37 = vpop.eup %2558  ;;  %2578 = vpow2.f32 %v1171_v29  ;;  %v1214_v38 = vsub.f32 %v2553_v26, %v2557_v33  ;;  %v3193_v40 = vadd.f32 %v2557_v33, %v2553_v26  ;;  %v357_v26 = vld [vmem:[%s4563_s9 + $0x10] sm:$0xff]  ;;  %v1242_v29 = vmax.f32 %v3175_v11, 1e-12  ;;  %v436_v2 = vpop.permute.xlu0 %435 }
 0x2e3   :  { %v2561_v41 = vpop.eup %2560  ;;  %2580 = vrcp.f32 %v1240_v27  ;;  %v3195_v59 = vadd.f32 %v2559_v37, %v2555_v12  ;;  %v1216_v53 = vsub.f32 %v2559_v37, %v2555_v12 }
 0x2e4   :  { %v2563_v43 = vpop.eup %2562  ;;  %2582 = vpow2.f32 %v1195_v49  ;;  %v1222_v54 = vmul.f32 0.5, %v1214_v38  ;;  %v3232_v38 = vmul.f32 %v432_v6, %v357_v26 }
 0x2e5   :  { %v2565_v60 = vpop.eup %2564  ;;  %2584 = vrcp.f32 %v1241_v35  ;;  %v1224_v19 = vmul.f32 0.5, %v1216_v53  ;;  %v3224_v35 = vmul.f32 %v430_v61, %v356_v15 }
 0x2e6   :  { %v2567_v3 = vpop.eup %2566  ;;  %v1215_v55 = vsub.f32 %v2561_v41, %v2565_v60  ;;  %v3197_v1 = vadd.f32 %v2565_v60, %v2561_v41  ;;  %v1244_v41 = vmax.f32 %v3185_v23, 1e-12  ;;  %2586 = vrcp.f32 %v1242_v29 }
 0x2e7   :  { %v2569_v5 = vpop.eup %2568  ;;  %v3199_v63 = vadd.f32 %v2567_v3, %v2563_v43  ;;  %v1217_v10 = vsub.f32 %v2563_v43, %v2567_v3  ;;  %v358_v43 = vld [vmem:[%s4563_s9 + $0x18] sm:$0xff] }
 0x2e8   :  { %v3201_v56 = vpop.eup %2570  ;;  %v1246_v7 = vmul.f32 %v2569_v5, %v1221_v44  ;;  %v1223_v8 = vmul.f32 0.5, %v1215_v55  ;;  %v434_v44 = vpop.permute.xlu1 %433  ;;  %v359_v5 = vld [vmem:[%s4563_s9 + $0x20] sm:$0xff]  ;;  %2588 = vrcp.f32 %v1244_v41 }
 0x2e9   :  { %v2573_v13 = vpop.eup %2572  ;;  %v1225_v33 = vmul.f32 0.5, %v1217_v10  ;;  %v3259_v15 = vmul.f32 %v436_v2, %v359_v5 }
 0x2ea   :  { %v2575_v14 = vpop.eup %2574  ;;  %v1261_v16 = vsel %vm1229_vm9, 1.0, %v1246_v7  ;;  %v1248_v17 = vmul.f32 %v2573_v13, %v1222_v54 }
 0x2eb   :  { %v2577_v20 = vpop.eup %2576  ;;  %v3217_v27 = vmul.f32 %v1261_v16, %v2948_v45  ;;  %v3221_v9 = vadd.f32 %v2575_v14, %v3201_v56 }
 0x2ec   :  { %v2579_v12 = vpop.eup %2578  ;;  %v1262_v31 = vsel %vm1230_vm10, 1.0, %v1248_v17  ;;  %v1250_v32 = vmul.f32 %v2577_v20, %v1223_v8  ;;  %v3250_v8 = vmul.f32 %v434_v44, %v358_v43  ;;  %v1218_v17 = vsub.f32 %v3201_v56, %v2575_v14  ;;  %v360_v56 = vld [vmem:[%s4563_s9 + $0x28] sm:$0xff]  ;;  %v3287_v44 = vpop.permute.xlu0 %439 }
 0x2ed   :  { %4664 = vst [vmem:[#allocation16_spill] sm:$0xff] %v3217_v27  ;;  %v2581_v48 = vpop.eup %2580  ;;  %v1277_v37 = vmul.f32 %v3217_v27, %v3211_v21  ;;  %v3229_v49 = vmul.f32 %v1262_v31, %v2950_v46 }
 0x2ee   :  { %v2583_v30 = vpop.eup %2582  ;;  %v1263_v60 = vsel %vm1231_vm11, 1.0, %v1250_v32  ;;  %v1252_v3 = vmul.f32 %v2581_v48, %v1224_v19  ;;  %v1226_v51 = vmul.f32 0.5, %v1218_v17 }
 0x2ef   :  { %v2585_v54 = vpop.eup %2584  ;;  %1293 = vrot.lane.b32.xlu0 %v1277_v37, %s2822_s3  ;;  %v1278_v55 = vmul.f32 %v3229_v49, %v3224_v35  ;;  %v3242_v47 = vmul.f32 %v1263_v60, %v2961_v52  ;;  %v3245_v53 = vadd.f32 %v2583_v30, %v2579_v12  ;;  %v1220_v20 = vsub.f32 %v2579_v12, %v2583_v30  ;;  %v362_v30 = vld [vmem:[%s4563_s9 + $0x38] sm:$0xff] }
 0x2f0   :  { %v1264_v6 = vsel %vm1232_vm12, 1.0, %v1252_v3  ;;  %v1254_v7 = vmul.f32 %v2585_v54, %v1225_v33  ;;  %v2587_v26 = vpop.eup %2586 }
 0x2f1   :  { %4665 = vst [vmem:[#allocation17_spill] sm:$0xff] %v3242_v47  ;;  %4666 = vst [vmem:[#allocation18_spill] sm:$0xff] %v3245_v53  ;;  %1295 = vrot.lane.b32.xlu1 %v1278_v55, %s2822_s3  ;;  %v1279_v10 = vmul.f32 %v3242_v47, %v3232_v38  ;;  %v3256_v13 = vmul.f32 %v1264_v6, %v2957_v50  ;;  %v1256_v29 = vmul.f32 %v2587_v26, %v1226_v51 }
 0x2f2   :  { %v1265_v28 = vsel %vm1233_vm13, 1.0, %v1254_v7  ;;  %v1228_v31 = vmul.f32 0.5, %v1220_v20  ;;  %v2589_v32 = vpop.eup %2588 }
 0x2f3   :  { %4667 = vst [vmem:[#allocation19_spill] sm:$0xff] %v3256_v13  ;;  %1297 = vrot.lane.b32.xlu0 %v1279_v10, %s2822_s3  ;;  %v1280_v61 = vmul.f32 %v3256_v13, %v3250_v8  ;;  %v3265_v16 = vmul.f32 %v1265_v28, %v2973_v57  ;;  %v1266_v14 = vsel %vm1234_vm14, 1.0, %v1256_v29 }
 0x2f4   :  { %v1260_v48 = vmul.f32 %v2589_v32, %v1228_v31  ;;  %v3280_v12 = vmul.f32 %v1266_v14, %v2977_v58 }
 0x2f5   :  { %4668 = vst [vmem:[#allocation20_spill] sm:$0xff] %v3265_v16  ;;  %1299 = vrot.lane.b32.xlu1 %v1280_v61, %s2822_s3  ;;  %v1281_v19 = vmul.f32 %v3265_v16, %v3259_v15 }
 0x2f6   :  { %4669 = vst [vmem:[#allocation21_spill] sm:$0xff] %v3280_v12  ;;  %v1268_v43 = vsel %vm1236_vm2, 1.0, %v1260_v48 }
 0x2f7   :  { %1301 = vrot.lane.b32.xlu0 %v1281_v19, %s2822_s3  ;;  %v3293_v23 = vmul.f32 %v1268_v43, %v2989_v62 }
 0x2f9   :  { %4670 = vst [vmem:[#allocation22_spill] sm:$0xff] %v3293_v23 }
 0x2fd   :  { %v1089_v33 = vpop.xlane.xlu1 %1088 }
 0x2fe   :  { %2590 = vrsqrt.f32 %v1089_v33  ;;  %vm1137_vm3 = vcmp.eq.f32.partialorder %v1089_v33, inf  ;;  %v1140_v6 = vand.u32 2147483648, %v1089_v33  ;;  %vm1139_vm5 = vcmp.eq.f32.partialorder %v1089_v33, 0.0 }
 0x301   :  { %v438_v37 = vpop.permute.xlu1 %437 }
 0x302   :  { %v3277_v41 = vmul.f32 %v438_v37, %v360_v56 }
 0x304   :  { %v1282_v11 = vmul.f32 %v3280_v12, %v3277_v41 }
 0x305   :  { %v442_v60 = vpop.permute.xlu1 %441 }
 0x306   :  { %v3289_v3 = vmul.f32 %v442_v60, %v362_v30  ;;  %1303 = vrot.lane.b32.xlu1 %v1282_v11, %s2822_s3 }
 0x308   :  { %v2591_v54 = vpop.eup %2590  ;;  %v1284_v55 = vmul.f32 %v3293_v23, %v3289_v3 }
 0x309   :  { %v1136_v5 = vmul.f32 %v2591_v54, %v1089_v33  ;;  %v470_v2 = vpop.xlane.xlu0 %469 }
 0x30a   :  { %2592 = vrsqrt.f32 %v470_v2  ;;  %1307 = vrot.lane.b32.xlu1 %v1284_v55, %s2822_s3  ;;  %vm494_vm6 = vcmp.eq.f32.partialorder %v470_v2, inf  ;;  %vm496_vm7 = vcmp.eq.f32.partialorder %v470_v2, 0.0 }
 0x30b   :  { %v1138_v7 = vsel %vm1137_vm3, %v1089_v33, %v1136_v5  ;;  %v497_v33 = vand.u32 2147483648, %v470_v2 }
 0x30c   :  { %v1141_v10 = vsel %vm1139_vm5, %v1140_v6, %v1138_v7 }
 0x30d   :  { %v3298_v28 = vmin.f32 %v1141_v10, 85.0  ;;  %v476_v61 = vpop.xlane.xlu0 %475 }
 0x30e   :  { %2594 = vrsqrt.f32 %v476_v61  ;;  %vm508_vm8 = vcmp.eq.f32.partialorder %v476_v61, inf  ;;  %v511_v43 = vand.u32 2147483648, %v476_v61  ;;  %vm510_vm9 = vcmp.eq.f32.partialorder %v476_v61, 0.0 }
 0x30f   :  { %v1169_v17 = vmul.f32 1.442695, %v3298_v28  ;;  %v1179_v19 = vsub.f32 0.0, %v3298_v28  ;;  %v1243_v26 = vmax.f32 %v3298_v28, 1e-12 }
 0x310   :  { %vm1235_vm12 = vcmp.lt.f32.partialorder %v3298_v28, 1e-06 }
 0x311   :  { %2596 = vpow2.f32 %v1169_v17  ;;  %v1193_v51 = vmul.f32 1.442695, %v1179_v19  ;;  %v482_v20 = vpop.xlane.xlu0 %481 }
 0x312   :  { %2598 = vrsqrt.f32 %v482_v20  ;;  %vm522_vm10 = vcmp.eq.f32.partialorder %v482_v20, inf  ;;  %vm524_vm11 = vcmp.eq.f32.partialorder %v482_v20, 0.0  ;;  %v525_v19 = vand.u32 2147483648, %v482_v20 }
 0x313   :  { %2600 = vpow2.f32 %v1193_v51 }
 0x314   :  { %v2593_v29 = vpop.eup %2592 }
 0x315   :  { %v493_v31 = vmul.f32 %v2593_v29, %v470_v2  ;;  %v488_v32 = vpop.xlane.xlu0 %487 }
 0x316   :  { %2602 = vrsqrt.f32 %v488_v32  ;;  %vm536_vm13 = vcmp.eq.f32.partialorder %v488_v32, inf  ;;  %vm538_vm14 = vcmp.eq.f32.partialorder %v488_v32, 0.0 }
 0x317   :  { %v495_v56 = vsel %vm494_vm6, %v470_v2, %v493_v31  ;;  %2604 = vrcp.f32 %v1243_v26 }
 0x318   :  { %v2595_v14 = vpop.eup %2594  ;;  %v498_v48 = vsel %vm496_vm7, %v497_v33, %v495_v56 }
 0x319   :  { %v3303_v37 = vmin.f32 %v498_v48, 85.0  ;;  %v507_v30 = vmul.f32 %v2595_v14, %v476_v61 }
 0x31b   :  { %v2597_v11 = vpop.eup %2596  ;;  %v556_v60 = vmul.f32 1.442695, %v3303_v37  ;;  %v572_v54 = vsub.f32 0.0, %v3303_v37  ;;  %v509_v55 = vsel %vm508_vm8, %v476_v61, %v507_v30 }
 0x31c   :  { %v2599_v5 = vpop.eup %2598  ;;  %v512_v6 = vsel %vm510_vm9, %v511_v43, %v509_v55 }
 0x31d   :  { %v2601_v7 = vpop.eup %2600  ;;  %v580_v2 = vmul.f32 1.442695, %v572_v54  ;;  %v3307_v10 = vmin.f32 %v512_v6, 85.0  ;;  %v521_v17 = vmul.f32 %v2599_v5, %v482_v20  ;;  %2606 = vpow2.f32 %v556_v60 }
 0x31e   :  { %v1219_v51 = vsub.f32 %v2597_v11, %v2601_v7  ;;  %v3309_v26 = vadd.f32 %v2601_v7, %v2597_v11  ;;  %v361_v11 = vld [vmem:[%s4563_s9 + $0x30] sm:$0xff]  ;;  %v539_v54 = vand.u32 2147483648, %v488_v32  ;;  %s2824_s9 = smov 1  }
 0x31f   :  { %v560_v29 = vmul.f32 1.442695, %v3307_v10  ;;  %v574_v31 = vsub.f32 0.0, %v3307_v10  ;;  %v523_v33 = vsel %vm522_vm10, %v482_v20, %v521_v17  ;;  %2608 = vpow2.f32 %v580_v2 }
 0x320   :  { %4671 = vst [vmem:[#allocation23_spill] sm:$0xff] %v3309_v26  ;;  %v2603_v61 = vpop.eup %2602  ;;  %v526_v56 = vsel %vm524_vm11, %v525_v19, %v523_v33  ;;  %v1227_v14 = vmul.f32 0.5, %v1219_v51  ;;  %v3324_v17 = vmul.f32 %v3287_v44, %v361_v11 }
 0x321   :  { %v2605_v48 = vpop.eup %2604  ;;  %v584_v30 = vmul.f32 1.442695, %v574_v31  ;;  %v3314_v43 = vmin.f32 %v526_v56, 85.0  ;;  %v535_v60 = vmul.f32 %v2603_v61, %v488_v32  ;;  %2610 = vpow2.f32 %v560_v29 }
 0x322   :  { %v1258_v20 = vmul.f32 %v2605_v48, %v1227_v14 }
 0x323   :  { %v564_v55 = vmul.f32 1.442695, %v3314_v43  ;;  %v576_v5 = vsub.f32 0.0, %v3314_v43  ;;  %v537_v6 = vsel %vm536_vm13, %v488_v32, %v535_v60  ;;  %2612 = vpow2.f32 %v584_v30 }
 0x324   :  { %v540_v7 = vsel %vm538_vm14, %v539_v54, %v537_v6  ;;  %v1267_v2 = vsel %vm1235_vm12, 1.0, %v1258_v20 }
 0x325   :  { %v588_v19 = vmul.f32 1.442695, %v576_v5  ;;  %v3326_v51 = vmin.f32 %v540_v7, 85.0  ;;  %v3329_v29 = vmul.f32 %v1267_v2, %v2993_v0  ;;  %2614 = vpow2.f32 %v564_v55 }
 0x327   :  { %4672 = vst [vmem:[#allocation24_spill] sm:$0xff] %v3329_v29  ;;  %v568_v31 = vmul.f32 1.442695, %v3326_v51  ;;  %v578_v33 = vsub.f32 0.0, %v3326_v51  ;;  %v1283_v32 = vmul.f32 %v3329_v29, %v3324_v17  ;;  %2616 = vpow2.f32 %v588_v19  ;;  %v3335_v28 = vpop.eup %2606 }
 0x329   :  { %v3337_v61 = vpop.eup %2608  ;;  %v592_v44 = vmul.f32 1.442695, %v578_v33  ;;  %1305 = vrot.lane.b32.xlu0 %v1283_v32, %s2822_s3  ;;  %2618 = vpow2.f32 %v568_v31 }
 0x32a   :  { %v3342_v56 = vadd.f32 %v3337_v61, %v3335_v28 }
 0x32b   :  { %2620 = vpow2.f32 %v592_v44  ;;  %v3344_v14 = vpop.eup %2610 }
 0x32c   :  { %4673 = vst [vmem:[#allocation25_spill] sm:$0xff] %v3342_v56 }
 0x32d   :  { %v3346_v48 = vpop.eup %2612 }
 0x32e   :  { %v3350_v30 = vadd.f32 %v3346_v48, %v3344_v14 }
 0x32f   :  { %v3352_v60 = vpop.eup %2614 }
 0x330   :  { %4674 = vst [vmem:[#allocation26_spill] sm:$0xff] %v3350_v30 }
 0x331   :  { %v3354_v11 = vpop.eup %2616 }
 0x332   :  { %v3358_v54 = vadd.f32 %v3354_v11, %v3352_v60 }
 0x333   :  { %v3360_v20 = vpop.eup %2618 }
 0x334   :  { %4675 = vst [vmem:[#allocation27_spill] sm:$0xff] %v3358_v54 }
 0x335   :  { %v3362_v55 = vpop.eup %2620 }
 0x336   :  { %v473_v5 = vpop.xlane.xlu1 %472  ;;  %v3366_v6 = vadd.f32 %v3362_v55, %v3360_v20 }
 0x337   :  { %2622 = vrsqrt.f32 %v473_v5  ;;  %vm501_vm2 = vcmp.eq.f32.partialorder %v473_v5, inf  ;;  %v504_v32 = vand.u32 2147483648, %v473_v5  ;;  %vm503_vm3 = vcmp.eq.f32.partialorder %v473_v5, 0.0 }
 0x338   :  { %4676 = vst [vmem:[#allocation28_spill] sm:$0xff] %v3366_v6 }
 0x33a   :  { %v479_v7 = vpop.xlane.xlu1 %478 }
 0x33b   :  { %2624 = vrsqrt.f32 %v479_v7  ;;  %vm515_vm5 = vcmp.eq.f32.partialorder %v479_v7, inf  ;;  %v518_v4 = vand.u32 2147483648, %v479_v7  ;;  %vm517_vm6 = vcmp.eq.f32.partialorder %v479_v7, 0.0 }
 0x33e   :  { %v485_v2 = vpop.xlane.xlu1 %484 }
 0x33f   :  { %2626 = vrsqrt.f32 %v485_v2  ;;  %vm529_vm7 = vcmp.eq.f32.partialorder %v485_v2, inf  ;;  %vm531_vm8 = vcmp.eq.f32.partialorder %v485_v2, 0.0 }
 0x341   :  { %v2623_v19 = vpop.eup %2622 }
 0x342   :  { %v500_v31 = vmul.f32 %v2623_v19, %v473_v5  ;;  %v491_v33 = vpop.xlane.xlu1 %490 }
 0x343   :  { %2628 = vrsqrt.f32 %v491_v33  ;;  %vm543_vm9 = vcmp.eq.f32.partialorder %v491_v33, inf  ;;  %vm545_vm10 = vcmp.eq.f32.partialorder %v491_v33, 0.0 }
 0x344   :  { %v502_v44 = vsel %vm501_vm2, %v473_v5, %v500_v31  ;;  %vm628_vm2 = vcmp.lt.f32.partialorder %v3303_v37, 1e-06 }
 0x345   :  { %v2625_v42 = vpop.eup %2624  ;;  %v505_v39 = vsel %vm503_vm3, %v504_v32, %v502_v44  ;;  %vm630_vm3 = vcmp.lt.f32.partialorder %v3307_v10, 1e-06 }
 0x346   :  { %v3368_v18 = vmin.f32 %v505_v39, 85.0  ;;  %v514_v24 = vmul.f32 %v2625_v42, %v479_v7  ;;  %v532_v39 = vand.u32 2147483648, %v485_v2 }
 0x348   :  { %v558_v22 = vmul.f32 1.442695, %v3368_v18  ;;  %v573_v25 = vsub.f32 0.0, %v3368_v18  ;;  %v516_v34 = vsel %vm515_vm5, %v479_v7, %v514_v24  ;;  %vm629_vm11 = vcmp.lt.f32.partialorder %v3368_v18, 1e-06 }
 0x349   :  { %v2627_v19 = vpop.eup %2626  ;;  %v519_v6 = vsel %vm517_vm6, %v518_v4, %v516_v34  ;;  %vm632_vm5 = vcmp.lt.f32.partialorder %v3314_v43, 1e-06  ;;  %vm634_vm6 = vcmp.lt.f32.partialorder %v3326_v51, 1e-06 }
 0x34a   :  { %v582_v54 = vmul.f32 1.442695, %v573_v25  ;;  %v3372_v30 = vmin.f32 %v519_v6, 85.0  ;;  %v528_v31 = vmul.f32 %v2627_v19, %v485_v2  ;;  %2630 = vpow2.f32 %v558_v22 }
 0x34b   :  { %v546_v25 = vand.u32 2147483648, %v491_v33 }
 0x34c   :  { %v562_v42 = vmul.f32 1.442695, %v3372_v30  ;;  %v575_v5 = vsub.f32 0.0, %v3372_v30  ;;  %v530_v32 = vsel %vm529_vm7, %v485_v2, %v528_v31  ;;  %2632 = vpow2.f32 %v582_v54 }
 0x34d   :  { %v2629_v44 = vpop.eup %2628  ;;  %v533_v56 = vsel %vm531_vm8, %v532_v39, %v530_v32  ;;  %vm631_vm12 = vcmp.lt.f32.partialorder %v3372_v30, 1e-06 }
 0x34e   :  { %v586_v24 = vmul.f32 1.442695, %v575_v5  ;;  %v3376_v7 = vmin.f32 %v533_v56, 85.0  ;;  %v542_v4 = vmul.f32 %v2629_v44, %v491_v33  ;;  %2634 = vpow2.f32 %v562_v42 }
 0x350   :  { %v566_v34 = vmul.f32 1.442695, %v3376_v7  ;;  %v577_v22 = vsub.f32 0.0, %v3376_v7  ;;  %v544_v6 = vsel %vm543_vm9, %v491_v33, %v542_v4  ;;  %2636 = vpow2.f32 %v586_v24 }
 0x351   :  { %v547_v19 = vsel %vm545_vm10, %v546_v25, %v544_v6  ;;  %vm633_vm13 = vcmp.lt.f32.partialorder %v3376_v7, 1e-06 }
 0x352   :  { %v590_v29 = vmul.f32 1.442695, %v577_v22  ;;  %v3380_v2 = vmin.f32 %v547_v19, 85.0  ;;  %2638 = vpow2.f32 %v566_v34 }
 0x354   :  { %v570_v54 = vmul.f32 1.442695, %v3380_v2  ;;  %v579_v56 = vsub.f32 0.0, %v3380_v2  ;;  %2640 = vpow2.f32 %v590_v29  ;;  %v2631_v31 = vpop.eup %2630  ;;  %vm635_vm14 = vcmp.lt.f32.partialorder %v3380_v2, 1e-06 }
 0x356   :  { %v2633_v39 = vpop.eup %2632  ;;  %v594_v42 = vmul.f32 1.442695, %v579_v56  ;;  %2642 = vpow2.f32 %v570_v54  ;;  %v637_v54 = vmax.f32 %v3368_v18, 1e-12 }
 0x357   :  { %v3384_v5 = vadd.f32 %v2633_v39, %v2631_v31  ;;  %v613_v12 = vsub.f32 %v2631_v31, %v2633_v39 }
 0x358   :  { %2644 = vpow2.f32 %v594_v42  ;;  %v2635_v32 = vpop.eup %2634 }
 0x359   :  { %4677 = vst [vmem:[#allocation29_spill] sm:$0xff] %v3384_v5  ;;  %2646 = vrcp.f32 %v637_v54 }
 0x35a   :  { %v2637_v33 = vpop.eup %2636 }
 0x35b   :  { %v3386_v44 = vadd.f32 %v2637_v33, %v2635_v32 }
 0x35c   :  { %v2639_v24 = vpop.eup %2638 }
 0x35d   :  { %4678 = vst [vmem:[#allocation30_spill] sm:$0xff] %v3386_v44 }
 0x35e   :  { %v2641_v4 = vpop.eup %2640 }
 0x35f   :  { %v3388_v25 = vadd.f32 %v2641_v4, %v2639_v24  ;;  %v617_v13 = vsub.f32 %v2639_v24, %v2641_v4 }
 0x360   :  { %v2643_v34 = vpop.eup %2642 }
 0x361   :  { %4679 = vst [vmem:[#allocation31_spill] sm:$0xff] %v3388_v25  ;;  %v1294_v22 = vpop.permute.xlu0 %1293  ;;  %v639_v25 = vmax.f32 %v3372_v30, 1e-12  ;;  %v625_v39 = vmul.f32 0.5, %v617_v13 }
 0x362   :  { %v2645_v6 = vpop.eup %2644  ;;  %v1317_v29 = vsel %vm1068_vm4, %v1294_v22, 0.0 }
 0x363   :  { %1318 = vadd.xlane.f32.xlu0 %v1317_v29  ;;  %v1296_v19 = vpop.permute.xlu1 %1295  ;;  %v3392_v56 = vadd.f32 %v2645_v6, %v2643_v34  ;;  %2648 = vrcp.f32 %v639_v25 }
 0x364   :  { %v1320_v42 = vsel %vm1068_vm4, %v1296_v19, 0.0  ;;  %v641_v19 = vmax.f32 %v3376_v7, 1e-12 }
 0x365   :  { %4680 = vst [vmem:[#allocation32_spill] sm:$0xff] %v3392_v56  ;;  %1321 = vadd.xlane.f32.xlu1 %v1320_v42  ;;  %v1298_v26 = vpop.permute.xlu0 %1297  ;;  %v621_v42 = vmul.f32 0.5, %v613_v12  ;;  %v615_v56 = vsub.f32 %v2635_v32, %v2637_v33 }
 0x366   :  { %v1323_v44 = vsel %vm1068_vm4, %v1298_v26, 0.0  ;;  %2650 = vrcp.f32 %v641_v19  ;;  %v643_v26 = vmax.f32 %v3380_v2, 1e-12 }
 0x367   :  { %v1300_v5 = vpop.permute.xlu1 %1299  ;;  %1324 = vadd.xlane.f32.xlu0 %v1323_v44  ;;  %v2647_v44 = vpop.eup %2646  ;;  %v623_v16 = vmul.f32 0.5, %v615_v56 }
 0x368   :  { %v1326_v29 = vsel %vm1068_vm4, %v1300_v5, 0.0  ;;  %v647_v54 = vmul.f32 %v2647_v44, %v621_v42  ;;  %2652 = vrcp.f32 %v643_v26  ;;  %v619_v5 = vsub.f32 %v2643_v34, %v2645_v6 }
 0x369   :  { %v1302_v23 = vpop.permute.xlu0 %1301  ;;  %v636_v26 = vmax.f32 %v3303_v37, 1e-12 }
 0x36a   :  { %v1329_v22 = vsel %vm1068_vm4, %v1302_v23, 0.0  ;;  %v661_v23 = vsel %vm629_vm11, 1.0, %v647_v54  ;;  %v627_v4 = vmul.f32 0.5, %v619_v5  ;;  %v640_v5 = vmax.f32 %v3314_v43, 1e-12 }
 0x36b   :  { %1330 = vadd.xlane.f32.xlu1 %v1329_v22  ;;  %1327 = vadd.xlane.f32.xlu0 %v1326_v29  ;;  %v3404_v32 = vmul.f32 %v661_v23, %v2950_v46  ;;  %2654 = vrcp.f32 %v636_v26  ;;  %v638_v23 = vmax.f32 %v3307_v10, 1e-12 }
 0x36d   :  { %v2649_v53 = vpop.eup %2648  ;;  %2656 = vrcp.f32 %v638_v23 }
 0x36e   :  { %v651_v31 = vmul.f32 %v2649_v53, %v623_v16  ;;  %v677_v53 = vmul.f32 %v3404_v32, %v3224_v35  ;;  %2658 = vrcp.f32 %v640_v5 }
 0x370   :  { %v2651_v22 = vpop.eup %2650  ;;  %v663_v33 = vsel %vm631_vm12, 1.0, %v651_v31  ;;  %v687_v30 = vsel %vm467_vm15, %v677_v53, 0.0 }
 0x371   :  { %v655_v24 = vmul.f32 %v2651_v22, %v625_v39  ;;  %v3411_v13 = vmul.f32 %v663_v33, %v2957_v50  ;;  %v612_v39 = vsub.f32 %v3335_v28, %v3337_v61  ;;  %v642_v33 = vmax.f32 %v3326_v51, 1e-12 }
 0x372   :  { %v2653_v29 = vpop.eup %2652  ;;  %v616_v28 = vsub.f32 %v3352_v60, %v3354_v11  ;;  %v3473_v51 = vmul.f32 0.5, %v3191_v36 }
 0x373   :  { %v665_v16 = vsel %vm633_vm13, 1.0, %v655_v24  ;;  %v659_v34 = vmul.f32 %v2653_v29, %v627_v4  ;;  %v679_v6 = vmul.f32 %v3411_v13, %v3250_v8  ;;  %v620_v22 = vmul.f32 0.5, %v612_v39 }
 0x374   :  { %v3418_v19 = vmul.f32 %v665_v16, %v2977_v58  ;;  %2660 = vrcp.f32 %v642_v33  ;;  %v624_v53 = vmul.f32 0.5, %v616_v28  ;;  %4684 = vst [vmem:[#allocation36_spill] sm:$0xff] %v3473_v51  ;;  %v3480_v33 = vmul.f32 0.5, %v3197_v1 }
 0x375   :  { %v667_v42 = vsel %vm635_vm14, 1.0, %v659_v34  ;;  %v693_v44 = vsel %vm467_vm15, %v679_v6, 0.0  ;;  %v2655_v24 = vpop.eup %2654  ;;  %v3488_v28 = vmul.f32 0.5, %v3199_v63 }
 0x376   :  { %4681 = vst [vmem:[#allocation33_spill] sm:$0xff] %v3418_v19  ;;  %v681_v7 = vmul.f32 %v3418_v19, %v3277_v41  ;;  %v3426_v54 = vmul.f32 %v667_v42, %v2989_v62  ;;  %v645_v4 = vmul.f32 %v2655_v24, %v620_v22  ;;  %v3476_v22 = vmul.f32 0.5, %v3193_v40  ;;  %4686 = vst [vmem:[#allocation38_spill] sm:$0xff] %v3480_v33 }
 0x377   :  { %v2657_v61 = vpop.eup %2656  ;;  %4688 = vst [vmem:[#allocation40_spill] sm:$0xff] %v3488_v28  ;;  %v1345_v40 = vadd.f32 1.0, %v3488_v28  ;;  %v4706_v28 = vld [vmem:[#allocation24_spill] sm:$0xff] }
 0x378   :  { %v1304_v25 = vpop.permute.xlu1 %1303  ;;  %4682 = vst [vmem:[#allocation34_spill] sm:$0xff] %v3426_v54  ;;  %v699_v31 = vsel %vm467_vm15, %v681_v7, 0.0  ;;  %v683_v2 = vmul.f32 %v3426_v54, %v3289_v3  ;;  %v660_v29 = vsel %vm628_vm2, 1.0, %v645_v4  ;;  %4685 = vst [vmem:[#allocation37_spill] sm:$0xff] %v3476_v22  ;;  %v1342_v24 = vadd.f32 1.0, %v3476_v22 }
 0x379   :  { %v1332_v12 = vsel %vm1068_vm4, %v1304_v25, 0.0  ;;  %v3445_v16 = vmul.f32 %v660_v29, %v2948_v45  ;;  %v3484_v4 = vmul.f32 0.5, %v3195_v59 }
 0x37a   :  { %1333 = vadd.xlane.f32.xlu0 %v1332_v12  ;;  %v705_v25 = vsel %vm467_vm15, %v683_v2, 0.0  ;;  %v614_v12 = vsub.f32 %v3344_v14, %v3346_v48  ;;  %v618_v14 = vsub.f32 %v3360_v20, %v3362_v55  ;;  %v2659_v48 = vpop.eup %2658 }
 0x37b   :  { %v676_v37 = vmul.f32 %v3445_v16, %v3211_v21  ;;  %4687 = vst [vmem:[#allocation39_spill] sm:$0xff] %v3484_v4  ;;  %v1344_v36 = vadd.f32 1.0, %v3484_v4  ;;  %v4723_v4 = vld [vmem:[#allocation32_spill] sm:$0xff] }
 0x37c   :  { %v1308_v56 = vpop.permute.xlu1 %1307  ;;  %v626_v6 = vmul.f32 0.5, %v618_v14 }
 0x37d   :  { %v1338_v18 = vsel %vm1068_vm4, %v1308_v56, 0.0  ;;  %v622_v56 = vmul.f32 0.5, %v614_v12  ;;  %v684_v10 = vsel %vm467_vm15, %v676_v37, 0.0  ;;  %v1341_v12 = vadd.f32 1.0, %v3473_v51 }
 0x37e   :  { %1339 = vadd.xlane.f32.xlu0 %v1338_v18  ;;  %v2661_v11 = vpop.eup %2660 }
 0x37f   :  { %v649_v18 = vmul.f32 %v2657_v61, %v622_v56  ;;  %v657_v55 = vmul.f32 %v2661_v11, %v626_v6  ;;  %2662 = vrcp.f32 %v1341_v12  ;;  %v1343_v56 = vadd.f32 1.0, %v3480_v33  ;;  %v4694_v12 = vld [vmem:[#allocation19_spill] sm:$0xff] }
 0x380   :  { %2664 = vrcp.f32 %v1342_v24 }
 0x381   :  { %v662_v34 = vsel %vm630_vm3, 1.0, %v649_v18  ;;  %v666_v23 = vsel %vm634_vm6, 1.0, %v657_v55  ;;  %2666 = vrcp.f32 %v1343_v56  ;;  %v4695_v56 = vld [vmem:[#allocation20_spill] sm:$0xff] }
 0x382   :  { %688 = vadd.xlane.f32.xlu0 %v687_v30  ;;  %v653_v30 = vmul.f32 %v2659_v48, %v624_v53  ;;  %v3452_v26 = vmul.f32 %v662_v34, %v2961_v52  ;;  %v3466_v2 = vmul.f32 %v666_v23, %v2993_v0  ;;  %2668 = vrcp.f32 %v1344_v36  ;;  %v4691_v23 = vld [vmem:[#allocation18_spill] sm:$0xff] }
 0x383   :  { %2670 = vrcp.f32 %v1345_v40  ;;  %v3502_v34 = vmul.f32 0.5, %v3221_v9 }
 0x384   :  { %v664_v20 = vsel %vm632_vm5, 1.0, %v653_v30  ;;  %4683 = vst [vmem:[#allocation35_spill] sm:$0xff] %v3466_v2  ;;  %v682_v5 = vmul.f32 %v3466_v2, %v3324_v17 }
 0x385   :  { %v3459_v7 = vmul.f32 %v664_v20, %v2973_v57  ;;  %4689 = vst [vmem:[#allocation41_spill] sm:$0xff] %v3502_v34 }
 0x386   :  { %694 = vadd.xlane.f32.xlu0 %v693_v44  ;;  %v678_v44 = vmul.f32 %v3452_v26, %v3232_v38 }
 0x387   :  { %v680_v43 = vmul.f32 %v3459_v7, %v3259_v15 }
 0x389   :  { %v696_v39 = vsel %vm467_vm15, %v680_v43, 0.0  ;;  %v2663_v1 = vpop.eup %2662 }
 0x38a   :  { %700 = vadd.xlane.f32.xlu0 %v699_v31  ;;  %v690_v31 = vsel %vm467_vm15, %v678_v44, 0.0  ;;  %v2665_v29 = vpop.eup %2664  ;;  %v1346_v44 = vadd.f32 1.0, %v3502_v34 }
 0x38b   :  { %v2667_v14 = vpop.eup %2666 }
 0x38c   :  { %v2669_v11 = vpop.eup %2668  ;;  %2672 = vrcp.f32 %v1346_v44 }
 0x38d   :  { %v2671_v55 = vpop.eup %2670 }
 0x38e   :  { %706 = vadd.xlane.f32.xlu0 %v705_v25  ;;  %v702_v25 = vsel %vm467_vm15, %v682_v5, 0.0 }
 0x39b   :  { %v1306_v60 = vpop.permute.xlu0 %1305 }
 0x39c   :  { %v1335_v42 = vsel %vm1068_vm4, %v1306_v60, 0.0 }
 0x39d   :  { %1336 = vadd.xlane.f32.xlu1 %v1335_v42 }
 0x3a1   :  { %685 = vadd.xlane.f32.xlu1 %v684_v10 }
 0x3a5   :  { %691 = vadd.xlane.f32.xlu1 %v690_v31  ;;  %v3521_v31 = vmul.f32 0.5, %v4691_v23 }
 0x3a7   :  { %4692 = vst [vmem:[#allocation18_spill] sm:$0xff] %v3521_v31 }
 0x3a9   :  { %697 = vadd.xlane.f32.xlu1 %v696_v39 }
 0x3ad   :  { %703 = vadd.xlane.f32.xlu1 %v702_v25 }
 0x3f0   :  { %v3492_v61 = vpop.xlane.xlu0 %1318 }
 0x3f1   :  { %v1350_v59 = vmul.f32 %v2663_v1, %v3492_v61 }
 0x3f2   :  { %v3495_v18 = vpop.xlane.xlu1 %1321 }
 0x3f3   :  { %v1365_v53 = vmul.f32 %v1350_v59, %v3217_v27  ;;  %v1352_v63 = vmul.f32 %v2665_v29, %v3495_v18  ;;  %v1348_v29 = vadd.f32 1.0, %v3521_v31 }
 0x3f4   :  { %v3499_v48 = vpop.xlane.xlu0 %1324 }
 0x3f5   :  { %v1366_v30 = vmul.f32 %v1352_v63, %v3229_v49  ;;  %v1354_v6 = vmul.f32 %v2667_v14, %v3499_v48  ;;  %v3507_v60 = vadd.f32 %v1365_v53, %v3211_v21  ;;  %2674 = vrcp.f32 %v1348_v29  ;;  %v2673_v14 = vpop.eup %2672 }
 0x3f7   :  { %4690 = vst [vmem:[#allocation42_spill] sm:$0xff] %v3507_v60  ;;  %v1367_v42 = vmul.f32 %v1354_v6, %v3242_v47  ;;  %v1381_v37 = vmul.f32 %v3507_v60, %v3507_v60  ;;  %v3513_v20 = vadd.f32 %v1366_v30, %v3224_v35 }
 0x3f8   :  { %v3515_v10 = vpop.xlane.xlu0 %1327  ;;  %v3517_v9 = vpop.xlane.xlu1 %1330 }
 0x3f9   :  { %1397 = vrot.lane.b32.xlu1 %v1381_v37, %s2822_s3  ;;  %v1356_v43 = vmul.f32 %v2669_v11, %v3515_v10  ;;  %v1358_v39 = vmul.f32 %v2671_v55, %v3517_v9  ;;  %v1382_v5 = vmul.f32 %v3513_v20, %v3513_v20  ;;  %v3529_v25 = vadd.f32 %v1367_v42, %v3232_v38  ;;  %v4698_v11 = vld [vmem:[#allocation21_spill] sm:$0xff] }
 0x3fb   :  { %4693 = vst [vmem:[#allocation43_spill] sm:$0xff] %v3529_v25  ;;  %v1368_v24 = vmul.f32 %v1356_v43, %v4694_v12  ;;  %v1369_v36 = vmul.f32 %v1358_v39, %v4695_v56  ;;  %1399 = vrot.lane.b32.xlu0 %v1382_v5, %s2822_s3  ;;  %v1383_v40 = vmul.f32 %v3529_v25, %v3529_v25  ;;  %v4700_v43 = vld [vmem:[#allocation22_spill] sm:$0xff]  ;;  %v3653_v25 = vmul.f32 0.5, %v4723_v4 }
 0x3fd   :  { %1401 = vrot.lane.b32.xlu1 %v1383_v40, %s2822_s3  ;;  %v3538_v1 = vadd.f32 %v1368_v24, %v3250_v8  ;;  %v3541_v59 = vadd.f32 %v1369_v36, %v3259_v15  ;;  %v4702_v40 = vld [vmem:[#allocation29_spill] sm:$0xff]  ;;  %4724 = vst [vmem:[#allocation32_spill] sm:$0xff] %v3653_v25 }
 0x3fe   :  { %v3570_v29 = vmul.f32 0.5, %v4702_v40 }
 0x3ff   :  { %4696 = vst [vmem:[#allocation44_spill] sm:$0xff] %v3538_v1  ;;  %4697 = vst [vmem:[#allocation45_spill] sm:$0xff] %v3541_v59  ;;  %v1384_v53 = vmul.f32 %v3538_v1, %v3538_v1  ;;  %v1385_v63 = vmul.f32 %v3541_v59, %v3541_v59  ;;  %v2675_v37 = vpop.eup %2674 }
 0x400   :  { %4703 = vst [vmem:[#allocation29_spill] sm:$0xff] %v3570_v29 }
 0x401   :  { %1403 = vrot.lane.b32.xlu1 %v1384_v53, %s2822_s3  ;;  %1405 = vrot.lane.b32.xlu0 %v1385_v63, %s2822_s3  ;;  %v709_v53 = vadd.f32 1.0, %v3570_v29  ;;  %v4704_v63 = vld [vmem:[#allocation23_spill] sm:$0xff] }
 0x403   :  { %2676 = vrcp.f32 %v709_v53 }
 0x407   :  { %v3550_v30 = vpop.xlane.xlu0 %1333 }
 0x408   :  { %v1360_v6 = vmul.f32 %v2673_v14, %v3550_v30  ;;  %v3575_v14 = vmul.f32 0.5, %v4704_v63  ;;  %v4707_v63 = vld [vmem:[#allocation25_spill] sm:$0xff] }
 0x409   :  { %v3587_v56 = vmul.f32 0.5, %v4707_v63 }
 0x40a   :  { %v1370_v42 = vmul.f32 %v1360_v6, %v4698_v11  ;;  %4705 = vst [vmem:[#allocation23_spill] sm:$0xff] %v3575_v14  ;;  %v1347_v6 = vadd.f32 1.0, %v3575_v14  ;;  %v4719_v11 = vld [vmem:[#allocation31_spill] sm:$0xff] }
 0x40b   :  { %v3554_v55 = vpop.xlane.xlu0 %1339  ;;  %4708 = vst [vmem:[#allocation25_spill] sm:$0xff] %v3587_v56  ;;  %v708_v14 = vadd.f32 1.0, %v3587_v56  ;;  %v4714_v56 = vld [vmem:[#allocation27_spill] sm:$0xff] }
 0x40c   :  { %v1364_v44 = vmul.f32 %v2675_v37, %v3554_v55  ;;  %v3558_v23 = vadd.f32 %v1370_v42, %v3277_v41  ;;  %2678 = vrcp.f32 %v1347_v6 }
 0x40d   :  { %v2677_v37 = vpop.eup %2676  ;;  %2680 = vrcp.f32 %v708_v14 }
 0x40e   :  { %4699 = vst [vmem:[#allocation46_spill] sm:$0xff] %v3558_v23  ;;  %v1372_v39 = vmul.f32 %v1364_v44, %v4700_v43  ;;  %v1386_v5 = vmul.f32 %v3558_v23, %v3558_v23 }
 0x40f   :  { %v3578_v42 = vpop.xlane.xlu0 %688 }
 0x410   :  { %1407 = vrot.lane.b32.xlu1 %v1386_v5, %s2822_s3  ;;  %v3565_v24 = vadd.f32 %v1372_v39, %v3289_v3  ;;  %v719_v44 = vmul.f32 %v2677_v37, %v3578_v42 }
 0x412   :  { %4701 = vst [vmem:[#allocation47_spill] sm:$0xff] %v3565_v24  ;;  %v1388_v36 = vmul.f32 %v3565_v24, %v3565_v24  ;;  %v733_v40 = vmul.f32 %v719_v44, %v3404_v32  ;;  %v4710_v24 = vld [vmem:[#allocation26_spill] sm:$0xff] }
 0x413   :  { %v3599_v44 = vmul.f32 0.5, %v4710_v24  ;;  %v3611_v24 = vmul.f32 0.5, %v4714_v56 }
 0x414   :  { %1411 = vrot.lane.b32.xlu1 %v1388_v36, %s2822_s3  ;;  %v3593_v6 = vadd.f32 %v733_v40, %v3224_v35 }
 0x415   :  { %4711 = vst [vmem:[#allocation26_spill] sm:$0xff] %v3599_v44  ;;  %4715 = vst [vmem:[#allocation27_spill] sm:$0xff] %v3611_v24 }
 0x416   :  { %v2679_v39 = vpop.eup %2678 }
 0x417   :  { %v2681_v31 = vpop.eup %2680 }
 0x42a   :  { %v3581_v5 = vpop.xlane.xlu1 %1336 }
 0x42b   :  { %v1362_v36 = vmul.f32 %v2679_v39, %v3581_v5  ;;  %v749_v39 = vmul.f32 %v3593_v6, %v3593_v6 }
 0x42d   :  { %v1371_v59 = vmul.f32 %v1362_v36, %v4706_v28  ;;  %v4712_v36 = vld [vmem:[#allocation30_spill] sm:$0xff]  ;;  %v759_v40 = vsel %vm467_vm15, %v749_v39, 0.0 }
 0x42e   :  { %v3605_v63 = vmul.f32 0.5, %v4712_v36  ;;  %v3613_v28 = vpop.xlane.xlu1 %685 }
 0x42f   :  { %v3590_v53 = vadd.f32 %v1371_v59, %v3324_v17  ;;  %v710_v59 = vadd.f32 1.0, %v3599_v44  ;;  %4716 = vst [vmem:[#allocation49_spill] sm:$0xff] %v3613_v28  ;;  %v717_v36 = vmul.f32 %v2681_v31, %v3613_v28 }
 0x430   :  { %4713 = vst [vmem:[#allocation30_spill] sm:$0xff] %v3605_v63 }
 0x431   :  { %4709 = vst [vmem:[#allocation48_spill] sm:$0xff] %v3590_v53  ;;  %v1387_v37 = vmul.f32 %v3590_v53, %v3590_v53  ;;  %v711_v53 = vadd.f32 1.0, %v3605_v63  ;;  %2682 = vrcp.f32 %v710_v59  ;;  %v732_v39 = vmul.f32 %v717_v36, %v3445_v16  ;;  %v3621_v59 = vpop.xlane.xlu0 %694 }
 0x432   :  { %v3617_v14 = vpop.xlane.xlu1 %691 }
 0x433   :  { %1409 = vrot.lane.b32.xlu0 %v1387_v37, %s2822_s3  ;;  %2684 = vrcp.f32 %v711_v53  ;;  %v712_v37 = vadd.f32 1.0, %v3611_v24  ;;  %4717 = vst [vmem:[#allocation50_spill] sm:$0xff] %v3617_v14  ;;  %v3626_v43 = vadd.f32 %v732_v39, %v3211_v21  ;;  %v4721_v39 = vld [vmem:[#allocation28_spill] sm:$0xff] }
 0x434   :  { %v3642_v63 = vmul.f32 0.5, %v4721_v39 }
 0x435   :  { %2686 = vrcp.f32 %v712_v37  ;;  %v3631_v37 = vmul.f32 0.5, %v4719_v11  ;;  %v748_v24 = vmul.f32 %v3626_v43, %v3626_v43  ;;  %v3665_v4 = vpop.xlane.xlu0 %700 }
 0x436   :  { %v3628_v23 = vpop.xlane.xlu1 %697  ;;  %4722 = vst [vmem:[#allocation28_spill] sm:$0xff] %v3642_v63 }
 0x437   :  { %4718 = vst [vmem:[#allocation51_spill] sm:$0xff] %v3628_v23  ;;  %4720 = vst [vmem:[#allocation31_spill] sm:$0xff] %v3631_v37  ;;  %v756_v11 = vsel %vm467_vm15, %v748_v24, 0.0 }
 0x438   :  { %760 = vadd.xlane.f32.xlu1 %v759_v40 }
 0x43b   :  { %v2683_v44 = vpop.eup %2682 }
 0x43c   :  { %v721_v40 = vmul.f32 %v2683_v44, %v3617_v14 }
 0x43d   :  { %v2685_v56 = vpop.eup %2684 }
 0x43e   :  { %v723_v34 = vmul.f32 %v2685_v56, %v3621_v59  ;;  %v734_v53 = vmul.f32 %v721_v40, %v3452_v26  ;;  %v713_v40 = vadd.f32 1.0, %v3631_v37  ;;  %v715_v37 = vadd.f32 1.0, %v3653_v25  ;;  %v3673_v25 = vpop.xlane.xlu0 %706 }
 0x43f   :  { %v2687_v31 = vpop.eup %2686 }
 0x440   :  { %v735_v36 = vmul.f32 %v723_v34, %v3411_v13  ;;  %v725_v44 = vmul.f32 %v2687_v31, %v3628_v23  ;;  %v3638_v56 = vadd.f32 %v734_v53, %v3232_v38  ;;  %2688 = vrcp.f32 %v713_v40 }
 0x441   :  { %v714_v53 = vadd.f32 1.0, %v3642_v63  ;;  %v3669_v63 = vpop.xlane.xlu1 %703 }
 0x442   :  { %v736_v33 = vmul.f32 %v725_v44, %v3459_v7  ;;  %v750_v34 = vmul.f32 %v3638_v56, %v3638_v56  ;;  %v3649_v31 = vadd.f32 %v735_v36, %v3250_v8 }
 0x443   :  { %2690 = vrcp.f32 %v714_v53 }
 0x444   :  { %v762_v39 = vsel %vm467_vm15, %v750_v34, 0.0  ;;  %v751_v44 = vmul.f32 %v3649_v31, %v3649_v31  ;;  %v3659_v24 = vadd.f32 %v736_v33, %v3259_v15  ;;  %2692 = vrcp.f32 %v715_v37 }
 0x446   :  { %v765_v36 = vsel %vm467_vm15, %v751_v44, 0.0  ;;  %v752_v40 = vmul.f32 %v3659_v24, %v3659_v24 }
 0x44a   :  { %v2689_v34 = vpop.eup %2688 }
 0x44b   :  { %v727_v33 = vmul.f32 %v2689_v34, %v3665_v4 }
 0x44d   :  { %v737_v53 = vmul.f32 %v727_v33, %v3418_v19 }
 0x452   :  { %757 = vadd.xlane.f32.xlu0 %v756_v11  ;;  %v768_v11 = vsel %vm467_vm15, %v752_v40, 0.0  ;;  %v3678_v40 = vadd.f32 %v737_v53, %v3277_v41 }
 0x454   :  { %4725 = vst [vmem:[#allocation52_spill] sm:$0xff] %v3678_v40  ;;  %v753_v33 = vmul.f32 %v3678_v40, %v3678_v40 }
 0x456   :  { %763 = vadd.xlane.f32.xlu0 %v762_v39  ;;  %v2691_v39 = vpop.eup %2690  ;;  %v771_v53 = vsel %vm467_vm15, %v753_v33, 0.0 }
 0x457   :  { %v729_v44 = vmul.f32 %v2691_v39, %v3669_v63  ;;  %v2693_v47 = vpop.eup %2692 }
 0x459   :  { %v738_v37 = vmul.f32 %v729_v44, %v3466_v2 }
 0x45a   :  { %766 = vadd.xlane.f32.xlu0 %v765_v36  ;;  %v731_v36 = vmul.f32 %v2693_v47, %v3673_v25 }
 0x45b   :  { %v3685_v39 = vadd.f32 %v738_v37, %v3324_v17 }
 0x45c   :  { %v739_v34 = vmul.f32 %v731_v36, %v3426_v54 }
 0x45d   :  { %4726 = vst [vmem:[#allocation53_spill] sm:$0xff] %v3685_v39  ;;  %v754_v2 = vmul.f32 %v3685_v39, %v3685_v39 }
 0x45e   :  { %769 = vadd.xlane.f32.xlu0 %v768_v11  ;;  %v3692_v36 = vadd.f32 %v739_v34, %v3289_v3 }
 0x45f   :  { %v774_v54 = vsel %vm467_vm15, %v754_v2, 0.0 }
 0x460   :  { %4727 = vst [vmem:[#allocation54_spill] sm:$0xff] %v3692_v36 }
 0x46b   :  { %v1398_v11 = vpop.permute.xlu1 %1397 }
 0x46c   :  { %v1421_v51 = vsel %vm1068_vm4, %v1398_v11, 0.0 }
 0x46d   :  { %1422 = vadd.xlane.f32.xlu0 %v1421_v51  ;;  %v1400_v1 = vpop.permute.xlu0 %1399  ;;  %v755_v51 = vmul.f32 %v3692_v36, %v3692_v36 }
 0x46e   :  { %v1424_v47 = vsel %vm1068_vm4, %v1400_v1, 0.0 }
 0x46f   :  { %1425 = vadd.xlane.f32.xlu1 %v1424_v47  ;;  %v1402_v44 = vpop.permute.xlu1 %1401  ;;  %v777_v1 = vsel %vm467_vm15, %v755_v51, 0.0 }
 0x470   :  { %v1427_v33 = vsel %vm1068_vm4, %v1402_v44, 0.0  ;;  %v781_v44 = vmul.f32 %v3578_v42, %v3578_v42 }
 0x471   :  { %772 = vadd.xlane.f32.xlu0 %v771_v53 }
 0x473   :  { %v1404_v11 = vpop.permute.xlu1 %1403  ;;  %v1406_v53 = vpop.permute.xlu0 %1405 }
 0x474   :  { %v1430_v37 = vsel %vm1068_vm4, %v1404_v11, 0.0  ;;  %v1433_v2 = vsel %vm1068_vm4, %v1406_v53, 0.0 }
 0x475   :  { %775 = vadd.xlane.f32.xlu0 %v774_v54  ;;  %1431 = vadd.xlane.f32.xlu1 %v1430_v37 }
 0x479   :  { %778 = vadd.xlane.f32.xlu0 %v777_v1  ;;  %1428 = vadd.xlane.f32.xlu1 %v1427_v33 }
 0x482   :  { %v1408_v47 = vpop.permute.xlu1 %1407 }
 0x483   :  { %v1436_v34 = vsel %vm1068_vm4, %v1408_v47, 0.0 }
 0x484   :  { %1437 = vadd.xlane.f32.xlu1 %v1436_v34 }
 0x486   :  { %v1412_v39 = vpop.permute.xlu1 %1411 }
 0x487   :  { %v1442_v36 = vsel %vm1068_vm4, %v1412_v39, 0.0 }
 0x488   :  { %1434 = vadd.xlane.f32.xlu1 %v1433_v2  ;;  %1443 = vadd.xlane.f32.xlu0 %v1442_v36 }
 0x4a5   :  { %v1410_v54 = vpop.permute.xlu0 %1409 }
 0x4a6   :  { %v1439_v11 = vsel %vm1068_vm4, %v1410_v54, 0.0  ;;  %v780_v54 = vmul.f32 %v3613_v28, %v3613_v28 }
 0x4a7   :  { %1440 = vadd.xlane.f32.xlu1 %v1439_v11 }
 0x4c5   :  { %v761_v51 = vpop.xlane.xlu1 %760 }
 0x4c6   :  { %v789_v37 = vsub.f32 %v761_v51, %v781_v44 }
 0x4c8   :  { %v797_v1 = vmax.f32 %v789_v37, 0.0 }
 0x4ca   :  { %2694 = vrsqrt.f32 %v797_v1  ;;  %vm813_vm15 = vcmp.eq.f32.partialorder %v797_v1, inf  ;;  %v816_v34 = vand.u32 2147483648, %v797_v1  ;;  %vm815_vm7 = vcmp.eq.f32.partialorder %v797_v1, 0.0 }
 0x4d4   :  { %v2695_v33 = vpop.eup %2694 }
 0x4d5   :  { %v812_v47 = vmul.f32 %v2695_v33, %v797_v1  ;;  %v782_v33 = vmul.f32 %v3617_v14, %v3617_v14 }
 0x4d7   :  { %v814_v53 = vsel %vm813_vm15, %v797_v1, %v812_v47 }
 0x4d8   :  { %v817_v39 = vsel %vm815_vm7, %v816_v34, %v814_v53 }
 0x4d9   :  { %v861_v2 = vmin.f32 %v817_v39, 85.0 }
 0x4db   :  { %v870_v36 = vmul.f32 1.442695, %v861_v2  ;;  %v885_v12 = vsub.f32 0.0, %v861_v2  ;;  %v949_v44 = vmax.f32 %v861_v2, 1e-12 }
 0x4dc   :  { %vm941_vm9 = vcmp.lt.f32.partialorder %v861_v2, 1e-06 }
 0x4dd   :  { %v894_v22 = vmul.f32 1.442695, %v885_v12  ;;  %2696 = vpow2.f32 %v870_v36  ;;  %v783_v12 = vmul.f32 %v3621_v59, %v3621_v59 }
 0x4df   :  { %v758_v11 = vpop.xlane.xlu0 %757  ;;  %2698 = vpow2.f32 %v894_v22 }
 0x4e0   :  { %v788_v51 = vsub.f32 %v758_v11, %v780_v54  ;;  %2700 = vrcp.f32 %v949_v44  ;;  %v784_v54 = vmul.f32 %v3628_v23, %v3628_v23 }
 0x4e2   :  { %v796_v37 = vmax.f32 %v788_v51, 0.0 }
 0x4e3   :  { %v764_v60 = vpop.xlane.xlu0 %763 }
 0x4e4   :  { %2702 = vrsqrt.f32 %v796_v37  ;;  %v790_v1 = vsub.f32 %v764_v60, %v782_v33  ;;  %vm806_vm8 = vcmp.eq.f32.partialorder %v796_v37, inf  ;;  %vm808_vm10 = vcmp.eq.f32.partialorder %v796_v37, 0.0 }
 0x4e6   :  { %v798_v47 = vmax.f32 %v790_v1, 0.0 }
 0x4e7   :  { %v767_v34 = vpop.xlane.xlu0 %766  ;;  %v2697_v53 = vpop.eup %2696 }
 0x4e8   :  { %2704 = vrsqrt.f32 %v798_v47  ;;  %v791_v39 = vsub.f32 %v767_v34, %v783_v12  ;;  %v809_v34 = vand.u32 2147483648, %v796_v37  ;;  %vm820_vm11 = vcmp.eq.f32.partialorder %v798_v47, inf }
 0x4e9   :  { %v2699_v36 = vpop.eup %2698  ;;  %v823_v2 = vand.u32 2147483648, %v798_v47  ;;  %vm822_vm12 = vcmp.eq.f32.partialorder %v798_v47, 0.0 }
 0x4ea   :  { %v3712_v22 = vmax.f32 %v791_v39, 0.0  ;;  %v909_v11 = vadd.f32 %v2699_v36, %v2697_v53  ;;  %v925_v51 = vsub.f32 %v2697_v53, %v2699_v36  ;;  %v2701_v44 = vpop.eup %2700 }
 0x4eb   :  { %v770_v14 = vpop.xlane.xlu0 %769 }
 0x4ec   :  { %2706 = vrsqrt.f32 %v3712_v22  ;;  %v792_v60 = vsub.f32 %v770_v14, %v784_v54  ;;  %v917_v33 = vmul.f32 0.5, %v909_v11  ;;  %v933_v1 = vmul.f32 0.5, %v925_v51 }
 0x4ed   :  { %vm827_vm13 = vcmp.eq.f32.partialorder %v3712_v22, inf  ;;  %vm829_vm14 = vcmp.eq.f32.partialorder %v3712_v22, 0.0 }
 0x4ee   :  { %v2703_v28 = vpop.eup %2702  ;;  %v3717_v40 = vmax.f32 %v792_v60, 0.0  ;;  %v959_v12 = vmul.f32 %v2701_v44, %v933_v1  ;;  %v1005_v19 = vmul.f32 %v917_v33, %v3404_v32  ;;  %v981_v11 = vmul.f32 %v917_v33, %v3570_v29 }
 0x4ef   :  { %v805_v27 = vmul.f32 %v2703_v28, %v796_v37 }
 0x4f0   :  { %v973_v39 = vsel %vm941_vm9, 1.0, %v959_v12  ;;  %2708 = vrsqrt.f32 %v3717_v40  ;;  %vm834_vm2 = vcmp.eq.f32.partialorder %v3717_v40, inf  ;;  %vm836_vm3 = vcmp.eq.f32.partialorder %v3717_v40, 0.0 }
 0x4f1   :  { %v807_v23 = vsel %vm806_vm8, %v796_v37, %v805_v27  ;;  %v989_v36 = vmul.f32 %v973_v39, %v3578_v42  ;;  %v1013_v14 = vmul.f32 %v973_v39, %v3593_v6 }
 0x4f2   :  { %v2705_v53 = vpop.eup %2704  ;;  %v810_v54 = vsel %vm808_vm10, %v809_v34, %v807_v23 }
 0x4f3   :  { %v819_v28 = vmul.f32 %v2705_v53, %v798_v47  ;;  %v3724_v51 = vmin.f32 %v810_v54, 85.0  ;;  %v1021_v60 = vadd.f32 %v1013_v14, %v1005_v19  ;;  %v3726_v44 = vadd.f32 %v989_v36, %v981_v11 }
 0x4f4   :  { %v1030_v19 = vadd.f32 %v3232_v38, %v2961_v52  ;;  %v1446_v14 = vmul.f32 %v3495_v18, %v3495_v18  ;;  %v785_v11 = vmul.f32 %v3665_v4, %v3665_v4 }
 0x4f5   :  { %4728 = vst [vmem:[#allocation55_spill] sm:$0xff] %v3726_v44  ;;  %v868_v27 = vmul.f32 1.442695, %v3724_v51  ;;  %v884_v37 = vsub.f32 0.0, %v3724_v51  ;;  %v821_v42 = vsel %vm820_vm11, %v798_v47, %v819_v28  ;;  %1703 = vrot.lane.b32.xlu0 %v1021_v60, %s2824_s9  ;;  %v830_v47 = vand.u32 2147483648, %v3712_v22 }
 0x4f6   :  { %v2707_v6 = vpop.eup %2706  ;;  %v824_v23 = vsel %vm822_vm12, %v823_v2, %v821_v42  ;;  %v948_v53 = vmax.f32 %v3724_v51, 1e-12  ;;  %v1032_v2 = vadd.f32 %v3259_v15, %v2973_v57  ;;  %vm940_vm5 = vcmp.lt.f32.partialorder %v3724_v51, 1e-06 }
 0x4f7   :  { %v826_v33 = vmul.f32 %v2707_v6, %v3712_v22  ;;  %v892_v1 = vmul.f32 1.442695, %v884_v37  ;;  %v3732_v12 = vmin.f32 %v824_v23, 85.0  ;;  %2710 = vpow2.f32 %v868_v27 }
 0x4f9   :  { %2712 = vpow2.f32 %v892_v1  ;;  %v886_v34 = vsub.f32 0.0, %v3732_v12  ;;  %1737 = vrot.lane.b32.xlu0 %v1030_v19, %s2824_s9  ;;  %v828_v36 = vsel %vm827_vm13, %v3712_v22, %v826_v33  ;;  %v872_v38 = vmul.f32 1.442695, %v3732_v12 }
 0x4fa   :  { %v1423_v39 = vpop.xlane.xlu0 %1422  ;;  %v831_v60 = vsel %vm829_vm14, %v830_v47, %v828_v36  ;;  %v2709_v27 = vpop.eup %2708  ;;  %v950_v42 = vmax.f32 %v3732_v12, 1e-12  ;;  %v1034_v33 = vadd.f32 %v3324_v17, %v2993_v0  ;;  %v1445_v47 = vmul.f32 %v3492_v61, %v3492_v61 }
 0x4fb   :  { %v896_v54 = vmul.f32 1.442695, %v886_v34  ;;  %v3751_v6 = vmin.f32 %v831_v60, 85.0  ;;  %v833_v1 = vmul.f32 %v2709_v27, %v3717_v40  ;;  %v3781_v60 = vadd.f32 %v3250_v8, %v2957_v50 }
 0x4fc   :  { %v1426_v28 = vpop.xlane.xlu1 %1425  ;;  %v3791_v8 = vadd.f32 %v3277_v41, %v2977_v58  ;;  %v3807_v41 = vadd.f32 %v3289_v3, %v2989_v62  ;;  %v3823_v3 = vmul.f32 %v3554_v55, %v3554_v55  ;;  %vm942_vm6 = vcmp.lt.f32.partialorder %v3732_v12, 1e-06 }
 0x4fd   :  { %v1454_v37 = vsub.f32 %v1426_v28, %v1446_v14  ;;  %2714 = vpow2.f32 %v896_v54  ;;  %1741 = vrot.lane.b32.xlu0 %v1032_v2, %s2824_s9  ;;  %v874_v19 = vmul.f32 1.442695, %v3751_v6  ;;  %v887_v34 = vsub.f32 0.0, %v3751_v6 }
 0x4fe   :  { %v773_v23 = vpop.xlane.xlu0 %772  ;;  %2716 = vrcp.f32 %v948_v53  ;;  %v3767_v53 = vadd.f32 %v3211_v21, %v2948_v45  ;;  %v1453_v21 = vsub.f32 %v1423_v39, %v1445_v47  ;;  %vm943_vm7 = vcmp.lt.f32.partialorder %v3751_v6, 1e-06 }
 0x4ff   :  { %v793_v22 = vsub.f32 %v773_v23, %v785_v11  ;;  %2718 = vpow2.f32 %v872_v38  ;;  %v3757_v15 = vmax.f32 %v1454_v37, 0.0  ;;  %v1448_v38 = vmul.f32 %v3515_v10, %v3515_v10 }
 0x500   :  { %2720 = vrcp.f32 %v950_v42  ;;  %v3775_v11 = vadd.f32 %v3224_v35, %v2950_v46  ;;  %v898_v28 = vmul.f32 1.442695, %v887_v34  ;;  %v835_v42 = vsel %vm834_vm2, %v3717_v40, %v833_v1 }
 0x501   :  { %v3763_v36 = vmax.f32 %v793_v22, 0.0  ;;  %v2711_v17 = vpop.eup %2710  ;;  %2722 = vrsqrt.f32 %v3757_v15  ;;  %1745 = vrot.lane.b32.xlu0 %v1034_v33, %s2824_s9  ;;  %v837_v23 = vand.u32 2147483648, %v3717_v40  ;;  %v786_v35 = vmul.f32 %v3669_v63, %v3669_v63 }
 0x502   :  { %v776_v14 = vpop.xlane.xlu0 %775  ;;  %v1432_v54 = vpop.xlane.xlu1 %1431  ;;  %v951_v34 = vmax.f32 %v3751_v6, 1e-12  ;;  %v3793_v47 = vmax.f32 %v1453_v21, 0.0  ;;  %v3803_v40 = vmul.f32 %v3517_v9, %v3517_v9  ;;  %vm1478_vm15 = vcmp.eq.f32.partialorder %v3757_v15, inf }
 0x503   :  { %v2713_v2 = vpop.eup %2712  ;;  %2724 = vrsqrt.f32 %v3763_v36  ;;  %v1456_v27 = vsub.f32 %v1432_v54, %v1448_v38  ;;  %v794_v1 = vsub.f32 %v776_v14, %v786_v35  ;;  %v787_v38 = vmul.f32 %v3673_v25, %v3673_v25 }
 0x504   :  { %v924_v37 = vsub.f32 %v2711_v17, %v2713_v2  ;;  %2726 = vpow2.f32 %v874_v19  ;;  %v908_v22 = vadd.f32 %v2713_v2, %v2711_v17  ;;  %v838_v17 = vsel %vm836_vm3, %v837_v23, %v835_v42 }
 0x505   :  { %2728 = vpow2.f32 %v898_v28  ;;  %v3797_v2 = vmax.f32 %v1456_v27, 0.0  ;;  %v3813_v27 = vmul.f32 %v3550_v30, %v3550_v30  ;;  %v3815_v44 = vmin.f32 %v838_v17, 85.0 }
 0x506   :  { %v779_v33 = vpop.xlane.xlu0 %778  ;;  %v932_v39 = vmul.f32 0.5, %v924_v37  ;;  %v1429_v54 = vpop.xlane.xlu1 %1428  ;;  %v1447_v37 = vmul.f32 %v3499_v48, %v3499_v48  ;;  %v3809_v35 = vmul.f32 0.5, %v908_v22  ;;  %2730 = vrcp.f32 %v951_v34 }
 0x507   :  { %v2715_v19 = vpop.eup %2714  ;;  %v795_v21 = vsub.f32 %v779_v33, %v787_v38  ;;  %2732 = vrsqrt.f32 %v3793_v47  ;;  %v3818_v57 = vmax.f32 %v794_v1, 0.0  ;;  %v888_v52 = vsub.f32 0.0, %v3815_v44 }
 0x508   :  { %v2717_v28 = vpop.eup %2716  ;;  %4729 = vst [vmem:[#allocation56_spill] sm:$0xff] %v3809_v35  ;;  %v1455_v42 = vsub.f32 %v1429_v54, %v1447_v37  ;;  %2734 = vrsqrt.f32 %v3797_v2  ;;  %v1004_v51 = vmul.f32 %v3809_v35, %v3445_v16  ;;  %vm841_vm8 = vcmp.eq.f32.partialorder %v3763_v36, inf }
 0x509   :  { %v2719_v14 = vpop.eup %2718  ;;  %v957_v29 = vmul.f32 %v2717_v28, %v932_v39  ;;  %v3831_v39 = vmul.f32 %v3581_v5, %v3581_v5  ;;  %v3834_v38 = vmax.f32 %v795_v21, 0.0  ;;  %2736 = vrsqrt.f32 %v3818_v57 }
 0x50a   :  { %v926_v23 = vsub.f32 %v2719_v14, %v2715_v19  ;;  %v2721_v0 = vpop.eup %2720  ;;  %v3841_v28 = vmax.f32 %v1455_v42, 0.0  ;;  %vm1480_vm9 = vcmp.eq.f32.partialorder %v3757_v15, 0.0  ;;  %vm1471_vm10 = vcmp.eq.f32.partialorder %v3793_v47, inf }
 0x50b   :  { %v2723_v22 = vpop.eup %2722  ;;  %v3826_v33 = vsel %vm940_vm5, 1.0, %v957_v29  ;;  %v900_v29 = vmul.f32 1.442695, %v888_v52  ;;  %2738 = vrsqrt.f32 %v3834_v38  ;;  %vm1473_vm11 = vcmp.eq.f32.partialorder %v3793_v47, 0.0 }
 0x50c   :  { %4730 = vst [vmem:[#allocation57_spill] sm:$0xff] %v3826_v33  ;;  %v1477_v1 = vmul.f32 %v2723_v22, %v3757_v15  ;;  %v1012_v54 = vmul.f32 %v3826_v33, %v3626_v43  ;;  %v934_v37 = vmul.f32 0.5, %v926_v23  ;;  %v876_v22 = vmul.f32 1.442695, %v3815_v44 }
 0x50d   :  { %v2725_v34 = vpop.eup %2724  ;;  %v1481_v43 = vand.u32 2147483648, %v3757_v15  ;;  %v910_v23 = vadd.f32 %v2719_v14, %v2715_v19  ;;  %2740 = vrsqrt.f32 %v3841_v28  ;;  %v844_v19 = vand.u32 2147483648, %v3763_v36 }
 0x50e   :  { %v2727_v17 = vpop.eup %2726  ;;  %v1020_v21 = vadd.f32 %v1012_v54, %v1004_v51  ;;  %v961_v35 = vmul.f32 %v2721_v0, %v934_v37  ;;  %v1479_v45 = vsel %vm1478_vm15, %v3757_v15, %v1477_v1  ;;  %v840_v51 = vmul.f32 %v2725_v34, %v3763_v36 }
 0x50f   :  { %v2729_v62 = vpop.eup %2728  ;;  %v952_v54 = vmax.f32 %v3815_v44, 1e-12  ;;  %2742 = vpow2.f32 %v876_v22  ;;  %v1482_v34 = vsel %vm1480_vm9, %v1481_v43, %v1479_v45  ;;  %vm1492_vm12 = vcmp.eq.f32.partialorder %v3797_v2, inf }
 0x510   :  { %v927_v33 = vsub.f32 %v2727_v17, %v2729_v62  ;;  %1701 = vrot.lane.b32.xlu1 %v1020_v21, %s2824_s9  ;;  %v911_v0 = vadd.f32 %v2729_v62, %v2727_v17  ;;  %v2731_v58 = vpop.eup %2730  ;;  %v3862_v14 = vsel %vm942_vm6, 1.0, %v961_v35  ;;  %2744 = vpow2.f32 %v900_v29 }
 0x511   :  { %v1438_v42 = vpop.xlane.xlu1 %1437  ;;  %v2733_v1 = vpop.eup %2732  ;;  %v851_v21 = vand.u32 2147483648, %v3818_v57  ;;  %v3869_v17 = vmin.f32 %v1482_v34, 85.0  ;;  %v1495_v45 = vand.u32 2147483648, %v3797_v2  ;;  %2746 = vrcp.f32 %v952_v54 }
 0x512   :  { %v1458_v52 = vsub.f32 %v1438_v42, %v3813_v27  ;;  %v935_v37 = vmul.f32 0.5, %v927_v33  ;;  %v3867_v27 = vmul.f32 0.5, %v910_v23  ;;  %v2735_v12 = vpop.eup %2734  ;;  %v842_v35 = vsel %vm841_vm8, %v3763_v36, %v840_v51 }
 0x513   :  { %v3882_v22 = vmul.f32 0.5, %v911_v0  ;;  %v1535_v23 = vmul.f32 1.442695, %v3869_v17  ;;  %v1550_v54 = vsub.f32 0.0, %v3869_v17  ;;  %v2737_v51 = vpop.eup %2736  ;;  %vm843_vm13 = vcmp.eq.f32.partialorder %v3763_v36, 0.0 }
 0x514   :  { %1733 = vrot.lane.b32.xlu1 %v3767_v53, %s2824_s9  ;;  %4731 = vst [vmem:[#allocation58_spill] sm:$0xff] %v3867_v27  ;;  %v963_v33 = vmul.f32 %v2731_v58, %v935_v37  ;;  %v3877_v53 = vmax.f32 %v1458_v52, 0.0  ;;  %v1014_v58 = vmul.f32 %v3862_v14, %v3638_v56  ;;  %v1470_v52 = vmul.f32 %v2733_v1, %v3793_v47 }
 0x515   :  { %v1444_v62 = vpop.xlane.xlu0 %1443  ;;  %v1435_v15 = vpop.xlane.xlu1 %1434  ;;  %v1006_v56 = vmul.f32 %v3867_v27, %v3452_v26  ;;  %v1559_v0 = vmul.f32 1.442695, %v1550_v54  ;;  %v845_v37 = vsel %vm843_vm13, %v844_v19, %v842_v35  ;;  %vm855_vm14 = vcmp.eq.f32.partialorder %v3834_v38, inf }
 0x516   :  { %v1460_v29 = vsub.f32 %v1444_v62, %v3823_v3  ;;  %v1457_v43 = vsub.f32 %v1435_v15, %v3803_v40  ;;  %v3887_v42 = vsel %vm943_vm7, 1.0, %v963_v33  ;;  %v1491_v3 = vmul.f32 %v2735_v12, %v3797_v2  ;;  %v2739_v34 = vpop.eup %2738 }
 0x517   :  { %v1015_v40 = vmul.f32 %v3887_v42, %v3649_v31  ;;  %v1488_v62 = vand.u32 2147483648, %v3841_v28  ;;  %2748 = vrsqrt.f32 %v3877_v53  ;;  %v2741_v15 = vpop.eup %2740  ;;  %v3906_v33 = vmul.f32 %v2737_v51, %v3818_v57 }
 0x518   :  { %1735 = vrot.lane.b32.xlu1 %v3775_v11, %s2824_s9  ;;  %v3898_v6 = vmax.f32 %v1460_v29, 0.0  ;;  %v1022_v11 = vadd.f32 %v1014_v58, %v1006_v56  ;;  %v3909_v36 = vmax.f32 %v1457_v43, 0.0  ;;  %v1007_v31 = vmul.f32 %v3882_v22, %v3411_v13 }
 0x519   :  { %vm944_vm2 = vcmp.lt.f32.partialorder %v3815_v44, 1e-06  ;;  %2750 = vpow2.f32 %v1535_v23  ;;  %v2743_v19 = vpop.eup %2742  ;;  %v1614_v12 = vmax.f32 %v3869_v17, 1e-12  ;;  %v3916_v35 = vmin.f32 %v845_v37, 85.0 }
 0x51a   :  { %2752 = vpow2.f32 %v1559_v0  ;;  %v1472_v29 = vsel %vm1471_vm10, %v3793_v47, %v1470_v52  ;;  %v2745_v58 = vpop.eup %2744  ;;  %vm848_vm3 = vcmp.eq.f32.partialorder %v3818_v57, inf  ;;  %v1023_v43 = vadd.f32 %v1015_v40, %v1007_v31 }
 0x51b   :  { %2754 = vrsqrt.f32 %v3898_v6  ;;  %v4732_v23 = vand.u32 2147483648, %v3793_v47  ;;  %v1493_v51 = vsel %vm1492_vm12, %v3797_v2, %v1491_v3  ;;  %v912_v56 = vadd.f32 %v2745_v58, %v2743_v19 }
 0x51c   :  { %1705 = vrot.lane.b32.xlu1 %v1022_v11, %s2824_s9  ;;  %v928_v0 = vsub.f32 %v2743_v19, %v2745_v58  ;;  %v878_v37 = vmul.f32 1.442695, %v3916_v35  ;;  %v889_v52 = vsub.f32 0.0, %v3916_v35  ;;  %v2747_v11 = vpop.eup %2746  ;;  %v854_v1 = vmul.f32 %v2739_v34, %v3834_v38 }
 0x51d   :  { %v1475_v54 = vsel %vm1473_vm11, %v4732_v23, %v1472_v29  ;;  %2756 = vrsqrt.f32 %v3909_v36  ;;  %vm1494_vm5 = vcmp.eq.f32.partialorder %v3797_v2, 0.0  ;;  %v1484_v47 = vmul.f32 %v2741_v15, %v3841_v28  ;;  %v4734_v23 = vld [vmem:[#allocation51_spill] sm:$0xff] }
 0x51e   :  { %v3934_v40 = vmin.f32 %v1475_v54, 85.0  ;;  %v936_v3 = vmul.f32 0.5, %v928_v0  ;;  %2758 = vrcp.f32 %v1614_v12  ;;  %v1496_v31 = vsel %vm1494_vm5, %v1495_v45, %v1493_v51 }
 0x51f   :  { %vm1485_vm6 = vcmp.eq.f32.partialorder %v3841_v28, inf  ;;  %v3940_v19 = vmul.f32 0.5, %v912_v56  ;;  %v902_v29 = vmul.f32 1.442695, %v889_v52  ;;  %2760 = vpow2.f32 %v878_v37 }
 0x520   :  { %1707 = vrot.lane.b32.xlu1 %v1023_v43, %s2824_s9  ;;  %v1533_v34 = vmul.f32 1.442695, %v3934_v40  ;;  %v1549_v58 = vsub.f32 0.0, %v3934_v40  ;;  %v965_v54 = vmul.f32 %v2747_v11, %v936_v3  ;;  %v953_v2 = vmax.f32 %v3916_v35, 1e-12 }
 0x521   :  { %vm1506_vm15 = vcmp.eq.f32.partialorder %v3877_v53, inf  ;;  %2762 = vpow2.f32 %v902_v29  ;;  %v1613_v45 = vmax.f32 %v3934_v40, 1e-12  ;;  %v3948_v12 = vmin.f32 %v1496_v31, 85.0  ;;  %v2749_v43 = vpop.eup %2748 }
 0x522   :  { %v1557_v15 = vmul.f32 1.442695, %v1549_v58  ;;  %v856_v51 = vsel %vm855_vm14, %v3834_v38, %v854_v1  ;;  %v3955_v56 = vmul.f32 %v3887_v42, %v3621_v59  ;;  %v3961_v0 = vsel %vm944_vm2, 1.0, %v965_v54 }
 0x523   :  { %2764 = vpow2.f32 %v1533_v34  ;;  %v2751_v37 = vpop.eup %2750  ;;  %vm857_vm7 = vcmp.eq.f32.partialorder %v3834_v38, 0.0  ;;  %v1008_v52 = vmul.f32 %v3940_v19, %v3459_v7  ;;  %v1016_v1 = vmul.f32 %v3961_v0, %v3659_v24 }
 0x524   :  { %1739 = vrot.lane.b32.xlu1 %v3781_v60, %s2824_s9  ;;  %vm1606_vm8 = vcmp.lt.f32.partialorder %v3869_v17, 1e-06  ;;  %2766 = vpow2.f32 %v1557_v15  ;;  %v2753_v59 = vpop.eup %2752  ;;  %v1539_v60 = vmul.f32 1.442695, %v3948_v12  ;;  %v1552_v44 = vsub.f32 0.0, %v3948_v12 }
 0x525   :  { %2768 = vrcp.f32 %v953_v2  ;;  %v849_v42 = vsel %vm848_vm3, %v3818_v57, %v3906_v33  ;;  %v2755_v11 = vpop.eup %2754  ;;  %v1024_v3 = vadd.f32 %v1016_v1, %v1008_v52  ;;  %v1574_v31 = vadd.f32 %v2753_v59, %v2751_v37 }
 0x526   :  { %v1590_v29 = vsub.f32 %v2751_v37, %v2753_v59  ;;  %2770 = vrcp.f32 %v1613_v45  ;;  %v1505_v24 = vmul.f32 %v2749_v43, %v3877_v53  ;;  %v1563_v34 = vmul.f32 1.442695, %v1552_v44 }
 0x527   :  { %2772 = vpow2.f32 %v1539_v60  ;;  %vm850_vm9 = vcmp.eq.f32.partialorder %v3818_v57, 0.0  ;;  %v2757_v58 = vpop.eup %2756  ;;  %v3978_v54 = vmul.f32 0.5, %v1574_v31  ;;  %v1616_v15 = vmax.f32 %v3948_v12, 1e-12 }
 0x528   :  { %1709 = vrot.lane.b32.xlu1 %v1024_v3, %s2824_s9  ;;  %v1598_v2 = vmul.f32 0.5, %v1590_v29  ;;  %v852_v33 = vsel %vm850_vm9, %v851_v21, %v849_v42  ;;  %v2759_v52 = vpop.eup %2758  ;;  %2774 = vpow2.f32 %v1563_v34  ;;  %v1486_v37 = vsel %vm1485_vm6, %v3841_v28, %v1484_v47 }
 0x529   :  { %v3984_v43 = vmin.f32 %v852_v33, 85.0  ;;  %vm945_vm10 = vcmp.lt.f32.partialorder %v3916_v35, 1e-06  ;;  %vm1487_vm11 = vcmp.eq.f32.partialorder %v3841_v28, 0.0  ;;  %v2761_v60 = vpop.eup %2760  ;;  %v3995_v57 = vsel %vm1506_vm15, %v3877_v53, %v1505_v24 }
 0x52a   :  { %v1624_v59 = vmul.f32 %v2759_v52, %v1598_v2  ;;  %v1489_v47 = vsel %vm1487_vm11, %v1488_v62, %v1486_v37  ;;  %vm1520_vm12 = vcmp.eq.f32.partialorder %v3898_v6, inf  ;;  %v1670_v31 = vmul.f32 %v3978_v54, %v3229_v49 }
 0x52b   :  { %v880_v21 = vmul.f32 1.442695, %v3984_v43  ;;  %v890_v44 = vsub.f32 0.0, %v3984_v43  ;;  %v2763_v42 = vpop.eup %2762  ;;  %2776 = vrcp.f32 %v1616_v15  ;;  %v4008_v29 = vmin.f32 %v1489_v47, 85.0 }
 0x52c   :  { %v4004_v3 = vsel %vm1606_vm8, 1.0, %v1624_v59  ;;  %v913_v2 = vadd.f32 %v2763_v42, %v2761_v60  ;;  %v929_v28 = vsub.f32 %v2761_v60, %v2763_v42  ;;  %vm1605_vm13 = vcmp.lt.f32.partialorder %v3934_v40, 1e-06 }
 0x52d   :  { %v2765_v24 = vpop.eup %2764  ;;  %v1678_v34 = vmul.f32 %v4004_v3, %v3513_v20  ;;  %v4733_v62 = vand.u32 2147483648, %v3834_v38  ;;  %2778 = vpow2.f32 %v880_v21  ;;  %v904_v52 = vmul.f32 1.442695, %v890_v44 }
 0x52e   :  { %v2767_v33 = vpop.eup %2766  ;;  %v1537_v15 = vmul.f32 1.442695, %v4008_v29  ;;  %v1551_v37 = vsub.f32 0.0, %v4008_v29  ;;  %vm1499_vm14 = vcmp.eq.f32.partialorder %v3909_v36, inf  ;;  %v4020_v47 = vmul.f32 0.5, %v913_v2 }
 0x52f   :  { %v859_v17 = vsel %vm857_vm7, %v4733_v62, %v856_v51  ;;  %v2769_v59 = vpop.eup %2768  ;;  %v1686_v20 = vadd.f32 %v1678_v34, %v1670_v31  ;;  %v937_v60 = vmul.f32 0.5, %v929_v28  ;;  %v1573_v42 = vadd.f32 %v2767_v33, %v2765_v24 }
 0x530   :  { %v2771_v1 = vpop.eup %2770  ;;  %v1589_v45 = vsub.f32 %v2765_v24, %v2767_v33  ;;  %2780 = vpow2.f32 %v904_v52  ;;  %v954_v38 = vmax.f32 %v3984_v43, 1e-12  ;;  %v1561_v51 = vmul.f32 1.442695, %v1551_v37  ;;  %v4736_v52 = vld [vmem:[#allocation52_spill] sm:$0xff] }
 0x531   :  { %v2773_v21 = vpop.eup %2772  ;;  %v1519_v44 = vmul.f32 %v2755_v11, %v3898_v6  ;;  %v1498_v62 = vmul.f32 %v2757_v58, %v3909_v36  ;;  %v4027_v27 = vmul.f32 %v3961_v0, %v4734_v23  ;;  %1767 = vrot.lane.b32.xlu0 %v1686_v20, %s2825_s17  ;;  %v967_v31 = vmul.f32 %v2769_v59, %v937_v60  ;;  %v4735_v0 = vld [vmem:[#allocation33_spill] sm:$0xff] }
 0x532   :  { %v4030_v34 = vmul.f32 0.5, %v1573_v42  ;;  %v1597_v24 = vmul.f32 0.5, %v1589_v45  ;;  %2782 = vpow2.f32 %v1537_v15  ;;  %v4032_v28 = vmin.f32 %v859_v17, 85.0  ;;  %v2775_v33 = vpop.eup %2774 }
 0x533   :  { %vm1508_vm2 = vcmp.eq.f32.partialorder %v3877_v53, 0.0  ;;  %vm1522_vm3 = vcmp.eq.f32.partialorder %v3898_v6, 0.0  ;;  %v977_v23 = vsel %vm945_vm10, 1.0, %v967_v31  ;;  %v1009_v11 = vmul.f32 %v4020_v47, %v4735_v0  ;;  %v4737_v31 = vld [vmem:[#allocation16_spill] sm:$0xff] }
 0x534   :  { %v1441_v2 = vpop.xlane.xlu1 %1440  ;;  %2784 = vpow2.f32 %v1561_v51  ;;  %v1615_v58 = vmax.f32 %v4008_v29, 1e-12  ;;  %v1017_v45 = vmul.f32 %v977_v23, %v4736_v52  ;;  %v1622_v15 = vmul.f32 %v2771_v1, %v1597_v24  ;;  %v4738_v24 = vld [vmem:[#allocation42_spill] sm:$0xff] }
 0x535   :  { %v1576_v37 = vadd.f32 %v2775_v33, %v2773_v21  ;;  %2786 = vrcp.f32 %v954_v38  ;;  %v1521_v17 = vsel %vm1520_vm12, %v3898_v6, %v1519_v44  ;;  %v1592_v59 = vsub.f32 %v2773_v21, %v2775_v33  ;;  %v2777_v60 = vpop.eup %2776 }
 0x536   :  { %v1459_v20 = vsub.f32 %v1441_v2, %v3831_v39  ;;  %v882_v35 = vmul.f32 1.442695, %v4032_v28  ;;  %v1025_v42 = vadd.f32 %v1017_v45, %v1009_v11  ;;  %v4049_v51 = vsel %vm1605_vm13, 1.0, %v1622_v15 }
 0x537   :  { %v1669_v1 = vmul.f32 %v4030_v34, %v4737_v31  ;;  %v891_v38 = vsub.f32 0.0, %v4032_v28  ;;  %v1677_v52 = vmul.f32 %v4049_v51, %v4738_v24  ;;  %v1600_v44 = vmul.f32 0.5, %v1592_v59  ;;  %v2779_v39 = vpop.eup %2778  ;;  %v4739_v59 = vld [vmem:[#allocation37_spill] sm:$0xff] }
 0x538   :  { %2788 = vrcp.f32 %v1615_v58  ;;  %v4056_v21 = vmax.f32 %v1459_v20, 0.0  ;;  %v4061_v2 = vsel %vm1499_vm14, %v3909_v36, %v1498_v62  ;;  %1711 = vrot.lane.b32.xlu1 %v1025_v42, %s2824_s9  ;;  %v4064_v40 = vmul.f32 0.5, %v1576_v37 }
 0x539   :  { %2790 = vpow2.f32 %v882_v35  ;;  %v906_v33 = vmul.f32 1.442695, %v891_v38  ;;  %v1685_v11 = vadd.f32 %v1677_v52, %v1669_v1  ;;  %vm1608_vm5 = vcmp.lt.f32.partialorder %v3948_v12, 1e-06 }
 0x53a   :  { %v1628_v45 = vmul.f32 %v2777_v60, %v1600_v44  ;;  %2792 = vrsqrt.f32 %v4056_v21  ;;  %v2781_v58 = vpop.eup %2780  ;;  %v4070_v15 = vmul.f32 %v4004_v3, %v3495_v18  ;;  %v4074_v62 = vmul.f32 %v3978_v54, %v4739_v59  ;;  %v4740_v18 = vld [vmem:[#allocation19_spill] sm:$0xff]  ;;  %v4741_v54 = vld [vmem:[#allocation44_spill] sm:$0xff] }
 0x53b   :  { %vm946_vm6 = vcmp.lt.f32.partialorder %v3984_v43, 1e-06  ;;  %2794 = vpow2.f32 %v906_v33  ;;  %1765 = vrot.lane.b32.xlu0 %v1685_v11, %s2825_s17  ;;  %v914_v12 = vadd.f32 %v2781_v58, %v2779_v39  ;;  %v930_v20 = vsub.f32 %v2779_v39, %v2781_v58 }
 0x53c   :  { %v4078_v37 = vsel %vm1608_vm5, 1.0, %v1628_v45  ;;  %v955_v35 = vmax.f32 %v4032_v28, 1e-12  ;;  %v2783_v60 = vpop.eup %2782  ;;  %1743 = vrot.lane.b32.xlu1 %v3791_v8, %s2824_s9  ;;  %v1672_v3 = vmul.f32 %v4064_v40, %v4740_v18  ;;  %v4742_v1 = vand.u32 2147483648, %v3877_v53 }
 0x53d   :  { %v1680_v42 = vmul.f32 %v4078_v37, %v4741_v54  ;;  %v4743_v24 = vand.u32 2147483648, %v3898_v6  ;;  %v4096_v39 = vmul.f32 0.5, %v914_v12  ;;  %v938_v8 = vmul.f32 0.5, %v930_v20  ;;  %v4744_v20 = vld [vmem:[#allocation36_spill] sm:$0xff] }
 0x53e   :  { %v1510_v38 = vsel %vm1508_vm2, %v4742_v1, %v3995_v57  ;;  %v2785_v44 = vpop.eup %2784  ;;  %2796 = vrcp.f32 %v955_v35  ;;  %vm1501_vm15 = vcmp.eq.f32.partialorder %v3909_v36, 0.0  ;;  %vm1607_vm7 = vcmp.lt.f32.partialorder %v4008_v29, 1e-06 }
 0x53f   :  { %v1524_v52 = vsel %vm1522_vm3, %v4743_v24, %v1521_v17  ;;  %v4098_v33 = vmin.f32 %v1510_v38, 85.0  ;;  %v2787_v11 = vpop.eup %2786  ;;  %v1688_v45 = vadd.f32 %v1680_v42, %v1672_v3  ;;  %v1575_v58 = vadd.f32 %v2785_v44, %v2783_v60  ;;  %v4745_v38 = vld [vmem:[#allocation35_spill] sm:$0xff] }
 0x540   :  { %v1591_v54 = vsub.f32 %v2783_v60, %v2785_v44  ;;  %v4101_v53 = vmin.f32 %v1524_v52, 85.0  ;;  %v969_v57 = vmul.f32 %v2787_v11, %v938_v8  ;;  %v4107_v12 = vmul.f32 %v977_v23, %v3665_v4  ;;  %v4746_v44 = vld [vmem:[#allocation53_spill] sm:$0xff] }
 0x541   :  { %v1543_v6 = vmul.f32 1.442695, %v4098_v33  ;;  %v1554_v17 = vsub.f32 0.0, %v4098_v33  ;;  %v4111_v35 = vmul.f32 %v4030_v34, %v4744_v20  ;;  %1771 = vrot.lane.b32.xlu0 %v1688_v45, %s2825_s17  ;;  %v4114_v3 = vmul.f32 0.5, %v1575_v58 }
 0x542   :  { %v1599_v60 = vmul.f32 0.5, %v1591_v54  ;;  %v2789_v42 = vpop.eup %2788  ;;  %v4118_v1 = vsel %vm946_vm6, 1.0, %v969_v57  ;;  %v1010_v24 = vmul.f32 %v4096_v39, %v4745_v38  ;;  %v1618_v4 = vmax.f32 %v4098_v33, 1e-12 }
 0x543   :  { %v1567_v52 = vmul.f32 1.442695, %v1554_v17  ;;  %v2791_v23 = vpop.eup %2790  ;;  %v1018_v34 = vmul.f32 %v4118_v1, %v4746_v44  ;;  %2798 = vpow2.f32 %v1543_v6  ;;  %v1547_v11 = vmul.f32 1.442695, %v4101_v53  ;;  %v4747_v17 = vld [vmem:[#allocation17_spill] sm:$0xff] }
 0x544   :  { %v1626_v8 = vmul.f32 %v2789_v42, %v1599_v60  ;;  %v2793_v45 = vpop.eup %2792  ;;  %vm1513_vm8 = vcmp.eq.f32.partialorder %v4056_v21, inf  ;;  %vm1515_vm9 = vcmp.eq.f32.partialorder %v4056_v21, 0.0  ;;  %v1556_v43 = vsub.f32 0.0, %v4101_v53  ;;  %v4748_v60 = vld [vmem:[#allocation43_spill] sm:$0xff] }
 0x545   :  { %2800 = vpow2.f32 %v1567_v52  ;;  %v2795_v58 = vpop.eup %2794  ;;  %v1026_v54 = vadd.f32 %v1018_v34, %v1010_v24  ;;  %v1671_v44 = vmul.f32 %v4114_v3, %v4747_v17  ;;  %v1512_v6 = vmul.f32 %v2793_v45, %v4056_v21 }
 0x546   :  { %v1639_v57 = vsel %vm1607_vm7, 1.0, %v1626_v8  ;;  %v915_v20 = vadd.f32 %v2795_v58, %v2791_v23  ;;  %v931_v59 = vsub.f32 %v2791_v23, %v2795_v58  ;;  %2802 = vrcp.f32 %v1618_v4 }
 0x547   :  { %v1679_v42 = vmul.f32 %v1639_v57, %v4748_v60  ;;  %1713 = vrot.lane.b32.xlu1 %v1026_v54, %s2824_s9  ;;  %v1514_v52 = vsel %vm1513_vm8, %v4056_v21, %v1512_v6  ;;  %v1516_v31 = vand.u32 2147483648, %v4056_v21  ;;  %2804 = vpow2.f32 %v1547_v11  ;;  %v4751_v6 = vld [vmem:[#allocation34_spill] sm:$0xff] }
 0x548   :  { %v1571_v24 = vmul.f32 1.442695, %v1556_v43  ;;  %v2797_v29 = vpop.eup %2796  ;;  %v939_v8 = vmul.f32 0.5, %v931_v59  ;;  %v1620_v17 = vmax.f32 %v4101_v53, 1e-12  ;;  %v4749_v45 = vand.u32 2147483648, %v3909_v36 }
 0x549   :  { %v1687_v34 = vadd.f32 %v1679_v42, %v1671_v44  ;;  %v4144_v4 = vmul.f32 0.5, %v915_v20  ;;  %v1517_v11 = vsel %vm1515_vm9, %v1516_v31, %v1514_v52  ;;  %v1653_v43 = vmul.f32 %v4049_v51, %v3492_v61  ;;  %v4750_v59 = vld [vmem:[#allocation39_spill] sm:$0xff] }
 0x54a   :  { %v1503_v23 = vsel %vm1501_vm15, %v4749_v45, %v4061_v2  ;;  %2806 = vpow2.f32 %v1571_v24  ;;  %v4154_v54 = vmul.f32 %v4064_v40, %v4750_v59  ;;  %v971_v44 = vmul.f32 %v2797_v29, %v939_v8 }
 0x54b   :  { %v4146_v58 = vmin.f32 %v1503_v23, 85.0  ;;  %1769 = vrot.lane.b32.xlu0 %v1687_v34, %s2825_s17  ;;  %v4157_v36 = vmin.f32 %v1517_v11, 85.0  ;;  %v4161_v2 = vmul.f32 %v4078_v37, %v3515_v10  ;;  %vm947_vm10 = vcmp.lt.f32.partialorder %v4032_v28, 1e-06  ;;  %v4752_v10 = vld [vmem:[#allocation54_spill] sm:$0xff] }
 0x54c   :  { %v4166_v61 = vsel %vm947_vm10, 1.0, %v971_v44  ;;  %vm1610_vm11 = vcmp.lt.f32.partialorder %v4098_v33, 1e-06  ;;  %v1011_v60 = vmul.f32 %v4144_v4, %v4751_v6  ;;  %2808 = vrcp.f32 %v1620_v17  ;;  %v4753_v44 = vld [vmem:[#allocation38_spill] sm:$0xff] }
 0x54d   :  { %v1541_v31 = vmul.f32 1.442695, %v4146_v58  ;;  %v1553_v21 = vsub.f32 0.0, %v4146_v58  ;;  %v1545_v51 = vmul.f32 1.442695, %v4157_v36  ;;  %v1555_v40 = vsub.f32 0.0, %v4157_v36  ;;  %v2799_v20 = vpop.eup %2798 }
 0x54e   :  { %v1019_v37 = vmul.f32 %v4166_v61, %v4752_v10  ;;  %v1617_v52 = vmax.f32 %v4146_v58, 1e-12  ;;  %v1619_v29 = vmax.f32 %v4157_v36, 1e-12  ;;  %v994_v11 = vmul.f32 %v4118_v1, %v3669_v63  ;;  %v4754_v17 = vld [vmem:[#allocation30_spill] sm:$0xff] }
 0x54f   :  { %v1565_v28 = vmul.f32 1.442695, %v1553_v21  ;;  %v2801_v42 = vpop.eup %2800  ;;  %2810 = vpow2.f32 %v1541_v31  ;;  %v1569_v24 = vmul.f32 1.442695, %v1555_v40  ;;  %v1647_v10 = vmul.f32 %v4114_v3, %v4753_v44  ;;  %v1824_v63 = vld [vmem:[%s4564_s5] sm:$0xff] }
 0x550   :  { %v1027_v34 = vadd.f32 %v1019_v37, %v1011_v60  ;;  %v1578_v8 = vadd.f32 %v2801_v42, %v2799_v20  ;;  %v1594_v45 = vsub.f32 %v2799_v20, %v2801_v42  ;;  %v2803_v23 = vpop.eup %2802  ;;  %v983_v31 = vmul.f32 %v3882_v22, %v4754_v17  ;;  %v1825_v3 = vld [vmem:[%s4564_s5 + $0x8] sm:$0x1]  ;;  %s2827_s5 = smov 17  }
 0x551   :  { %2812 = vpow2.f32 %v1565_v28  ;;  %v2805_v21 = vpop.eup %2804  ;;  %v1655_v40 = vmul.f32 %v1639_v57, %v3499_v48  ;;  %vm1612_vm12 = vcmp.lt.f32.partialorder %v4101_v53, 1e-06  ;;  %v4197_v48 = vadd.f32 %v4070_v15, %v4074_v62  ;;  %v4755_v20 = vld [vmem:[#allocation27_spill] sm:$0xff] }
 0x552   :  { %2814 = vpow2.f32 %v1545_v51  ;;  %1715 = vrot.lane.b32.xlu1 %v1027_v34, %s2824_s9  ;;  %v1602_v60 = vmul.f32 0.5, %v1594_v45  ;;  %v1586_v1 = vmul.f32 0.5, %v1578_v8  ;;  %v4193_v22 = vadd.f32 %v3955_v56, %v983_v31  ;;  %v4756_v62 = vld [vmem:[#allocation31_spill] sm:$0xff]  ;;  %v4758_v8 = vld [vmem:[#allocation46_spill] sm:$0xff] }
 0x553   :  { %2816 = vpow2.f32 %v1569_v24  ;;  %v984_v37 = vmul.f32 %v3940_v19, %v4755_v20  ;;  %vm1858_vm13 = vcmask 1040384   ;;  %v2481_v24 = vpack.c.bf16 %v1825_v3, %v1824_v63  ;;  %v4760_v3 = vld [vmem:[#allocation22_spill] sm:$0xff] }
 0x554   :  { %2818 = vrcp.f32 %v1617_v52  ;;  %v2807_v57 = vpop.eup %2806  ;;  %v1632_v51 = vmul.f32 %v2803_v23, %v1602_v60  ;;  %vm2826_vm14 = vmmov 1   ;;  %v4209_v15 = vadd.f32 %v1653_v43, %v4111_v35  ;;  %v4759_v43 = vld [vmem:[#allocation28_spill] sm:$0xff] }
 0x555   :  { %2820 = vrcp.f32 %v1619_v29  ;;  %v1580_v28 = vadd.f32 %v2807_v57, %v2805_v21  ;;  %v1596_v42 = vsub.f32 %v2805_v21, %v2807_v57  ;;  %v4206_v52 = vadd.f32 %v4027_v27, %v984_v37  ;;  %vm2482_vm2 = vmpackc.low %vm1858_vm13, %vm2826_vm14  ;;  %v4757_v29 = vld [vmem:[#allocation21_spill] sm:$0xff] }
 0x556   :  { %1747 = vrot.lane.b32.xlu1 %v3807_v41, %s2824_s9  ;;  %v1642_v56 = vsel %vm1610_vm11, 1.0, %v1632_v51  ;;  %v985_v19 = vmul.f32 %v4020_v47, %v4756_v62  ;;  %v1674_v34 = vmul.f32 %v1586_v1, %v4757_v29  ;;  %2483 = vmatprep.subr.msk.bf16.mxu0 %vm2482_vm2, %v2481_v24  ;;  %v2809_v33 = vpop.eup %2808  ;;  %v4220_v31 = vadd.f32 %v4161_v2, %v4154_v54  ;;  %v4761_v51 = vld [vmem:[#allocation32_spill] sm:$0xff] }
 0x557   :  { %v1682_v45 = vmul.f32 %v1642_v56, %v4758_v8  ;;  %v1588_v23 = vmul.f32 0.5, %v1580_v28  ;;  %v1604_v41 = vmul.f32 0.5, %v1596_v42  ;;  %2486 = vmatpush3.bf16.msk.msra.mxu0 %vm2482_vm2, %v2481_v24  ;;  %v4222_v35 = vadd.f32 %v1655_v40, %v1647_v10  ;;  %v4762_v10 = vld [vmem:[#allocation41_spill] sm:$0xff] }
 0x558   :  { %v4216_v27 = vadd.f32 %v4107_v12, %v985_v19  ;;  %v986_v47 = vmul.f32 %v4096_v39, %v4759_v43  ;;  %v987_v37 = vmul.f32 %v4144_v4, %v4761_v51  ;;  %v995_v54 = vmul.f32 %v4166_v61, %v3673_v25 }
 0x559   :  { %v2811_v21 = vpop.eup %2810  ;;  %v1690_v60 = vadd.f32 %v1682_v45, %v1674_v34  ;;  %v1636_v63 = vmul.f32 %v2809_v33, %v1604_v41  ;;  %v1676_v57 = vmul.f32 %v1588_v23, %v4760_v3  ;;  %v1658_v2 = vmul.f32 %v1642_v56, %v3550_v30  ;;  %v4763_v34 = vld [vmem:[#allocation18_spill] sm:$0xff] }
 0x55a   :  { %v4229_v12 = vadd.f32 %v994_v11, %v986_v47  ;;  %v1650_v40 = vmul.f32 %v1586_v1, %v4762_v10  ;;  %v1652_v4 = vmul.f32 %v1588_v23, %v4763_v34  ;;  %v4764_v11 = vld [vmem:[#allocation47_spill] sm:$0xff]  ;;  %v4240_v41 = vadd.f32 %v995_v54, %v987_v37  ;;  %v4765_v54 = vld [vmem:[#allocation20_spill] sm:$0xff] }
 0x55b   :  { %v2813_v28 = vpop.eup %2812  ;;  %1775 = vrot.lane.b32.xlu0 %v1690_v60, %s2825_s17  ;;  %v1644_v39 = vsel %vm1612_vm12, 1.0, %v1636_v63  ;;  %vm1609_vm3 = vcmp.lt.f32.partialorder %v4146_v58, 1e-06  ;;  %vm1611_vm5 = vcmp.lt.f32.partialorder %v4157_v36, 1e-06  ;;  %v4770_v58 = vld [vmem:[#allocation48_spill] sm:$0xff] }
 0x55c   :  { %v2815_v42 = vpop.eup %2814  ;;  %v1577_v24 = vadd.f32 %v2813_v28, %v2811_v21  ;;  %v1593_v19 = vsub.f32 %v2811_v21, %v2813_v28  ;;  %v1684_v45 = vmul.f32 %v1644_v39, %v4764_v11  ;;  %v4242_v25 = vadd.f32 %v1658_v2, %v1650_v40  ;;  %v4766_v40 = vld [vmem:[#allocation45_spill] sm:$0xff]  ;;  %v4769_v11 = vld [vmem:[#allocation23_spill] sm:$0xff] }
 0x55d   :  { %v2817_v8 = vpop.eup %2816  ;;  %v1660_v30 = vmul.f32 %v1644_v39, %v3554_v55  ;;  %v4767_v39 = vld [vmem:[#allocation40_spill] sm:$0xff]  ;;  %vm1789_vm6 = vcmask 7168   ;;  %vm1806_vm15 = vcmask 39936   ;;  %vm1815_vm7 = vcmask 48128  }
 0x55e   :  { %v2819_v61 = vpop.eup %2818  ;;  %v1601_v1 = vmul.f32 0.5, %v1593_v19  ;;  %v1579_v56 = vadd.f32 %v2817_v8, %v2815_v42  ;;  %v1595_v33 = vsub.f32 %v2815_v42, %v2817_v8  ;;  %v1692_v53 = vadd.f32 %v1684_v45, %v1676_v57 }
 0x55f   :  { %v2821_v47 = vpop.eup %2820  ;;  %v1585_v60 = vmul.f32 0.5, %v1577_v24  ;;  %v4245_v63 = vadd.f32 %v1660_v30, %v1652_v4  ;;  %v4768_v4 = vld [vmem:[#allocation24_spill] sm:$0xff]  ;;  %vm1833_vm8 = vcmask 72704   ;;  %vm2260_vm9 = vcmask 154624  }
 0x560   :  { %v1630_v21 = vmul.f32 %v2819_v61, %v1601_v1  ;;  %v1587_v23 = vmul.f32 0.5, %v1579_v56  ;;  %v1603_v28 = vmul.f32 0.5, %v1595_v33  ;;  %1779 = vrot.lane.b32.xlu1 %v1692_v53, %s2825_s17  ;;  %vm2269_vm10 = vcmask 171008  }
 0x561   :  { %v1673_v2 = vmul.f32 %v1585_v60, %v4765_v54  ;;  %v1649_v24 = vmul.f32 %v1585_v60, %v4767_v39  ;;  %vm2278_vm11 = vcmask 179200   ;;  %vm2287_vm12 = vcmask 203776  }
 0x562   :  { %v1641_v37 = vsel %vm1609_vm3, 1.0, %v1630_v21  ;;  %v1634_v55 = vmul.f32 %v2821_v47, %v1603_v28  ;;  %v1675_v8 = vmul.f32 %v1587_v23, %v4768_v4  ;;  %v1651_v45 = vmul.f32 %v1587_v23, %v4769_v11  ;;  %v4779_v47 = vld [vmem:[#allocation4_spill] sm:$0xff] }
 0x563   :  { %v1681_v42 = vmul.f32 %v1641_v37, %v4766_v40  ;;  %v1657_v57 = vmul.f32 %v1641_v37, %v3517_v9  ;;  %v4780_v37 = vld [vmem:[#allocation50_spill] sm:$0xff] }
 0x564   :  { %v1643_v19 = vsel %vm1611_vm5, 1.0, %v1634_v55  ;;  %2125 = vrot.lane.b32.xlu1 %v3404_v32, %s2827_s5  ;;  %v4771_v32 = vld [vmem:[#allocation5_spill] sm:$0xff]  ;;  %v4781_v55 = vld [vmem:[#allocation7_spill] sm:$0xff] }
 0x565   :  { %v1689_v30 = vadd.f32 %v1681_v42, %v1673_v2  ;;  %v1683_v36 = vmul.f32 %v1643_v19, %v4770_v58  ;;  %v4259_v61 = vadd.f32 %v1657_v57, %v1649_v24  ;;  %v1659_v1 = vmul.f32 %v1643_v19, %v3581_v5  ;;  %v4782_v2 = vld [vmem:[#allocation55_spill] sm:$0xff]  ;;  %v4783_v57 = vld [vmem:[#allocation26_spill] sm:$0xff] }
 0x566   :  { %v4784_v24 = vld [vmem:[#allocation58_spill] sm:$0xff] }
 0x567   :  { %1773 = vrot.lane.b32.xlu0 %v1689_v30, %s2825_s17  ;;  %v1691_v9 = vadd.f32 %v1683_v36, %v1675_v8  ;;  %v4263_v56 = vadd.f32 %v1659_v1, %v1651_v45  ;;  %v1704_v21 = vpop.permute.xlu0 %1703  ;;  %v982_v19 = vmul.f32 %v4784_v24, %v4783_v57  ;;  %v4786_v36 = vld [vmem:[#allocation17_spill] sm:$0xff] }
 0x568   :  { %2129 = vrot.lane.b32.xlu1 %v3411_v13, %s2827_s5  ;;  %v4772_v13 = vld [vmem:[#allocation2_spill] sm:$0xff]  ;;  %v1791_v40 = vsel %vm1789_vm6, %v4782_v2, %v1704_v21 }
 0x56b   :  { %1777 = vrot.lane.b32.xlu0 %v1691_v9, %s2825_s17  ;;  %v1738_v30 = vpop.permute.xlu0 %1737  ;;  %v4787_v9 = vld [vmem:[#allocation11_spill] sm:$0xff] }
 0x56c   :  { %2133 = vrot.lane.b32.xlu1 %v4735_v0, %s2827_s5  ;;  %v4777_v0 = vld [vmem:[#allocation25_spill] sm:$0xff] }
 0x56f   :  { %2123 = vrot.lane.b32.xlu0 %v3445_v16, %s2827_s5  ;;  %v4773_v16 = vld [vmem:[#allocation6_spill] sm:$0xff] }
 0x570   :  { %2137 = vrot.lane.b32.xlu1 %v4751_v6, %s2827_s5 }
 0x573   :  { %2127 = vrot.lane.b32.xlu0 %v3452_v26, %s2827_s5  ;;  %v4774_v26 = vld [vmem:[#allocation49_spill] sm:$0xff] }
 0x574   :  { %2157 = vrot.lane.b32.xlu1 %v2950_v46, %s2827_s5  ;;  %v4775_v46 = vld [vmem:[#allocation57_spill] sm:$0xff] }
 0x575   :  { %v988_v5 = vmul.f32 %v4775_v46, %v4774_v26 }
 0x577   :  { %2131 = vrot.lane.b32.xlu0 %v3459_v7, %s2827_s5  ;;  %v4776_v7 = vld [vmem:[#allocation3_spill] sm:$0xff] }
 0x578   :  { %2161 = vrot.lane.b32.xlu1 %v2957_v50, %s2827_s5  ;;  %v4778_v50 = vld [vmem:[#allocation56_spill] sm:$0xff] }
 0x579   :  { %v980_v6 = vmul.f32 %v4778_v50, %v4777_v0 }
 0x57b   :  { %2135 = vrot.lane.b32.xlu0 %v4745_v38, %s2827_s5  ;;  %v996_v38 = vadd.f32 %v988_v5, %v980_v6  ;;  %v1975_v5 = vld [vmem:[%s4565_s7] sm:$0xff] }
 0x57c   :  { %2165 = vrot.lane.b32.xlu1 %v4771_v32, %s2827_s5 }
 0x57f   :  { %2155 = vrot.lane.b32.xlu0 %v4772_v13, %s2827_s5  ;;  %v4788_v13 = vld [vmem:[#allocation10_spill] sm:$0xff] }
 0x580   :  { %2169 = vrot.lane.b32.xlu1 %v4773_v16, %s2827_s5 }
 0x582   :  { %v1702_v33 = vpop.permute.xlu1 %1701 }
 0x583   :  { %2159 = vrot.lane.b32.xlu0 %v4776_v7, %s2827_s5  ;;  %v1790_v53 = vsel %vm1789_vm6, %v996_v38, %v1702_v33  ;;  %v1976_v7 = vld [vmem:[%s4565_s7 + $0x8] sm:$0xff] }
 0x584   :  { %2189 = vrot.lane.b32.xlu1 %v3229_v49, %s2828_s0  ;;  %v990_v49 = vmul.f32 %v3862_v14, %v4780_v37  ;;  %v4785_v14 = vld [vmem:[#allocation16_spill] sm:$0xff]  ;;  %v2487_v50 = vpack.c.bf16 %v1976_v7, %v1975_v5  ;;  %v4791_v33 = vld [vmem:[#allocation15_spill] sm:$0xff] }
 0x586   :  { %v1734_v60 = vpop.permute.xlu1 %1733  ;;  %v998_v8 = vadd.f32 %v990_v49, %v982_v19  ;;  %2488 = vmatprep.subr.bf16.mxu1 %v2487_v50 }
 0x587   :  { %2163 = vrot.lane.b32.xlu0 %v4779_v47, %s2827_s5  ;;  %v1798_v23 = vsel %vm1068_vm4, %v1790_v53, %v1734_v60  ;;  %2490 = vmatpush3.bf16.msra.mxu1 %v2487_v50  ;;  %v4793_v47 = vld [vmem:[#allocation12_spill] sm:$0xff]  ;;  %v4794_v60 = vld [vmem:[#allocation13_spill] sm:$0xff] }
 0x588   :  { %2193 = vrot.lane.b32.xlu1 %v4740_v18, %s2828_s0  ;;  %v1807_v28 = vsel %vm1806_vm15, %v1798_v23, %v4209_v15 }
 0x58a   :  { %v1736_v42 = vpop.permute.xlu1 %1735 }
 0x58b   :  { %2167 = vrot.lane.b32.xlu0 %v4781_v55, %s2827_s5  ;;  %v1799_v18 = vsel %vm1068_vm4, %v1791_v40, %v1736_v42 }
 0x58c   :  { %2197 = vrot.lane.b32.xlu1 %v4757_v29, %s2828_s0  ;;  %v1808_v15 = vsel %vm1806_vm15, %v1799_v18, %v4197_v48 }
 0x58e   :  { %v1706_v45 = vpop.permute.xlu1 %1705 }
 0x58f   :  { %2187 = vrot.lane.b32.xlu0 %v4785_v14, %s2828_s0  ;;  %v1792_v58 = vsel %vm1789_vm6, %v998_v8, %v1706_v45 }
 0x590   :  { %2201 = vrot.lane.b32.xlu1 %v4760_v3, %s2828_s0  ;;  %v1800_v29 = vsel %vm1068_vm4, %v1792_v58, %v1738_v30 }
 0x591   :  { %v1809_v1 = vsel %vm1806_vm15, %v1800_v29, %v4222_v35  ;;  %v4789_v35 = vld [vmem:[#allocation14_spill] sm:$0xff] }
 0x592   :  { %v1708_v48 = vpop.permute.xlu1 %1707 }
 0x593   :  { %2191 = vrot.lane.b32.xlu0 %v4786_v36, %s2828_s0  ;;  %v1793_v3 = vsel %vm1789_vm6, %v4193_v22, %v1708_v48 }
 0x594   :  { %2221 = vrot.lane.b32.xlu1 %v4787_v9, %s2828_s0 }
 0x596   :  { %v1740_v32 = vpop.permute.xlu1 %1739 }
 0x597   :  { %2195 = vrot.lane.b32.xlu0 %v4765_v54, %s2828_s0  ;;  %v1801_v16 = vsel %vm1068_vm4, %v1793_v3, %v1740_v32  ;;  %v1742_v54 = vpop.permute.xlu0 %1741  ;;  %v1978_v3 = vld [vmem:[%s4565_s7 + $0x18] sm:$0xff] }
 0x598   :  { %2225 = vrot.lane.b32.xlu1 %v4788_v13, %s2828_s0  ;;  %v1810_v26 = vsel %vm1806_vm15, %v1801_v16, %v4220_v31  ;;  %v4790_v31 = vld [vmem:[#allocation8_spill] sm:$0xff]  ;;  %v2334_v13 = vld [vmem:[%s4566_s6] ss:$0 sm:$0xff] }
 0x59a   :  { %v1710_v46 = vpop.permute.xlu1 %1709 }
 0x59b   :  { %2199 = vrot.lane.b32.xlu0 %v4768_v4, %s2828_s0  ;;  %v1794_v22 = vsel %vm1789_vm6, %v4206_v52, %v1710_v46  ;;  %v4792_v52 = vld [vmem:[#allocation9_spill] sm:$0xff]  ;;  %v1746_v38 = vpop.permute.xlu0 %1745 }
 0x59c   :  { %2229 = vrot.lane.b32.xlu1 %v4789_v35, %s2828_s0  ;;  %v1802_v4 = vsel %vm1068_vm4, %v1794_v22, %v1742_v54 }
 0x59d   :  { %v1811_v6 = vsel %vm1806_vm15, %v1802_v4, %v4259_v61 }
 0x59f   :  { %2219 = vrot.lane.b32.xlu0 %v4790_v31, %s2828_s0 }
 0x5a0   :  { %2233 = vrot.lane.b32.xlu1 %v4791_v33, %s2828_s0 }
 0x5a3   :  { %2223 = vrot.lane.b32.xlu0 %v4792_v52, %s2828_s0  ;;  %v1768_v53 = vpop.permute.xlu0 %1767 }
 0x5a4   :  { %v1817_v55 = vsel %vm1815_vm7, %v1808_v15, %v1768_v53 }
 0x5a7   :  { %2227 = vrot.lane.b32.xlu0 %v4793_v47, %s2828_s0 }
 0x5aa   :  { %v1712_v21 = vpop.permute.xlu1 %1711 }
 0x5ab   :  { %2231 = vrot.lane.b32.xlu0 %v4794_v60, %s2828_s0  ;;  %v1795_v37 = vsel %vm1789_vm6, %v4216_v27, %v1712_v21 }
 0x5ad   :  { %v1766_v61 = vpop.permute.xlu0 %1765 }
 0x5ae   :  { %v1816_v23 = vsel %vm1815_vm7, %v1807_v28, %v1766_v61  ;;  %v1744_v49 = vpop.permute.xlu1 %1743 }
 0x5af   :  { %2437 = vmatprep.mubr.msk.f32.mxu0 %vm1833_vm8, %v1816_v23  ;;  %v1803_v2 = vsel %vm1068_vm4, %v1795_v37, %v1744_v49 }
 0x5b0   :  { %2438 = vmatmul.mubr.msk.f32.vlgmr.msra.gmra.mrb[8].mxu0 %vm1833_vm8, %v1817_v55  ;;  %v1812_v40 = vsel %vm1806_vm15, %v1803_v2, %v4242_v25 }
 0x5b3   :  { %v1772_v42 = vpop.permute.xlu0 %1771 }
 0x5b4   :  { %v1819_v14 = vsel %vm1815_vm7, %v1810_v26, %v1772_v42 }
 0x5b9   :  { %v1714_v18 = vpop.permute.xlu1 %1713 }
 0x5ba   :  { %v1796_v28 = vsel %vm1789_vm6, %v4229_v12, %v1714_v18 }
 0x5bb   :  { %v1804_v24 = vsel %vm1068_vm4, %v1796_v28, %v1746_v38 }
 0x5bc   :  { %v1813_v19 = vsel %vm1806_vm15, %v1804_v24, %v4263_v56 }
 0x5bd   :  { %v1770_v27 = vpop.permute.xlu0 %1769 }
 0x5be   :  { %v1818_v15 = vsel %vm1815_vm7, %v1809_v1, %v1770_v27 }
 0x5bf   :  { %2440 = vmatprep.mubr.msk.f32.mxu0 %vm1833_vm8, %v1818_v15 }
 0x5c0   :  { %2441 = vmatmul.mubr.msk.f32.gmra.mrb[10].mxu0 %vm1833_vm8, %v1819_v14 }
 0x5c4   :  { %v1716_v25 = vpop.permute.xlu1 %1715 }
 0x5c5   :  { %v1797_v8 = vsel %vm1789_vm6, %v4240_v41, %v1716_v25 }
 0x5c8   :  { %v1748_v45 = vpop.permute.xlu1 %1747 }
 0x5c9   :  { %v1805_v12 = vsel %vm1068_vm4, %v1797_v8, %v1748_v45  ;;  %vm2251_vm4 = vcmask 138240  }
 0x5ca   :  { %v1814_v30 = vsel %vm1806_vm15, %v1805_v12, %v4245_v63  ;;  %v1977_v63 = vld [vmem:[%s4565_s7 + $0x10] sm:$0xff] }
 0x5cb   :  { %v2491_v32 = vpack.c.bf16 %v1978_v3, %v1977_v63 }
 0x5cd   :  { %v1776_v58 = vpop.permute.xlu0 %1775  ;;  %2492 = vmatprep.subr.bf16.mxu1 %v2491_v32 }
 0x5ce   :  { %v1821_v36 = vsel %vm1815_vm7, %v1812_v40, %v1776_v58  ;;  %2494 = vmatpush3.bf16.msra.mxu1 %v2491_v32 }
 0x5d2   :  { %v1780_v1 = vpop.permute.xlu1 %1779 }
 0x5d3   :  { %v1823_v9 = vsel %vm1815_vm7, %v1814_v30, %v1780_v1 }
 0x5d6   :  { %v2126_v2 = vpop.permute.xlu1 %2125 }
 0x5d9   :  { %v1774_v56 = vpop.permute.xlu0 %1773 }
 0x5da   :  { %v1820_v29 = vsel %vm1815_vm7, %v1811_v6, %v1774_v56  ;;  %v2130_v42 = vpop.permute.xlu1 %2129 }
 0x5db   :  { %2443 = vmatprep.mubr.msk.f32.mxu0 %vm1833_vm8, %v1820_v29 }
 0x5dc   :  { %2444 = vmatmul.mubr.msk.f32.gmra.mrb[12].mxu0 %vm1833_vm8, %v1821_v36 }
 0x5dd   :  { %v1778_v48 = vpop.permute.xlu0 %1777 }
 0x5de   :  { %v1822_v41 = vsel %vm1815_vm7, %v1813_v19, %v1778_v48  ;;  %v4413_v28 = vpop.permute.xlu1 %2133 }
 0x5df   :  { %2446 = vmatprep.mubr.msk.f32.mxu0 %vm1833_vm8, %v1822_v41 }
 0x5e0   :  { %2447 = vmatmul.mubr.msk.f32.gmra.mrb[14].mxu0 %vm1833_vm8, %v1823_v9  ;;  %v4436_v9 = vld [vmem:[%s4567_s8] ss:$0 sm:$0xff] }
 0x5e1   :  { %v2124_v40 = vpop.permute.xlu0 %2123 }
 0x5e2   :  { %v4417_v27 = vpop.permute.xlu1 %2137 }
 0x5e5   :  { %v2128_v18 = vpop.permute.xlu0 %2127 }
 0x5e6   :  { %v2158_v15 = vpop.permute.xlu1 %2157 }
 0x5e9   :  { %v4415_v24 = vpop.permute.xlu0 %2131 }
 0x5ea   :  { %v2162_v25 = vpop.permute.xlu1 %2161 }
 0x5ed   :  { %v4419_v19 = vpop.permute.xlu0 %2135 }
 0x5ee   :  { %v4421_v45 = vpop.permute.xlu1 %2165 }
 0x5f1   :  { %v2156_v14 = vpop.permute.xlu0 %2155 }
 0x5f2   :  { %v4425_v30 = vpop.permute.xlu1 %2169 }
 0x5f5   :  { %v2160_v8 = vpop.permute.xlu0 %2159 }
 0x5f6   :  { %v2190_v56 = vpop.permute.xlu1 %2189 }
 0x5f9   :  { %v4423_v12 = vpop.permute.xlu0 %2163 }
 0x5fa   :  { %v2194_v36 = vpop.permute.xlu1 %2193 }
 0x5fd   :  { %v4427_v58 = vpop.permute.xlu0 %2167 }
 0x5fe   :  { %v4429_v48 = vpop.permute.xlu1 %2197 }
 0x601   :  { %v2188_v29 = vpop.permute.xlu0 %2187 }
 0x602   :  { %v4438_v3 = vpop.permute.xlu1 %2201 }
 0x605   :  { %v2192_v1 = vpop.permute.xlu0 %2191 }
 0x609   :  { %v4431_v41 = vpop.permute.xlu0 %2195 }
 0x683   :  { %v2439_v16 = vpop.f32.mrb[8].mxu0 }
 0x684   :  { %v1934_v26 = vadd.f32 %v2439_v16, %v2334_v13  ;;  %v1928_v35 = vpop.f32.mrb[9].mxu0  ;;  %v4441_v16 = vpop.permute.xlu0 %2199 }
 0x685   :  { %v1929_v46 = vadd.f32 %v2334_v13, %v1928_v35  ;;  %v4795_v35 = vld [vmem:[#allocation29_spill] sm:$0xff] }
 0x686   :  { %v1968_v22 = vmax.f32 %v1934_v26, 0.0 }
 0x687   :  { %v1967_v54 = vmax.f32 %v1929_v46, 0.0 }
 0x689   :  { %2457 = vmatprep.mubr.msk.f32.mxu1 %vm201_vm1, %v1967_v54 }
 0x68a   :  { %2458 = vmatmul.mubr.msk.f32.vlgmr.msra.gmra.mrb[8].mxu1 %vm201_vm1, %v1968_v22 }
 0x693   :  { %v2442_v5 = vpop.f32.mrb[10].mxu0 }
 0x694   :  { %v1944_v7 = vadd.f32 %v2442_v5, %v2334_v13  ;;  %v1938_v31 = vpop.f32.mrb[11].mxu0 }
 0x695   :  { %v1939_v4 = vadd.f32 %v2334_v13, %v1938_v31  ;;  %v4796_v31 = vld [vmem:[#allocation37_spill] sm:$0xff] }
 0x696   :  { %v1970_v6 = vmax.f32 %v1944_v7, 0.0 }
 0x697   :  { %v1969_v50 = vmax.f32 %v1939_v4, 0.0 }
 0x699   :  { %2460 = vmatprep.mubr.msk.f32.mxu1 %vm201_vm1, %v1969_v50 }
 0x69a   :  { %2461 = vmatmul.mubr.msk.f32.gmra.mrb[10].mxu1 %vm201_vm1, %v1970_v6  ;;  %v2222_v6 = vpop.permute.xlu1 %2221 }
 0x6af   :  { %v2445_v33 = vpop.f32.mrb[12].mxu0 }
 0x6b0   :  { %v1954_v52 = vadd.f32 %v2445_v33, %v2334_v13  ;;  %v1948_v38 = vpop.f32.mrb[13].mxu0 }
 0x6b1   :  { %v1949_v47 = vadd.f32 %v2334_v13, %v1948_v38 }
 0x6b2   :  { %v1972_v21 = vmax.f32 %v1954_v52, 0.0  ;;  %v4797_v52 = vld [vmem:[#allocation36_spill] sm:$0xff] }
 0x6b3   :  { %v1971_v53 = vmax.f32 %v1949_v47, 0.0  ;;  %v2448_v60 = vpop.f32.mrb[14].mxu0  ;;  %v2220_v47 = vpop.permute.xlu0 %2219 }
 0x6b4   :  { %v1964_v61 = vadd.f32 %v2448_v60, %v2334_v13  ;;  %v1958_v23 = vpop.f32.mrb[15].mxu0 }
 0x6b5   :  { %2463 = vmatprep.mubr.msk.f32.mxu1 %vm201_vm1, %v1971_v53  ;;  %v1959_v37 = vadd.f32 %v2334_v13, %v1958_v23 }
 0x6b6   :  { %2464 = vmatmul.mubr.msk.f32.gmra.mrb[12].mxu1 %vm201_vm1, %v1972_v21  ;;  %v1974_v55 = vmax.f32 %v1964_v61, 0.0 }
 0x6b7   :  { %v1973_v49 = vmax.f32 %v1959_v37, 0.0 }
 0x6b9   :  { %2466 = vmatprep.mubr.msk.f32.mxu1 %vm201_vm1, %v1973_v49 }
 0x6ba   :  { %2467 = vmatmul.mubr.msk.f32.gmra.mrb[14].mxu1 %vm201_vm1, %v1974_v55 }
 0x75d   :  { %v2459_v63 = vpop.f32.mrb[8].mxu1 }
 0x75e   :  { %v2082_v32 = vadd.f32 %v2459_v63, %v4436_v9  ;;  %v2076_v13 = vpop.f32.mrb[9].mxu1 }
 0x75f   :  { %v2077_v26 = vadd.f32 %v4436_v9, %v2076_v13 }
 0x760   :  { %v2244_v46 = vsel %vm52_vm0, %v2082_v32, %v4795_v35  ;;  %v2226_v32 = vpop.permute.xlu1 %2225 }
 0x761   :  { %v2253_v54 = vsel %vm2251_vm4, %v2244_v46, %v2126_v2  ;;  %v2243_v22 = vsel %vm52_vm0, %v2077_v26, %v4777_v0  ;;  %v2224_v26 = vpop.permute.xlu0 %2223 }
 0x762   :  { %v2262_v5 = vsel %vm2260_vm9, %v2253_v54, %v2158_v15  ;;  %v2252_v7 = vsel %vm2251_vm4, %v2243_v22, %v2124_v40 }
 0x763   :  { %v2271_v4 = vsel %vm2269_vm10, %v2262_v5, %v4796_v31  ;;  %v2261_v50 = vsel %vm2260_vm9, %v2252_v7, %v2156_v14 }
 0x764   :  { %v2280_v33 = vsel %vm2278_vm11, %v2271_v4, %v2190_v56  ;;  %v2270_v38 = vsel %vm2269_vm10, %v2261_v50, %v4797_v52  ;;  %v2230_v5 = vpop.permute.xlu1 %2229 }
 0x765   :  { %v2289_v53 = vsel %vm2287_vm12, %v2280_v33, %v2222_v6  ;;  %v2279_v0 = vsel %vm2278_vm11, %v2270_v38, %v2188_v29  ;;  %v2228_v6 = vpop.permute.xlu0 %2227 }
 0x766   :  { %v2297_v60 = vsel %vm201_vm1, %v2289_v53, 0.0  ;;  %v2288_v21 = vsel %vm2287_vm12, %v2279_v0, %v2220_v47 }
 0x767   :  { %2305 = vst [vmem:[%s4568_s10 + $0x8] sm:$0xff] %v2297_v60  ;;  %v2296_v61 = vsel %vm201_vm1, %v2288_v21, 0.0 }
 0x768   :  { %2304 = vst [vmem:[%s4568_s10] sm:$0xff] %v2296_v61  ;;  %v2234_v47 = vpop.permute.xlu1 %2233 }
 0x769   :  { %v2232_v53 = vpop.permute.xlu0 %2231 }
 0x76d   :  { %v2462_v23 = vpop.f32.mrb[10].mxu1 }
 0x76e   :  { %v2092_v37 = vadd.f32 %v2462_v23, %v4436_v9  ;;  %v2086_v49 = vpop.f32.mrb[11].mxu1 }
 0x76f   :  { %v2087_v55 = vadd.f32 %v4436_v9, %v2086_v49 }
 0x770   :  { %v2246_v2 = vsel %vm52_vm0, %v2092_v37, %v4754_v17 }
 0x771   :  { %v2255_v40 = vsel %vm2251_vm4, %v2246_v2, %v2130_v42  ;;  %v2245_v15 = vsel %vm52_vm0, %v2087_v55, %v4783_v57 }
 0x772   :  { %v2264_v14 = vsel %vm2260_vm9, %v2255_v40, %v2162_v25  ;;  %v2254_v56 = vsel %vm2251_vm4, %v2245_v15, %v2128_v18 }
 0x773   :  { %v2273_v29 = vsel %vm2269_vm10, %v2264_v14, %v4750_v59  ;;  %v2263_v63 = vsel %vm2260_vm9, %v2254_v56, %v2160_v8 }
 0x774   :  { %v2282_v13 = vsel %vm2278_vm11, %v2273_v29, %v2194_v36  ;;  %v2272_v17 = vsel %vm2269_vm10, %v2263_v63, %v4753_v44 }
 0x775   :  { %v2291_v42 = vsel %vm2287_vm12, %v2282_v13, %v2226_v32  ;;  %v2281_v57 = vsel %vm2278_vm11, %v2272_v17, %v2192_v1 }
 0x776   :  { %v2299_v25 = vsel %vm201_vm1, %v2291_v42, 0.0  ;;  %v2290_v18 = vsel %vm2287_vm12, %v2281_v57, %v2224_v26 }
 0x777   :  { %2307 = vst [vmem:[%s4568_s10 + $0x18] sm:$0xff] %v2299_v25  ;;  %v2298_v59 = vsel %vm201_vm1, %v2290_v18, 0.0 }
 0x778   :  { %2306 = vst [vmem:[%s4568_s10 + $0x10] sm:$0xff] %v2298_v59 }
 0x789   :  { %v2465_v44 = vpop.f32.mrb[12].mxu1 }
 0x78a   :  { %v2102_v8 = vadd.f32 %v2465_v44, %v4436_v9  ;;  %v2096_v36 = vpop.f32.mrb[13].mxu1 }
 0x78b   :  { %v2097_v1 = vadd.f32 %v4436_v9, %v2096_v36 }
 0x78c   :  { %v2248_v35 = vsel %vm52_vm0, %v2102_v8, %v4756_v62 }
 0x78d   :  { %v2257_v46 = vsel %vm2251_vm4, %v2248_v35, %v4413_v28  ;;  %v2247_v54 = vsel %vm52_vm0, %v2097_v1, %v4755_v20  ;;  %v2468_v22 = vpop.f32.mrb[14].mxu1 }
 0x78e   :  { %v2266_v7 = vsel %vm2260_vm9, %v2257_v46, %v4421_v45  ;;  %v2256_v31 = vsel %vm2251_vm4, %v2247_v54, %v4415_v24  ;;  %v2112_v4 = vadd.f32 %v2468_v22, %v4436_v9  ;;  %v2106_v50 = vpop.f32.mrb[15].mxu1 }
 0x78f   :  { %v2275_v62 = vsel %vm2269_vm10, %v2266_v7, %v4762_v10  ;;  %v2265_v28 = vsel %vm2260_vm9, %v2256_v31, %v4423_v12  ;;  %v2107_v20 = vadd.f32 %v4436_v9, %v2106_v50 }
 0x790   :  { %v2284_v33 = vsel %vm2278_vm11, %v2275_v62, %v4429_v48  ;;  %v2274_v45 = vsel %vm2269_vm10, %v2265_v28, %v4767_v39  ;;  %v2250_v24 = vsel %vm52_vm0, %v2112_v4, %v4761_v51 }
 0x791   :  { %v2293_v52 = vsel %vm2287_vm12, %v2284_v33, %v2230_v5  ;;  %v2283_v38 = vsel %vm2278_vm11, %v2274_v45, %v4431_v41  ;;  %v2259_v10 = vsel %vm2251_vm4, %v2250_v24, %v4417_v27  ;;  %v2249_v12 = vsel %vm52_vm0, %v2107_v20, %v4759_v43 }
 0x792   :  { %v2301_v9 = vsel %vm201_vm1, %v2293_v52, 0.0  ;;  %v2292_v48 = vsel %vm2287_vm12, %v2283_v38, %v2228_v6  ;;  %v2268_v39 = vsel %vm2260_vm9, %v2259_v10, %v4425_v30  ;;  %v2258_v51 = vsel %vm2251_vm4, %v2249_v12, %v4419_v19 }
 0x793   :  { %2309 = vst [vmem:[%s4568_s10 + $0x28] sm:$0xff] %v2301_v9  ;;  %v2300_v41 = vsel %vm201_vm1, %v2292_v48, 0.0  ;;  %v2277_v27 = vsel %vm2269_vm10, %v2268_v39, %v4763_v34  ;;  %v2267_v43 = vsel %vm2260_vm9, %v2258_v51, %v4427_v58 }
 0x794   :  { %2308 = vst [vmem:[%s4568_s10 + $0x20] sm:$0xff] %v2300_v41  ;;  %v2286_v19 = vsel %vm2278_vm11, %v2277_v27, %v4438_v3  ;;  %v2276_v30 = vsel %vm2269_vm10, %v2267_v43, %v4769_v11 }
 0x795   :  { %v2295_v0 = vsel %vm2287_vm12, %v2286_v19, %v2234_v47  ;;  %v2285_v34 = vsel %vm2278_vm11, %v2276_v30, %v4441_v16 }
 0x796   :  { %v2303_v60 = vsel %vm201_vm1, %v2295_v0, 0.0  ;;  %v2294_v58 = vsel %vm2287_vm12, %v2285_v34, %v2232_v53 }
 0x797   :  { %2311 = vst [vmem:[%s4568_s10 + $0x38] sm:$0xff] %v2303_v60  ;;  %v2302_v21 = vsel %vm201_vm1, %v2294_v58, 0.0 }
 0x798   :  { %2310 = vst [vmem:[%s4568_s10 + $0x30] sm:$0xff] %v2302_v21 }

</bundles_post_ra>
